<compile_context>
chip_gen: v5e
topology: v5e:2x2
jax: 0.10.0
libtpu: 0.0.40
codegen_flags: <defaults>
</compile_context>

<pallas_src>
import functools

import jax
import jax.numpy as jnp
from jax import lax
from jax.experimental import pallas as pl
from jax.experimental.pallas import tpu as pltpu


# ----------------------------------------------------------------------------
# Kernel helpers
# ----------------------------------------------------------------------------
def _multi_tap_matmul(taps, w_ref, piece, compute_dtype, aligned):
    """sum_k taps[k] @ W_k, with the W_k stacked along rows inside w_ref.

    taps: list of f32 (rows, piece) slabs.  When every concat boundary is
    128-lane aligned (piece % 128 == 0) the slabs are lane-concatenated into
    ONE large-K MXU matmul (single cast, no per-tap accumulator adds);
    otherwise fall back to per-tap dots accumulated in f32.
    """
    f32 = jnp.float32
    if len(taps) == 1 or aligned:
        lhs = taps[0] if len(taps) == 1 else jnp.concatenate(taps, axis=1)
        return jnp.dot(lhs.astype(compute_dtype), w_ref[...],
                       preferred_element_type=f32)
    out = None
    for k, t in enumerate(taps):
        p = jnp.dot(t.astype(compute_dtype),
                    w_ref[k * piece:(k + 1) * piece, :],
                    preferred_element_type=f32)
        out = p if out is None else out + p
    return out


def _res_block_kernel(Ft, H, W, tk, dilation, has_branch1, use_halo,
                      aligned_a, aligned_b, fuse_c, compute_dtype, *refs):
    f32 = jnp.float32
    cd = compute_dtype
    HW = H * W
    Lt = Ft * HW
    pad = tk // 2
    halo = pad * HW

    it = iter(refs)
    x_ref = next(it)
    xp_ref = next(it) if use_halo else None
    xn_ref = next(it) if use_halo else None
    wa_ref, ta_ref = next(it), next(it)
    wb_ref, tb_ref, mb_ref = next(it), next(it), next(it)
    wcb_ref, tcb_ref = next(it), next(it)
    o_ref = next(it)

    dim_in = x_ref.shape[1]
    x = x_ref[...]                                    # (Lt, Cin) f32

    # ---- branch2 conv_a: [tk,1,1] temporal conv (BN folded) + ReLU ---------
    # token l = (t*H + h)*W + w, so temporal tap dt is a row shift of dt*HW.
    # Tiles cover whole frames; the halo arrives as two clamped block fetches
    # that are zeroed at the sequence boundaries (zero padding).
    if pad > 0:
        if use_halo:
            f = pl.program_id(1)
            nt = pl.num_programs(1)
            xp = jnp.where(f > 0, xp_ref[...], 0.0)
            xn = jnp.where(f < nt - 1, xn_ref[...], 0.0)
        else:                                         # single tile: halo == padding
            xp = jnp.zeros((halo, dim_in), f32)
            xn = jnp.zeros((halo, dim_in), f32)
        x_ext = jnp.concatenate([xp, x, xn], axis=0)  # (Lt + 2*halo, Cin)
        taps_a = [x_ext[k * HW:k * HW + Lt, :] for k in range(tk)]
    else:
        taps_a = [x]
    a = _multi_tap_matmul(taps_a, wa_ref, dim_in, cd, aligned_a)
    a = jnp.maximum(a + ta_ref[...], 0.0)             # (Lt, Ci) f32

    # ---- branch2 conv_b: [1,3,3] spatial conv (dilated, BN folded) + ReLU ---
    # Shift via pltpu.roll (XLU) + precomputed per-frame 0/1 validity mask
    # (== zero padding).  Rolled rows that wrap the tile are always masked.
    dim_inner = a.shape[1]
    mb = mb_ref[...]                                  # (Lt, 9) f32
    taps_b = []
    for kh in range(3):
        for kw in range(3):
            j = kh * 3 + kw
            s = dilation * ((kh - 1) * W + (kw - 1))
            if s == 0:
                taps_b.append(a)
            else:
                taps_b.append(pltpu.roll(a, (-s) % Lt, 0) * mb[:, j:j + 1])
    b = _multi_tap_matmul(taps_b, wb_ref, dim_inner, cd, aligned_b)
    b = jnp.maximum(b + tb_ref[...], 0.0)             # (Lt, Ci) f32

    # ---- conv_c [1,1,1] (+ fused branch1 projection) + residual + ReLU -----
    if has_branch1:
        if fuse_c:   # one MXU matmul for shortcut + conv_c: [x | b] @ [W1; Wc]
            lhs = jnp.concatenate([x, b], axis=1).astype(cd)
            y = jnp.dot(lhs, wcb_ref[...], preferred_element_type=f32)
        else:
            y = (jnp.dot(x.astype(cd), wcb_ref[:dim_in, :],
                         preferred_element_type=f32)
                 + jnp.dot(b.astype(cd), wcb_ref[dim_in:, :],
                           preferred_element_type=f32))
        y = y + tcb_ref[...]
    else:
        y = jnp.dot(b.astype(cd), wcb_ref[...],
                    preferred_element_type=f32) + tcb_ref[...] + x
    o_ref[...] = jnp.maximum(y, 0.0).astype(o_ref.dtype)


# ----------------------------------------------------------------------------
# Wrapper
# ----------------------------------------------------------------------------
def _fold_bn(w, gamma, beta, mean, var, eps):
    """Fold eval-mode BatchNorm into a bias-free conv: y = (s*W) x + t."""
    s = gamma * lax.rsqrt(var + eps)
    shift = beta - mean * s
    w_scaled = w * s.reshape((-1,) + (1,) * (w.ndim - 1))
    return w_scaled, shift


def _pick_vmem_limit():
    # v5e default scoped VMEM is 16MiB; raise it, but stay well under v7x's
    # 64MiB physical capacity.
    try:
        cap = pltpu.get_tpu_info().vmem_capacity_bytes
    except Exception:
        cap = 64 * 1024 * 1024
    return int(min(cap * 3 // 4, 96 * 1024 * 1024))


def _choose_frames_per_tile(T, HW, cin, ci, cout, tk,
                            budget_bytes=12 * 1024 * 1024):
    """Largest frame count per tile whose working set fits the budget."""
    pad = tk // 2
    per_frame = HW * 4 * ((tk + 4) * cin + 14 * ci + 4 * cout)
    best = None
    for ft in range(1, T + 1):
        if T % ft:
            continue
        if ft < T:  # tiled: (8,128) block constraint + halo-block constraints
            if (ft * HW) % 8:
                continue
            if pad and (ft % pad or (pad * HW) % 8 or T % pad):
                continue
        if best is None or ft * per_frame <= budget_bytes:
            best = ft
    return best


def res_block_forward(x_ncthw, params, *, temp_kernel_size, dilation=1,
                      eps=1e-5, compute_dtype=jnp.bfloat16,
                      frames_per_tile=None):
    """x_ncthw: (N, C_in, T, H, W) float32. Returns (N, C_out, T, H, W)."""
    N, dim_in, T, H, W = x_ncthw.shape
    HW = H * W
    L = T * HW
    tk = temp_kernel_size
    pad = tk // 2
    has_branch1 = "w_1" in params
    dim_inner = params["w_a"].shape[0]
    dim_out = params["w_c"].shape[0]

    # Frame-tile selection.
    if frames_per_tile is None:
        Ft = _choose_frames_per_tile(T, HW, dim_in, dim_inner, dim_out, tk)
    else:
        Ft = int(frames_per_tile)
        assert T % Ft == 0
        if Ft < T:
            assert (Ft * HW) % 8 == 0
            if pad:
                assert Ft % pad == 0 and (pad * HW) % 8 == 0 and T % pad == 0
    n_tiles = T // Ft
    Lt = Ft * HW
    use_halo = pad > 0 and n_tiles > 1
    aligned_a = (dim_in % 128 == 0)
    aligned_b = (dim_inner % 128 == 0)
    fuse_c = has_branch1 and (dim_in % 128 == 0)

    # NCTHW -> (N, L, C): channels on the lane axis.
    x = jnp.transpose(x_ncthw, (0, 2, 3, 4, 1)).reshape(N, L, dim_in)
    x = x.astype(jnp.float32)

    # Fold BN, reshape to K-stacked matmul form, cast to the MXU dtype.
    wa, ta = _fold_bn(params["w_a"], params["g_a"], params["b_a"],
                      params["m_a"], params["v_a"], eps)
    wa = jnp.transpose(wa[:, :, :, 0, 0], (2, 1, 0))          # (tk, Cin, Ci)
    wa_cat = wa.reshape(tk * dim_in, dim_inner).astype(compute_dtype)

    wb, tb = _fold_bn(params["w_b"], params["g_b"], params["b_b"],
                      params["m_b"], params["v_b"], eps)
    wb = jnp.transpose(wb[:, :, 0, :, :], (2, 3, 1, 0))        # (3,3,Ci,Ci)
    wb_cat = wb.reshape(9 * dim_inner, dim_inner).astype(compute_dtype)

    wc, tc = _fold_bn(params["w_c"], params["g_c"], params["b_c"],
                      params["m_c"], params["v_c"], eps)
    wc = jnp.transpose(wc[:, :, 0, 0, 0], (1, 0))              # (Ci, Cout)
    if has_branch1:
        w1, t1 = _fold_bn(params["w_1"], params["g_1"], params["b_1"],
                          params["m_1"], params["v_1"], eps)
        w1 = jnp.transpose(w1[:, :, 0, 0, 0], (1, 0))          # (Cin, Cout)
        wcb = jnp.concatenate([w1, wc], axis=0).astype(compute_dtype)
        tcb = (t1 + tc).reshape(1, dim_out).astype(jnp.float32)
    else:
        wcb = wc.astype(compute_dtype)
        tcb = tc.reshape(1, dim_out).astype(jnp.float32)

    ta = ta.reshape(1, dim_inner).astype(jnp.float32)
    tb = tb.reshape(1, dim_inner).astype(jnp.float32)

    # Per-frame spatial validity masks for the 9 conv_b taps (no in-kernel
    # integer div/mod), tiled to the frame-tile length.
    h_idx = jnp.arange(H, dtype=jnp.int32).reshape(H, 1)
    w_idx = jnp.arange(W, dtype=jnp.int32).reshape(1, W)
    cols = []
    for kh in range(3):
        for kw in range(3):
            hh = h_idx + (kh - 1) * dilation
            ww = w_idx + (kw - 1) * dilation
            valid = (hh >= 0) & (hh < H) & (ww >= 0) & (ww < W)
            cols.append(valid.reshape(HW))
    masks = jnp.tile(jnp.stack(cols, axis=1).astype(jnp.float32), (Ft, 1))

    # BlockSpecs.
    wmap = lambda n, f: (0, 0)
    in_specs = [pl.BlockSpec((None, Lt, dim_in), lambda n, f: (n, f, 0))]
    args = [x]
    if use_halo:
        fpb = Ft // pad                       # frame tile in halo-block units
        n_halo_blocks = T // pad
        prev_map = lambda n, f: (n, jnp.maximum(f * fpb - 1, 0), 0)
        next_map = lambda n, f: (n, jnp.minimum((f + 1) * fpb,
                                                n_halo_blocks - 1), 0)
        in_specs += [pl.BlockSpec((None, pad * HW, dim_in), prev_map),
                     pl.BlockSpec((None, pad * HW, dim_in), next_map)]
        args += [x, x]
    in_specs += [
        pl.BlockSpec((tk * dim_in, dim_inner), wmap),      # conv_a taps (K-stacked)
        pl.BlockSpec((1, dim_inner), wmap),                # conv_a shift
        pl.BlockSpec((9 * dim_inner, dim_inner), wmap),    # conv_b taps (K-stacked)
        pl.BlockSpec((1, dim_inner), wmap),                # conv_b shift
        pl.BlockSpec((Lt, 9), wmap),                       # spatial validity masks
        pl.BlockSpec((wcb.shape[0], dim_out), wmap),       # [branch1 | conv_c]
        pl.BlockSpec((1, dim_out), wmap),                  # fused shift
    ]
    args += [wa_cat, ta, wb_cat, tb, masks, wcb, tcb]

    flops = 2 * N * L * (tk * dim_in * dim_inner + 9 * dim_inner * dim_inner
                         + ((dim_in + dim_inner) if has_branch1 else dim_inner)
                         * dim_out)
    bytes_accessed = (x.size * 4 + N * L * dim_out * 4
                      + wa_cat.size * wa_cat.dtype.itemsize
                      + wb_cat.size * wb_cat.dtype.itemsize
                      + wcb.size * wcb.dtype.itemsize
                      + masks.size * 4)

    kernel = functools.partial(_res_block_kernel, Ft, H, W, tk, dilation,
                               has_branch1, use_halo, aligned_a, aligned_b,
                               fuse_c, compute_dtype)
    out = pl.pallas_call(
        kernel,
        out_shape=jax.ShapeDtypeStruct((N, L, dim_out), jnp.float32),
        grid=(N, n_tiles),
        in_specs=in_specs,
        out_specs=pl.BlockSpec((None, Lt, dim_out), lambda n, f: (n, f, 0)),
        compiler_params=pltpu.CompilerParams(
            dimension_semantics=("parallel", "parallel"),
            vmem_limit_bytes=_pick_vmem_limit()),
        cost_estimate=pl.CostEstimate(flops=int(flops), transcendentals=0,
                                      bytes_accessed=int(bytes_accessed)),
    )(*args)

    # (N, L, Cout) -> NCTHW.  (These relayouts disappear in a channels-last
    # pipeline; do not include them in kernel benchmarks.)
    return jnp.transpose(out.reshape(N, T, H, W, dim_out), (0, 4, 1, 2, 3))


# ----------------------------------------------------------------------------
# Pure-JAX reference (PyTorch eval-mode semantics) and test harness.
# ----------------------------------------------------------------------------
def _reference(x, p, temp_kernel_size, dilation, eps):
    prec = lax.Precision.HIGHEST

    def conv(inp, w, padding, rhs_dilation=(1, 1, 1)):
        return lax.conv_general_dilated(
            inp, w, window_strides=(1, 1, 1), padding=padding,
            rhs_dilation=rhs_dilation,
            dimension_numbers=("NCTHW", "OITHW", "NCTHW"), precision=prec)

    def bn(z, g, b, m, v):
        s = g / jnp.sqrt(v + eps)
        t = b - m * s
        return z * s[None, :, None, None, None] + t[None, :, None, None, None]

    relu = lambda z: jnp.maximum(z, 0.0)
    tpad = temp_kernel_size // 2
    d = dilation
    a = relu(bn(conv(x, p["w_a"], [(tpad, tpad), (0, 0), (0, 0)]),
                p["g_a"], p["b_a"], p["m_a"], p["v_a"]))
    b = relu(bn(conv(a, p["w_b"], [(0, 0), (d, d), (d, d)],
                     rhs_dilation=(1, d, d)),
                p["g_b"], p["b_b"], p["m_b"], p["v_b"]))
    c = bn(conv(b, p["w_c"], [(0, 0), (0, 0), (0, 0)]),
           p["g_c"], p["b_c"], p["m_c"], p["v_c"])
    if "w_1" in p:
        sc = bn(conv(x, p["w_1"], [(0, 0), (0, 0), (0, 0)]),
                p["g_1"], p["b_1"], p["m_1"], p["v_1"])
    else:
        sc = x
    return relu(sc + c)


def _init_params(key, dim_in, dim_out, dim_inner, temp_kernel_size, has_branch1):
    ks = iter(jax.random.split(key, 16))

    def u(shape, scale=0.1):
        return jax.random.uniform(next(ks), shape, jnp.float32, -scale, scale)

    def bn(dim):
        return (1.0 + u((dim,)), u((dim,)),
                jnp.linspace(-0.05, 0.05, dim, dtype=jnp.float32),
                jnp.linspace(0.9, 1.1, dim, dtype=jnp.float32))

    p = {}
    p["w_a"] = u((dim_inner, dim_in, temp_kernel_size, 1, 1))
    p["g_a"], p["b_a"], p["m_a"], p["v_a"] = bn(dim_inner)
    p["w_b"] = u((dim_inner, dim_inner, 1, 3, 3))
    p["g_b"], p["b_b"], p["m_b"], p["v_b"] = bn(dim_inner)
    p["w_c"] = u((dim_out, dim_inner, 1, 1, 1))
    p["g_c"], p["b_c"], p["m_c"], p["v_c"] = bn(dim_out)
    if has_branch1:
        p["w_1"] = u((dim_out, dim_in, 1, 1, 1))
        p["g_1"], p["b_1"], p["m_1"], p["v_1"] = bn(dim_out)
    return p


if __name__ == "__main__":
    key = jax.random.PRNGKey(0)
    kx1, kp1, kx2, kp2 = jax.random.split(key, 4)

    # Config 1: projection shortcut, 128-aligned channels -> large-K concat
    # path, fused shortcut+conv_c, multi-tile frame grid with temporal halo.
    N, T, H, W = 2, 4, 8, 8
    dim_in, dim_out, dim_inner, tk = 128, 256, 128, 3
    x1 = jax.random.normal(kx1, (N, dim_in, T, H, W), dtype=jnp.float32)
    p1 = _init_params(kp1, dim_in, dim_out, dim_inner, tk, has_branch1=True)
    ref1 = _reference(x1, p1, tk, 1, 1e-5)

    out_f32 = jax.block_until_ready(
        res_block_forward(x1, p1, temp_kernel_size=tk,
                          compute_dtype=jnp.float32, frames_per_tile=2))
    assert out_f32.shape == (N, dim_out, T, H, W)
    assert jnp.allclose(out_f32, ref1, rtol=5e-3, atol=5e-3), \
        float(jnp.max(jnp.abs(out_f32 - ref1)))

    out_bf16 = jax.block_until_ready(
        res_block_forward(x1, p1, temp_kernel_size=tk,
                          compute_dtype=jnp.bfloat16, frames_per_tile=2))
    assert jnp.allclose(out_bf16, ref1, rtol=5e-2, atol=5e-2), \
        float(jnp.max(jnp.abs(out_bf16 - ref1)))

    # Config 2: identity shortcut, non-128-aligned channels -> per-tap
    # fallback path, auto tile choice (single tile, zero halo).
    dim2, inner2 = 64, 16
    x2 = jax.random.normal(kx2, (N, dim2, T, H, W), dtype=jnp.float32)
    p2 = _init_params(kp2, dim2, dim2, inner2, tk, has_branch1=False)
    ref2 = _reference(x2, p2, tk, 1, 1e-5)
    out2 = jax.block_until_ready(
        res_block_forward(x2, p2, temp_kernel_size=tk,
                          compute_dtype=jnp.float32))
    assert out2.shape == x2.shape
    assert jnp.allclose(out2, ref2, rtol=5e-3, atol=5e-3), \
        float(jnp.max(jnp.abs(out2 - ref2)))

    print("KERNEL_OK")
</pallas_src>

<mosaic_0001>
module attributes {stable_mosaic.version = 11 : i64} {
  func.func @_res_block_kernel(%arg0: i32, %arg1: i32, %arg2: memref<1x128x128xf32, #tpu.memory_space<vmem>>, %arg3: memref<1x64x128xf32, #tpu.memory_space<vmem>>, %arg4: memref<1x64x128xf32, #tpu.memory_space<vmem>>, %arg5: memref<384x128xf32, #tpu.memory_space<vmem>>, %arg6: memref<1x128xf32, #tpu.memory_space<vmem>>, %arg7: memref<1152x128xf32, #tpu.memory_space<vmem>>, %arg8: memref<1x128xf32, #tpu.memory_space<vmem>>, %arg9: memref<128x9xf32, #tpu.memory_space<vmem>>, %arg10: memref<256x256xf32, #tpu.memory_space<vmem>>, %arg11: memref<1x256xf32, #tpu.memory_space<vmem>>, %arg12: memref<1x128x256xf32, #tpu.memory_space<vmem>>) attributes {dimension_semantics = [#tpu.dimension_semantics<parallel>, #tpu.dimension_semantics<parallel>], iteration_bounds = array<i64: 2, 2>, scalar_prefetch = 0 : i64, scratch_operands = 0 : i64, tpu.core_type = #tpu.core_type<tc>, window_params = [{transform_indices = @transform_0, window_bounds = array<i64: 1, 128, 128>}, {transform_indices = @transform_1, window_bounds = array<i64: 1, 64, 128>}, {transform_indices = @transform_2, window_bounds = array<i64: 1, 64, 128>}, {pipeline_mode = #tpu.pipeline_mode<synchronous>, transform_indices = @transform_3, window_bounds = array<i64: 384, 128>}, {pipeline_mode = #tpu.pipeline_mode<synchronous>, transform_indices = @transform_4, window_bounds = array<i64: 1, 128>}, {pipeline_mode = #tpu.pipeline_mode<synchronous>, transform_indices = @transform_5, window_bounds = array<i64: 1152, 128>}, {pipeline_mode = #tpu.pipeline_mode<synchronous>, transform_indices = @transform_6, window_bounds = array<i64: 1, 128>}, {pipeline_mode = #tpu.pipeline_mode<synchronous>, transform_indices = @transform_7, window_bounds = array<i64: 128, 9>}, {pipeline_mode = #tpu.pipeline_mode<synchronous>, transform_indices = @transform_8, window_bounds = array<i64: 256, 256>}, {pipeline_mode = #tpu.pipeline_mode<synchronous>, transform_indices = @transform_9, window_bounds = array<i64: 1, 256>}, {transform_indices = @transform_10, window_bounds = array<i64: 1, 128, 256>}]} {
    %c0 = arith.constant 0 : index
    %c0_0 = arith.constant 0 : index
    %c0_1 = arith.constant 0 : index
    %0 = vector.load %arg2[%c0, %c0_0, %c0_1] : memref<1x128x128xf32, #tpu.memory_space<vmem>>, vector<1x128x128xf32>
    %1 = vector.shape_cast %0 : vector<1x128x128xf32> to vector<128x128xf32>
    %c0_i32 = arith.constant 0 : i32
    %2 = arith.cmpi sgt, %arg1, %c0_i32 : i32
    %c0_2 = arith.constant 0 : index
    %c0_3 = arith.constant 0 : index
    %c0_4 = arith.constant 0 : index
    %3 = vector.load %arg3[%c0_2, %c0_3, %c0_4] : memref<1x64x128xf32, #tpu.memory_space<vmem>>, vector<1x64x128xf32>
    %4 = vector.shape_cast %3 : vector<1x64x128xf32> to vector<64x128xf32>
    %cst = arith.constant 0.000000e+00 : f32
    %5 = vector.broadcast %cst : f32 to vector<64x128xf32>
    %6 = arith.select %2, %4, %5 : vector<64x128xf32>
    %c1_i32 = arith.constant 1 : i32
    %7 = arith.cmpi slt, %arg1, %c1_i32 : i32
    %c0_5 = arith.constant 0 : index
    %c0_6 = arith.constant 0 : index
    %c0_7 = arith.constant 0 : index
    %8 = vector.load %arg4[%c0_5, %c0_6, %c0_7] : memref<1x64x128xf32, #tpu.memory_space<vmem>>, vector<1x64x128xf32>
    %9 = vector.shape_cast %8 : vector<1x64x128xf32> to vector<64x128xf32>
    %cst_8 = arith.constant 0.000000e+00 : f32
    %10 = vector.broadcast %cst_8 : f32 to vector<64x128xf32>
    %11 = arith.select %7, %9, %10 : vector<64x128xf32>
    %12 = tpu.concatenate %6, %1, %11 in 0 : vector<64x128xf32>, vector<128x128xf32>, vector<64x128xf32> -> vector<256x128xf32>
    %13 = vector.extract_strided_slice %12 {offsets = [0, 0], sizes = [128, 128], strides = [1, 1]} : vector<256x128xf32> to vector<128x128xf32>
    %14 = vector.extract_strided_slice %12 {offsets = [64, 0], sizes = [128, 128], strides = [1, 1]} : vector<256x128xf32> to vector<128x128xf32>
    %15 = vector.extract_strided_slice %12 {offsets = [128, 0], sizes = [128, 128], strides = [1, 1]} : vector<256x128xf32> to vector<128x128xf32>
    %16 = tpu.concatenate %13, %14, %15 in 1 : vector<128x128xf32>, vector<128x128xf32>, vector<128x128xf32> -> vector<128x384xf32>
    %c0_9 = arith.constant 0 : index
    %c0_10 = arith.constant 0 : index
    %17 = vector.load %arg5[%c0_9, %c0_10] : memref<384x128xf32, #tpu.memory_space<vmem>>, vector<384x128xf32>
    %cst_11 = arith.constant dense<0.000000e+00> : vector<128x128xf32>
    %18 = tpu.matmul %16, %17, %cst_11 {dimension_numbers = #tpu.dot_dimension_numbers<[1], [0], [0], [1], [0, 0, 1, 1], [], []>} : vector<128x384xf32>, vector<384x128xf32>, vector<128x128xf32> -> vector<128x128xf32>
    %c0_12 = arith.constant 0 : index
    %c0_13 = arith.constant 0 : index
    %19 = vector.load %arg6[%c0_12, %c0_13] : memref<1x128xf32, #tpu.memory_space<vmem>>, vector<1x128xf32>
    %20 = vector.broadcast %19 : vector<1x128xf32> to vector<128x128xf32>
    %21 = arith.addf %18, %20 : vector<128x128xf32>
    %cst_14 = arith.constant 0.000000e+00 : f32
    %22 = vector.broadcast %cst_14 : f32 to vector<128x128xf32>
    %23 = arith.maximumf %21, %22 : vector<128x128xf32>
    %c0_15 = arith.constant 0 : index
    %c0_16 = arith.constant 0 : index
    %24 = vector.load %arg9[%c0_15, %c0_16] : memref<128x9xf32, #tpu.memory_space<vmem>>, vector<128x9xf32>
    %c9_i32 = arith.constant 9 : i32
    %25 = tpu.dynamic_rotate %23 by %c9_i32 dim 0 : vector<128x128xf32>, i32 -> vector<128x128xf32>
    %26 = vector.extract_strided_slice %24 {offsets = [0, 0], sizes = [128, 1], strides = [1, 1]} : vector<128x9xf32> to vector<128x1xf32>
    %27 = vector.broadcast %26 : vector<128x1xf32> to vector<128x128xf32>
    %28 = arith.mulf %25, %27 : vector<128x128xf32>
    %c8_i32 = arith.constant 8 : i32
    %29 = tpu.dynamic_rotate %23 by %c8_i32 dim 0 : vector<128x128xf32>, i32 -> vector<128x128xf32>
    %30 = vector.extract_strided_slice %24 {offsets = [0, 1], sizes = [128, 1], strides = [1, 1]} : vector<128x9xf32> to vector<128x1xf32>
    %31 = vector.broadcast %30 : vector<128x1xf32> to vector<128x128xf32>
    %32 = arith.mulf %29, %31 : vector<128x128xf32>
    %c7_i32 = arith.constant 7 : i32
    %33 = tpu.dynamic_rotate %23 by %c7_i32 dim 0 : vector<128x128xf32>, i32 -> vector<128x128xf32>
    %34 = vector.extract_strided_slice %24 {offsets = [0, 2], sizes = [128, 1], strides = [1, 1]} : vector<128x9xf32> to vector<128x1xf32>
    %35 = vector.broadcast %34 : vector<128x1xf32> to vector<128x128xf32>
    %36 = arith.mulf %33, %35 : vector<128x128xf32>
    %c1_i32_17 = arith.constant 1 : i32
    %37 = tpu.dynamic_rotate %23 by %c1_i32_17 dim 0 : vector<128x128xf32>, i32 -> vector<128x128xf32>
    %38 = vector.extract_strided_slice %24 {offsets = [0, 3], sizes = [128, 1], strides = [1, 1]} : vector<128x9xf32> to vector<128x1xf32>
    %39 = vector.broadcast %38 : vector<128x1xf32> to vector<128x128xf32>
    %40 = arith.mulf %37, %39 : vector<128x128xf32>
    %c127_i32 = arith.constant 127 : i32
    %41 = tpu.dynamic_rotate %23 by %c127_i32 dim 0 : vector<128x128xf32>, i32 -> vector<128x128xf32>
    %42 = vector.extract_strided_slice %24 {offsets = [0, 5], sizes = [128, 1], strides = [1, 1]} : vector<128x9xf32> to vector<128x1xf32>
    %43 = vector.broadcast %42 : vector<128x1xf32> to vector<128x128xf32>
    %44 = arith.mulf %41, %43 : vector<128x128xf32>
    %c121_i32 = arith.constant 121 : i32
    %45 = tpu.dynamic_rotate %23 by %c121_i32 dim 0 : vector<128x128xf32>, i32 -> vector<128x128xf32>
    %46 = vector.extract_strided_slice %24 {offsets = [0, 6], sizes = [128, 1], strides = [1, 1]} : vector<128x9xf32> to vector<128x1xf32>
    %47 = vector.broadcast %46 : vector<128x1xf32> to vector<128x128xf32>
    %48 = arith.mulf %45, %47 : vector<128x128xf32>
    %c120_i32 = arith.constant 120 : i32
    %49 = tpu.dynamic_rotate %23 by %c120_i32 dim 0 : vector<128x128xf32>, i32 -> vector<128x128xf32>
    %50 = vector.extract_strided_slice %24 {offsets = [0, 7], sizes = [128, 1], strides = [1, 1]} : vector<128x9xf32> to vector<128x1xf32>
    %51 = vector.broadcast %50 : vector<128x1xf32> to vector<128x128xf32>
    %52 = arith.mulf %49, %51 : vector<128x128xf32>
    %c119_i32 = arith.constant 119 : i32
    %53 = tpu.dynamic_rotate %23 by %c119_i32 dim 0 : vector<128x128xf32>, i32 -> vector<128x128xf32>
    %54 = vector.extract_strided_slice %24 {offsets = [0, 8], sizes = [128, 1], strides = [1, 1]} : vector<128x9xf32> to vector<128x1xf32>
    %55 = vector.broadcast %54 : vector<128x1xf32> to vector<128x128xf32>
    %56 = arith.mulf %53, %55 : vector<128x128xf32>
    %57 = tpu.concatenate %28, %32, %36, %40, %23, %44, %48, %52, %56 in 1 : vector<128x128xf32>, vector<128x128xf32>, vector<128x128xf32>, vector<128x128xf32>, vector<128x128xf32>, vector<128x128xf32>, vector<128x128xf32>, vector<128x128xf32>, vector<128x128xf32> -> vector<128x1152xf32>
    %c0_18 = arith.constant 0 : index
    %c0_19 = arith.constant 0 : index
    %58 = vector.load %arg7[%c0_18, %c0_19] : memref<1152x128xf32, #tpu.memory_space<vmem>>, vector<1152x128xf32>
    %cst_20 = arith.constant dense<0.000000e+00> : vector<128x128xf32>
    %59 = tpu.matmul %57, %58, %cst_20 {dimension_numbers = #tpu.dot_dimension_numbers<[1], [0], [0], [1], [0, 0, 1, 1], [], []>} : vector<128x1152xf32>, vector<1152x128xf32>, vector<128x128xf32> -> vector<128x128xf32>
    %c0_21 = arith.constant 0 : index
    %c0_22 = arith.constant 0 : index
    %60 = vector.load %arg8[%c0_21, %c0_22] : memref<1x128xf32, #tpu.memory_space<vmem>>, vector<1x128xf32>
    %61 = vector.broadcast %60 : vector<1x128xf32> to vector<128x128xf32>
    %62 = arith.addf %59, %61 : vector<128x128xf32>
    %cst_23 = arith.constant 0.000000e+00 : f32
    %63 = vector.broadcast %cst_23 : f32 to vector<128x128xf32>
    %64 = arith.maximumf %62, %63 : vector<128x128xf32>
    %65 = tpu.concatenate %1, %64 in 1 : vector<128x128xf32>, vector<128x128xf32> -> vector<128x256xf32>
    %c0_24 = arith.constant 0 : index
    %c0_25 = arith.constant 0 : index
    %66 = vector.load %arg10[%c0_24, %c0_25] : memref<256x256xf32, #tpu.memory_space<vmem>>, vector<256x256xf32>
    %cst_26 = arith.constant dense<0.000000e+00> : vector<128x256xf32>
    %67 = tpu.matmul %65, %66, %cst_26 {dimension_numbers = #tpu.dot_dimension_numbers<[1], [0], [0], [1], [0, 0, 1, 1], [], []>} : vector<128x256xf32>, vector<256x256xf32>, vector<128x256xf32> -> vector<128x256xf32>
    %c0_27 = arith.constant 0 : index
    %c0_28 = arith.constant 0 : index
    %68 = vector.load %arg11[%c0_27, %c0_28] : memref<1x256xf32, #tpu.memory_space<vmem>>, vector<1x256xf32>
    %69 = vector.broadcast %68 : vector<1x256xf32> to vector<128x256xf32>
    %70 = arith.addf %67, %69 : vector<128x256xf32>
    %cst_29 = arith.constant 0.000000e+00 : f32
    %71 = vector.broadcast %cst_29 : f32 to vector<128x256xf32>
    %72 = arith.maximumf %70, %71 : vector<128x256xf32>
    %c0_30 = arith.constant 0 : index
    %c0_31 = arith.constant 0 : index
    %c0_32 = arith.constant 0 : index
    %73 = vector.load %arg12[%c0_30, %c0_31, %c0_32] : memref<1x128x256xf32, #tpu.memory_space<vmem>>, vector<1x128x256xf32>
    %74 = vector.shape_cast %73 : vector<1x128x256xf32> to vector<128x256xf32>
    %75 = vector.shape_cast %72 : vector<128x256xf32> to vector<1x128x256xf32>
    tpu.vector_store %arg12[%c0_30, %c0_31, %c0_32], %75 {strides = array<i32>} : memref<1x128x256xf32, #tpu.memory_space<vmem>>, vector<1x128x256xf32>,
    return
  }
  func.func @transform_0(%arg0: i32, %arg1: i32) -> (i32, i32, i32) {
    %c0_i32 = arith.constant 0 : i32
    %c0_i32_0 = arith.constant 0 : i32
    return %arg0, %arg1, %c0_i32 : i32, i32, i32
  }
  func.func @transform_1(%arg0: i32, %arg1: i32) -> (i32, i32, i32) {
    %c2_i32 = arith.constant 2 : i32
    %0 = arith.muli %arg1, %c2_i32 : i32
    %c1_i32 = arith.constant 1 : i32
    %1 = arith.subi %0, %c1_i32 : i32
    %c0_i32 = arith.constant 0 : i32
    %2 = arith.maxsi %1, %c0_i32 : i32
    %c0_i32_0 = arith.constant 0 : i32
    %c0_i32_1 = arith.constant 0 : i32
    return %arg0, %2, %c0_i32_0 : i32, i32, i32
  }
  func.func @transform_2(%arg0: i32, %arg1: i32) -> (i32, i32, i32) {
    %c1_i32 = arith.constant 1 : i32
    %0 = arith.addi %arg1, %c1_i32 : i32
    %c2_i32 = arith.constant 2 : i32
    %1 = arith.muli %0, %c2_i32 : i32
    %c3_i32 = arith.constant 3 : i32
    %2 = arith.minsi %1, %c3_i32 : i32
    %c0_i32 = arith.constant 0 : i32
    %c0_i32_0 = arith.constant 0 : i32
    return %arg0, %2, %c0_i32 : i32, i32, i32
  }
  func.func @transform_3(%arg0: i32, %arg1: i32) -> (i32, i32) {
    %c0_i32 = arith.constant 0 : i32
    %c0_i32_0 = arith.constant 0 : i32
    %c0_i32_1 = arith.constant 0 : i32
    return %c0_i32, %c0_i32_0 : i32, i32
  }
  func.func @transform_4(%arg0: i32, %arg1: i32) -> (i32, i32) {
    %c0_i32 = arith.constant 0 : i32
    %c0_i32_0 = arith.constant 0 : i32
    %c0_i32_1 = arith.constant 0 : i32
    return %c0_i32, %c0_i32_0 : i32, i32
  }
  func.func @transform_5(%arg0: i32, %arg1: i32) -> (i32, i32) {
    %c0_i32 = arith.constant 0 : i32
    %c0_i32_0 = arith.constant 0 : i32
    %c0_i32_1 = arith.constant 0 : i32
    return %c0_i32, %c0_i32_0 : i32, i32
  }
  func.func @transform_6(%arg0: i32, %arg1: i32) -> (i32, i32) {
    %c0_i32 = arith.constant 0 : i32
    %c0_i32_0 = arith.constant 0 : i32
    %c0_i32_1 = arith.constant 0 : i32
    return %c0_i32, %c0_i32_0 : i32, i32
  }
  func.func @transform_7(%arg0: i32, %arg1: i32) -> (i32, i32) {
    %c0_i32 = arith.constant 0 : i32
    %c0_i32_0 = arith.constant 0 : i32
    %c0_i32_1 = arith.constant 0 : i32
    return %c0_i32, %c0_i32_0 : i32, i32
  }
  func.func @transform_8(%arg0: i32, %arg1: i32) -> (i32, i32) {
    %c0_i32 = arith.constant 0 : i32
    %c0_i32_0 = arith.constant 0 : i32
    %c0_i32_1 = arith.constant 0 : i32
    return %c0_i32, %c0_i32_0 : i32, i32
  }
  func.func @transform_9(%arg0: i32, %arg1: i32) -> (i32, i32) {
    %c0_i32 = arith.constant 0 : i32
    %c0_i32_0 = arith.constant 0 : i32
    %c0_i32_1 = arith.constant 0 : i32
    return %c0_i32, %c0_i32_0 : i32, i32
  }
  func.func @transform_10(%arg0: i32, %arg1: i32) -> (i32, i32, i32) {
    %c0_i32 = arith.constant 0 : i32
    %c0_i32_0 = arith.constant 0 : i32
    return %arg0, %arg1, %c0_i32 : i32, i32, i32
  }
}

</mosaic_0001>

<bundles_post_ra>
// kernel: tpu_custom_call.1
= control target key start
LH: loop header
LB: loop body
LE: loop exit
PB: predicated region body
PF: predicated region fallthrough
CT: control target
= control target key end

     0   :  { %s5712_s0 = inlined_call_operand.hbm [shape: f32[2,256,128], index: 0, kind: input, shape index: {}]   ;;  %s5713_s1 = inlined_call_operand.hbm [shape: f32[2,256,128], index: 1, kind: input, shape index: {}]   ;;  %s5714_s2 = inlined_call_operand.hbm [shape: f32[2,256,128], index: 2, kind: input, shape index: {}]   ;;  %s5715_s3 = inlined_call_operand.hbm [shape: f32[384,128], index: 3, kind: input, shape index: {}]   ;;  %s5716_s4 = inlined_call_operand.vmem [shape: f32[1,128], index: 4, kind: input, shape index: {}]   ;;  %s5717_s5 = inlined_call_operand.hbm [shape: f32[1152,128], index: 5, kind: input, shape index: {}]   ;;  %s5718_s6 = inlined_call_operand.vmem [shape: f32[1,128], index: 6, kind: input, shape index: {}]   ;;  %s5719_s7 = inlined_call_operand.vmem [shape: f32[128,9], index: 7, kind: input, shape index: {}]   ;;  %s5720_s8 = inlined_call_operand.hbm [shape: f32[256,256], index: 8, kind: input, shape index: {}]   ;;  %s5721_s9 = inlined_call_operand.vmem [shape: f32[1,256], index: 9, kind: input, shape index: {}]   ;;  %s5722_s10 = inlined_call_operand.hbm [shape: f32[2,256,256], index: 10, kind: output, shape index: {}]  }
   0x1   :  { %5800 = sst [smem:[#allocation95_spill]] %s5712_s0 }
   0x2   :  { %5801 = sst [smem:[#allocation96_spill]] %s5713_s1 }
   0x3   :  { %5802 = sst [smem:[#allocation97_spill]] %s5714_s2 }
   0x4   :  { %5803 = sst [smem:[#allocation98_spill]] %s5715_s3 }
   0x5   :  { %5804 = sst [smem:[#allocation99_spill]] %s5716_s4 }
   0x6   :  { %5805 = sst [smem:[#allocation100_spill]] %s5717_s5 }
   0x7   :  { %5806 = sst [smem:[#allocation101_spill]] %s5718_s6 }
   0x8   :  { %5807 = sst [smem:[#allocation102_spill]] %s5719_s7 }
   0x9   :  { %5808 = sst [smem:[#allocation103_spill]] %s5720_s8 }
   0xa   :  { %5809 = sst [smem:[#allocation104_spill]] %s5721_s9 }
   0xb   :  { %5810 = sst [smem:[#allocation105_spill]] %s5722_s10 }
   0xc   :  { %15 = vsyncpa [#allocation3], 0 }
   0xd   :  { %17 = vsyncpa [#allocation3 + $0x1], 0 }
   0xe   :  { %18 = vsyncpa [#allocation6], 0 }
   0xf   :  { %20 = vsyncpa [#allocation6 + $0x1], 0 }
  0x10   :  { %21 = vsyncpa [#allocation9], 0 }
  0x11   :  { %22 = vsyncpa [#allocation12], 0 }
  0x12   :  { %23 = vsyncpa [#allocation4], 0 }
  0x13   :  { %25 = vsyncpa [#allocation4 + $0x1], 0  ;;  %s3742_s13 = smov 0   ;;  %s3744_s14 = smov 0  }
  0x14   :  { %s3746_s15 = smov 0   ;;  %s3748_s16 = smov 0  }
  0x15   :  { %s3750_s17 = smov 0   ;;  %s3752_s18 = smov 0  }
  0x16   :  { %s3754_s19 = smov 0   ;;  %s3756_s20 = smov 0  }
  0x17   :  { %s3758_s21 = smov 0   ;;  %s3760_s22 = smov 0  }
  0x18   :  { %s3762_s23 = smov 0   ;;  %s3764_s24 = smov 0  }
  0x19   :  { %s3766_s25 = smov 0   ;;  %s3768_s26 = smov 0  }
  0x1a LB: > { %5811 = sst [smem:[#allocation20_spill]] %s3616_s13  ;;  %s3813_s27 = sadd.s32 4294967295, %s3668_s26   ;;  %s3668_s26 = sphi %s3768_s26, %s31_s26   ;;  %s3664_s25 = sphi %s3766_s25, %s6070_s25   ;;  %s3660_s24 = sphi %s3764_s24, %s6078_s24   ;;  %s3656_s23 = sphi %s3762_s23, %s6077_s23   ;;  %s3652_s22 = sphi %s3760_s22, %s6076_s22   ;;  %s3648_s21 = sphi %s3758_s21, %s6066_s21   ;;  %s3644_s20 = sphi %s3756_s20, %s6075_s20   ;;  %s3640_s19 = sphi %s3754_s19, %s6074_s19   ;;  %s3636_s18 = sphi %s3752_s18, %s6064_s18   ;;  %s3632_s17 = sphi %s3750_s17, %s6063_s17   ;;  %s3628_s16 = sphi %s3748_s16, %s6062_s16   ;;  %s3624_s15 = sphi %s3746_s15, %s6073_s15   ;;  %s3620_s14 = sphi %s3744_s14, %s6072_s14   ;;  %s3616_s13 = sphi %s3742_s13, %s6061_s13  }
  0x1b   : > { %5812 = sst [smem:[#allocation21_spill]] %s3620_s14  ;;  %p2970_p0 = scmp.ge.s32.totalorder %s3668_s26, 1 }
  0x1c   : > { %5813 = sst [smem:[#allocation22_spill]] %s3632_s17  ;;  %p66_p1 = scmp.eq.s32.totalorder %s3813_s27, 0 }
  0x1d   : > { %5814 = sst [smem:[#allocation23_spill]] %s3636_s18  ;;  %p323_p2 = scmp.lt.s32.totalorder %s3668_s26, 5 }
  0x1e   : > { %5815 = sst [smem:[#allocation24_spill]] %s3648_s21  ;;  %s3670_s12 = smov [#allocation8]  }
  0x1f   : > { %5816 = sst [smem:[#allocation25_spill]] %s3652_s22  ;;  %p3821_p3 = pnand %p2970_p0, %p323_p2 }
  0x20   : > { %5817 = sst [smem:[#allocation26_spill]] %s3656_s23  ;;  %s336_s10 = sshll.u32 %s3670_s12, 4  ;;  %s337_s10 = int_to_ptr.vmem [resolvable:$true] %s336_s10 }
  0x21   : > { %5818 = sst [smem:[#allocation27_spill]] %s3660_s24  ;;  %p3048_p4 = pneg %p3821_p3 }
  0x22   : > { %5819 = sst [smem:[#allocation28_spill]] %s3664_s25  ;;  %s5725_s28 = smov 128  }
  0x23   : > { %s5820_s3 = sld [smem:[#allocation98_spill]]  ;;  %p3829_p5 = pnand %p3048_p4, %p66_p1 }
  0x24   : > { %s5821_s11 = scalar_select %p3821_p3, 1, 0 }
  0x25   : > { %s5727_s29 = smov 8   ;;  %s43_s9 = sadd.s32 1, %s3664_s25 }
  0x26   : > { %5822 = sst [smem:[#allocation29_spill]] %s5821_s11  ;;  %p60_p7 = scmp.eq.s32.totalorder %s3668_s26, 0 }
  0x27   : > { %s2964_s12 = sshll.u32 %s3660_s24, 1  ;;  %p95_p12 = scmp.ne.s32.totalorder %s3636_s18, %s3632_s17 }
  0x28   : > { %s2965_s4 = sadd.s32 4294967295, %s2964_s12  ;;  %p101_p0 = scmp.ne.s32.totalorder %s3632_s17, %s3628_s16 }
  0x29   : > { %s334_s30 = sshll.u32 %s5820_s3, 4  ;;  %s40_s3 = sadd.s32 1, %s3660_s24  ;;  %s335_s30 = int_to_ptr.hbm [resolvable:$true] %s334_s30 }
  0x2a   : > { %3051 = dma.hbm_to_vmem [thread:$0]  (!%p3829_p5), %s335_s30, 6144, %s337_s10, [#allocation9], %s5725_s28, %s5725_s28, %s5727_s29  }
  0x2b   : > { %p41_p6 = scmp.ge.s32.totalorder %s40_s3, 2  ;;  %p77_p9 = scmp.gt.s32.totalorder %s2965_s4, 0 }
  0x2c   : > { %s88_s30 = sadd.s32 1, %s3636_s18  ;;  %p3863_p13 = por %p95_p12, %p60_p7 }
  0x2d   : > { %s6080_s3 = smov (%p41_p6, %s40_s3), 0  ;;  %s6082_s9 = smov (!%p41_p6, %s43_s9), %s3664_s25 }
  0x2e   : > { %5824 = sst [smem:[#allocation30_spill]] %s6080_s3  ;;  %s48_s6 = ssub.s32 %s3660_s24, %s6080_s3 }
  0x2f   : > { %p45_p8 = scmp.ge.s32.totalorder %s6082_s9, 2  ;;  %s2966_s10 = sshll.u32 %s6080_s3, 1 }
  0x30   : > { %s6086_s4 = smov (!%p77_p9, %s2965_s4), 0  ;;  %s2967_s29 = sadd.s32 4294967295, %s2966_s10 }
  0x31   : > { %s6084_s9 = smov (%p45_p8, %s6082_s9), 0  ;;  %p81_p10 = scmp.gt.s32.totalorder %s2967_s29, 0 }
  0x32   : > { %5825 = sst [smem:[#allocation31_spill]] %s6084_s9  ;;  %s3853_s28 = ssub.s32 %s3664_s25, %s6084_s9 }
  0x33   : > { %5826 = sst [smem:[#allocation32_spill]] %s3853_s28  ;;  %s3856_s22 = sor.u32 %s48_s6, %s3853_s28 }
  0x34   : > { %p50_p11 = scmp.eq.s32.totalorder %s3856_s22, 0  ;;  %s6088_s29 = smov (!%p81_p10, %s2967_s29), 0 }
  0x35   : > { %s84_s9 = ssub.s32 %s6086_s4, %s6088_s29  ;;  %s3869_s7 = sadd.s32 2, %s2964_s12 }
  0x36   : > { %5828 = sst [smem:[#allocation33_spill]] %s3869_s7  ;;  %s85_s6 = sor.u32 %s84_s9, %s3853_s28 }
  0x37   : > { %p3874_p2 = por %p101_p0, %p66_p1  ;;  %p86_p4 = scmp.eq.s32.totalorder %s85_s6, 0 }
  0x38   : > { %p113_p6 = scmp.lt.s32.totalorder %s3869_s7, 3  ;;  %s3879_s2 = sadd.s32 2, %s2966_s10 }
  0x39   : > { %s5829_s11 = scalar_select %p3874_p2, 1, 0 }
  0x3a   : > { %p5745_p8 = scmp.lt.s32.totalorder %s3668_s26, 4  ;;  %s3887_s16 = sshll.u32 %s3664_s25, 5 }
  0x3b   : > { %5830 = sst [smem:[#allocation34_spill]] %s5829_s11  ;;  %s414_s9 = sand.u32 1, %s3668_s26  }
  0x3c   : > { %s3883_s0 = scalar_select %p86_p4, %s3636_s18, %s88_s30  }
  0x3d   : > { %s416_s29 = sand.u32 1, %s3636_s18   ;;  %s2982_s17 = sshll.u32 %s6086_s4, 3 }
  0x3e   : > { %5831 = sst [smem:[#allocation35_spill]] %s3883_s0  ;;  %s2979_s12 = sshll.u32 %s416_s29, 6 }
  0x3f   : > { %s427_s28 = sadd.s32 %s2982_s17, %s3887_s16  ;;  %s418_s11 = scalar_lea.vmem [#allocation5], %s2979_s12 }
  0x40   : > { %s432_s6 = sshll.u32 %s418_s11, 4  ;;  %s2984_s13 = sshll.u32 %s427_s28, 3  ;;  %s433_s6 = int_to_ptr.vmem [resolvable:$true] %s432_s6 }
  0x41   : > { %s5832_s1 = sld [smem:[#allocation96_spill]]  ;;  %p3062_p10 = pnand %p5745_p8, %p3863_p13 }
  0x42   : > { %s5833_s5 = sld [smem:[#allocation100_spill]]  ;;  %s3902_s4 = scalar_lea.sflag [#allocation6], %s414_s9 }
  0x43   : > { %s5834_s17 = smov 8   ;;  %s5835_s11 = smov 128  }
  0x44   : > { %s3673_s3 = smov [#allocation10]   ;;  %s5836_s8 = sld [smem:[#allocation103_spill]] }
  0x45   : > { %s353_s0 = sshll.u32 %s3673_s3, 4  ;;  %s3674_s25 = smov [#allocation11]   ;;  %s354_s0 = int_to_ptr.vmem [resolvable:$true] %s353_s0 }
  0x46   : > { %s373_s28 = sshll.u32 %s3674_s25, 4  ;;  %s3675_s9 = smov 256   ;;  %s374_s28 = int_to_ptr.vmem [resolvable:$true] %s373_s28 }
  0x47   : > { %s429_s7 = scalar_lea.hbm %s5832_s1, %s2984_s13  ;;  %s3676_s29 = smov 16  }
  0x48   : > { %s430_s30 = sshll.u32 %s429_s7, 4  ;;  %s351_s18 = sshll.u32 %s5833_s5, 4  ;;  %s431_s30 = int_to_ptr.hbm [resolvable:$true] %s430_s30  ;;  %s352_s18 = int_to_ptr.hbm [resolvable:$true] %s351_s18 }
  0x49   : > { %3064 = dma.hbm_to_vmem [thread:$0]  (!%p3062_p10), %s431_s30, 1024, %s433_s6, %s3902_s4, %s5835_s11, %s5835_s11, %s5834_s17  }
  0x4a   : > { %s371_s14 = sshll.u32 %s5836_s8, 4  ;;  %s2963_s12 = sadd.s32 4294967294, %s3668_s26   ;;  %s372_s14 = int_to_ptr.hbm [resolvable:$true] %s371_s14 }
  0x4b   : > { %3054 = dma.hbm_to_vmem [thread:$0]  (!%p3829_p5), %s352_s18, 18432, %s354_s0, [#allocation9], %s5835_s11, %s5835_s11, %s5834_s17  }
  0x4c   : > { %3057 = dma.hbm_to_vmem [thread:$0]  (!%p3829_p5), %s372_s14, 8192, %s374_s28, [#allocation12], %s3675_s9, %s3675_s9, %s3676_s29  }
  0x4d   : > { %s52_s6 = sadd.s32 1, %s3648_s21  ;;  %p59_p12 = scmp.ne.s32.totalorder %s3648_s21, %s3644_s20 }
  0x4e   : > { %s3925_s10 = scalar_select %p50_p11, %s3648_s21, %s52_s6  }
  0x4f   : > { %p3929_p13 = por %p60_p7, %p59_p12  ;;  %p65_p0 = scmp.ne.s32.totalorder %s3644_s20, %s3640_s19 }
  0x50   : > { %5837 = sst [smem:[#allocation36_spill]] %s3925_s10  ;;  %p310_p4 = scmp.eq.s32.totalorder %s3813_s27, 3 }
  0x51   : > { %p316_p10 = scmp.eq.s32.totalorder %s2963_s12, 3  ;;  %p3938_p9 = por %p66_p1, %p65_p0 }
  0x52   : > { %s390_s23 = sand.u32 1, %s3648_s21   ;;  %p3943_p5 = por %p310_p4, %p59_p12 }
  0x53   : > { %s5841_s3 = sld [smem:[#allocation33_spill]]  ;;  %p3947_p11 = por %p316_p10, %p65_p0 }
  0x54   : > { %s2975_s7 = sshll.u32 %s390_s23, 7  ;;  %s5843_s13 = sld [smem:[#allocation21_spill]] }
  0x55   : > { %s2976_s14 = sshll.u32 %s3660_s24, 4  ;;  %s5844_s25 = sld [smem:[#allocation20_spill]] }
  0x56   : > { %s399_s28 = sadd.s32 %s3887_s16, %s2976_s14  ;;  %s394_s9 = scalar_lea.vmem [#allocation2], %s2975_s7 }
  0x57   : > { %s404_s29 = sshll.u32 %s394_s9, 4  ;;  %s5845_s12 = sld [smem:[#allocation32_spill]]  ;;  %s405_s29 = int_to_ptr.vmem [resolvable:$true] %s404_s29 }
  0x58   : > { %s2978_s6 = sshll.u32 %s399_s28, 3  ;;  %s5846_s8 = sld [smem:[#allocation95_spill]] }
  0x59   : > { %p3059_p12 = pnand %p5745_p8, %p3929_p13  ;;  %s391_s24 = scalar_lea.sflag [#allocation3], %s390_s23 }
  0x5a   : > { %s124_s7 = sadd.s32 1, %s3624_s15  ;;  %s6090_s3 = smov (!%p113_p6, %s5841_s3), 3 }
  0x5b   : > { %p5847_p0 = scmp.lt.s32.totalorder %s3879_s2, 3  ;;  %p131_p4 = scmp.ne.s32.totalorder %s3624_s15, %s5843_s13 }
  0x5c   : > { %p137_p10 = scmp.ne.s32.totalorder %s5843_s13, %s5844_s25  ;;  %s444_s5 = sand.u32 1, %s3624_s15  }
  0x5d   : > { %s6092_s2 = smov (!%p5847_p0, %s3879_s2), 3  ;;  %p3978_p13 = por %p131_p4, %p60_p7 }
  0x5e   : > { %s401_s10 = scalar_lea.hbm %s5846_s8, %s2978_s6  ;;  %s120_s1 = ssub.s32 %s6090_s3, %s6092_s2 }
  0x5f   : > { %s402_s21 = sshll.u32 %s401_s10, 4  ;;  %s121_s8 = sor.u32 %s120_s1, %s5845_s12  ;;  %s403_s21 = int_to_ptr.hbm [resolvable:$true] %s402_s21 }
  0x60   : > { %3061 = dma.hbm_to_vmem [thread:$0]  (!%p3059_p12), %s403_s21, 2048, %s405_s29, %s391_s24, %s5835_s11, %s5835_s11, %s5834_s17  }
  0x61   : > { %p122_p8 = scmp.eq.s32.totalorder %s121_s8, 0  ;;  %p3984_p12 = por %p137_p10, %p66_p1 }
  0x62   : > { %s2985_s24 = sshll.u32 %s444_s5, 6  ;;  %s2987_s30 = sshll.u32 %s6090_s3, 3 }
  0x63   : > { %s3989_s23 = scalar_select %p122_p8, %s3624_s15, %s124_s7  }
  0x64   : > { %s455_s2 = sadd.s32 %s2987_s30, %s3887_s16  ;;  %s446_s14 = scalar_lea.vmem [#allocation7], %s2985_s24 }
  0x65   : > { %s2989_s13 = sshll.u32 %s455_s2, 3  ;;  %s460_s25 = sshll.u32 %s446_s14, 4  ;;  %s461_s25 = int_to_ptr.vmem [resolvable:$true] %s460_s25 }
  0x66   : > { %s5850_s29 = sld [smem:[#allocation97_spill]]  ;;  %p5851_p7 = scmp.lt.s32.totalorder %s3668_s26, 4 }
  0x68   : > { %p3065_p6 = pnand %p5851_p7, %p3978_p13 }
  0x6a   : > { %472 = sbr.rel (%p3821_p3) target bundleno = 1095 (0x447), region = 60 }
  0x6c   : > { %s457_s12 = scalar_lea.hbm %s5850_s29, %s2989_s13 }
  0x6d   : > { %s458_s6 = sshll.u32 %s457_s12, 4  ;;  %s459_s6 = int_to_ptr.hbm [resolvable:$true] %s458_s6 }
  0x6e   : > { %3067 = dma.hbm_to_vmem [thread:$0]  (!%p3065_p6), %s459_s6, 1024, %s461_s25, %s3902_s4, %s5835_s11, %s5835_s11, %s5834_s17  }
  0x6f   : > { %s4006_s16 = sand.u32 1, %s3644_s20  }
  0x70   : > { %s2991_s7 = sshll.u32 %s4006_s16, 7  ;;  %s475_s1 = scalar_lea.sflag [#allocation3], %s4006_s16 }
  0x71   : > { %s4010_s5 = scalar_lea.vmem [#allocation2], %s2991_s7 }
  0x72   : > { %3591 = dma.done.wait (%p3938_p9), %s475_s1, 2048  }
  0x73   : > { %3593 = vsyncadd (%p3938_p9), %s475_s1, 4294965248  ;;  %s5853_s4 = sld [smem:[#allocation22_spill]]  ;;  %s484_s11 = sand.u32 1, %s3813_s27  }
  0x74   : > { %s485_s24 = scalar_lea.sflag [#allocation6], %s484_s11 }
  0x79   : > { %s486_s8 = sand.u32 1, %s5853_s4  }
  0x7a   : > { %s2992_s10 = sshll.u32 %s486_s8, 6 }
  0x7b   : > { %s4018_s30 = scalar_lea.vmem [#allocation5], %s2992_s10 }
  0x7c   : > { %3595 = dma.done.wait (%p3874_p2), %s485_s24, 1024  }
  0x7d   : > { %3597 = vsyncadd (%p3874_p2), %s485_s24, 4294966272  ;;  %s5855_s2 = sld [smem:[#allocation21_spill]] }
  0x83   : > { %s496_s13 = sand.u32 1, %s5855_s2  }
  0x84   : > { %s2993_s14 = sshll.u32 %s496_s13, 6 }
  0x85   : > { %s4025_s18 = scalar_lea.vmem [#allocation7], %s2993_s14 }
  0x86   : > { %3599 = dma.done.wait (%p3984_p12), %s485_s24, 1024  }
  0x87   : > { %3601 = vsyncadd (%p3984_p12), %s485_s24, 4294966272 }
  0x88   : > { %3603 = dma.done.wait (%p66_p1), [#allocation9], 24576  }
  0x89   : > { %3605 = vsyncadd (%p66_p1), [#allocation9], 4294942720 }
  0x8a   : > { %3607 = dma.done.wait (%p66_p1), [#allocation12], 8192  }
  0x8b   : > { %3609 = vsyncadd (%p66_p1), [#allocation12], 4294959104  ;;  %v3677_v0 = vmov 0   ;;  %s5856_s21 = sld [smem:[#allocation102_spill]]  ;;  %v676_v4 = vld [vmem:[#allocation8 + $0x178] sm:$0xff]  ;;  %v675_v6 = vld [vmem:[#allocation8 + $0x170] sm:$0xff] }
  0x8c   : > { %3211 = vset.pattern.permute.xlu2 %v3677_v0  ;;  %3210 = vset.pattern.permute.xlu1 %v3677_v0  ;;  %v644_v5 = vld [vmem:[#allocation8 + $0x78] sm:$0xff]  ;;  %v643_v7 = vld [vmem:[#allocation8 + $0x70] sm:$0xff]  ;;  %v674_v9 = vld [vmem:[#allocation8 + $0x168] sm:$0xff]  ;;  %s5858_s25 = sld [smem:[#allocation25_spill]]  ;;  %s2997_s17 = sshll.u32 %s4006_s16, 8 }
  0x8d   : > { %3209 = vset.pattern.permute.xlu0 %v3677_v0  ;;  %811 = vmatpush.msra.mxu2 %v676_v4  ;;  %v660_v8 = vld [vmem:[#allocation8 + $0xf8] sm:$0xff]  ;;  %v659_v10 = vld [vmem:[#allocation8 + $0xf0] sm:$0xff]  ;;  %v642_v11 = vld [vmem:[#allocation8 + $0x68] sm:$0xff]  ;;  %s5914_s29 = sld [smem:[#allocation99_spill]]  ;;  %s5579_s11 = scalar_lea.vmem [#allocation13], %s2997_s17 }
  0x8e   : > { %681 = vmatpush.msra.mxu0 %v644_v5  ;;  %746 = vmatpush.msra.mxu1 %v660_v8  ;;  %v673_v12 = vld [vmem:[#allocation8 + $0x160] sm:$0xff]  ;;  %v658_v13 = vld [vmem:[#allocation8 + $0xe8] sm:$0xff]  ;;  %v672_v18 = vld [vmem:[#allocation8 + $0x158] sm:$0xff]  ;;  %s6003_s3 = sld [smem:[#allocation101_spill]]  ;;  %s2776_s12 = scalar_lea.sflag [#allocation4], %s4006_s16 }
  0x8f   : > { %812 = vmatpush.msra.mxu2 %v675_v6  ;;  %v641_v17 = vld [vmem:[#allocation8 + $0x60] sm:$0xff]  ;;  %v640_v20 = vld [vmem:[#allocation8 + $0x58] sm:$0xff]  ;;  %v671_v21 = vld [vmem:[#allocation8 + $0x150] sm:$0xff]  ;;  %s6056_s4 = sld [smem:[#allocation104_spill]] }
  0x90   : > { %682 = vmatpush.msra.mxu0 %v643_v7  ;;  %747 = vmatpush.msra.mxu1 %v659_v10  ;;  %v657_v19 = vld [vmem:[#allocation8 + $0xe0] sm:$0xff]  ;;  %v656_v22 = vld [vmem:[#allocation8 + $0xd8] sm:$0xff]  ;;  %v639_v23 = vld [vmem:[#allocation8 + $0x50] sm:$0xff]  ;;  %v3678_v10 = vmov 1   ;;  %s6057_s8 = sld [smem:[#allocation26_spill]] }
  0x91   : > { %s5857_s9 = smov %s5856_s21  ;;  %v4042_v1 = vld [vmem:[%s5856_s21 + $0x20] sm:$0xff]  ;;  %813 = vmatpush.msra.mxu2 %v674_v9  ;;  %v670_v24 = vld [vmem:[#allocation8 + $0x148] sm:$0xff]  ;;  %v655_v25 = vld [vmem:[#allocation8 + $0xd0] sm:$0xff]  ;;  %s6058_s13 = sld [smem:[#allocation105_spill]] }
  0x92   : > { %v4047_v2 = vld [vmem:[%s5857_s9 + $0x10] sm:$0xff]  ;;  %v4052_v3 = vld [vmem:[%s5857_s9] sm:$0xff]  ;;  %965 = vperm.xlu2 %3211, %v4042_v1   ;;  %v4060_v14 = vld [vmem:[%s5857_s9 + $0x28] sm:$0xff]  ;;  %683 = vmatpush.msra.mxu0 %v642_v11  ;;  %p589_p1 = scmp.gt.s32.totalorder %s5858_s25, 0  ;;  %p609_p3 = scmp.lt.s32.totalorder %s5858_s25, 1 }
  0x93   : > { %955 = vperm.xlu1 %3210, %v4047_v2   ;;  %945 = vperm.xlu0 %3209, %v4052_v3   ;;  %v4065_v15 = vld [vmem:[%s5857_s9 + $0x18] sm:$0xff]  ;;  %v4070_v16 = vld [vmem:[%s5857_s9 + $0x8] sm:$0xff]  ;;  %v669_v27 = vld [vmem:[#allocation8 + $0x140] sm:$0xff]  ;;  %s3027_s10 = sshll.u32 %s5858_s25, 5  ;;  %s2791_s21 = sshll.u32 %s5579_s11, 4  ;;  %s2792_s21 = int_to_ptr.vmem [resolvable:$true] %s2791_s21 }
  0x94   : > { %748 = vmatpush.msra.mxu1 %v658_v13  ;;  %814 = vmatpush.msra.mxu2 %v673_v12  ;;  %v638_v26 = vld [vmem:[#allocation8 + $0x48] sm:$0xff]  ;;  %v4078_v28 = vld [vmem:[%s5857_s9 + $0x40] sm:$0xff]  ;;  %v4083_v29 = vld [vmem:[%s5857_s9 + $0x38] sm:$0xff]  ;;  %s598_s27 = scalar_select %p589_p1, 1, 0 }
  0x95   : > { %684 = vmatpush.msra.mxu0 %v641_v17  ;;  %v4088_v30 = vld [vmem:[%s5857_s9 + $0x30] sm:$0xff]  ;;  %v637_v31 = vld [vmem:[#allocation8 + $0x40] sm:$0xff]  ;;  %v654_v32 = vld [vmem:[#allocation8 + $0xc8] sm:$0xff]  ;;  %s618_s2 = scalar_select %p609_p3, 1, 0 }
  0x96   : > { %815 = vmatpush.msra.mxu2 %v672_v18  ;;  %749 = vmatpush.msra.mxu1 %v657_v19  ;;  %v668_v33 = vld [vmem:[#allocation8 + $0x138] sm:$0xff]  ;;  %v653_v35 = vld [vmem:[#allocation8 + $0xc0] sm:$0xff]  ;;  %v667_v36 = vld [vmem:[#allocation8 + $0x130] sm:$0xff]  ;;  %v599_v59 = vstv %s598_s27  ;;  %s3017_s24 = sshll.u32 %s6057_s8, 6 }
  0x97   : > { %685 = vmatpush.msra.mxu0 %v640_v20  ;;  %v636_v34 = vld [vmem:[#allocation8 + $0x38] sm:$0xff]  ;;  %v635_v37 = vld [vmem:[#allocation8 + $0x30] sm:$0xff]  ;;  %v666_v39 = vld [vmem:[#allocation8 + $0x128] sm:$0xff]  ;;  %vm4134_vm0 = vcmp.eq.s32.totalorder %v599_v59, 1  ;;  %s6059_s28 = smov %s6058_s13 }
  0x98   : > { %816 = vmatpush.msra.mxu2 %v671_v21  ;;  %750 = vmatpush.msra.mxu1 %v656_v22  ;;  %v652_v38 = vld [vmem:[#allocation8 + $0xb8] sm:$0xff]  ;;  %v634_v40 = vld [vmem:[#allocation8 + $0x28] sm:$0xff]  ;;  %v651_v41 = vld [vmem:[#allocation8 + $0xb0] sm:$0xff]  ;;  %s3526_s1 = scalar_lea.hbm %s6059_s28, 1024 }
  0x99   : > { %686 = vmatpush.msra.mxu0 %v639_v23  ;;  %v665_v42 = vld [vmem:[#allocation8 + $0x120] sm:$0xff]  ;;  %v4096_v43 = vld [vmem:[%s5857_s9 + $0x58] sm:$0xff]  ;;  %v4101_v44 = vld [vmem:[%s5857_s9 + $0x50] sm:$0xff] }
  0x9a   : > { %970 = vperm.xlu2 %3211, %v4060_v14   ;;  %817 = vmatpush.msra.mxu2 %v670_v24  ;;  %v4106_v45 = vld [vmem:[%s5857_s9 + $0x48] sm:$0xff]  ;;  %v633_v46 = vld [vmem:[#allocation8 + $0x20] sm:$0xff]  ;;  %v664_v48 = vld [vmem:[#allocation8 + $0x118] sm:$0xff] }
  0x9b   : > { %960 = vperm.xlu1 %3210, %v4065_v15   ;;  %950 = vperm.xlu0 %3209, %v4070_v16   ;;  %v650_v47 = vld [vmem:[#allocation8 + $0xa8] sm:$0xff]  ;;  %v632_v49 = vld [vmem:[#allocation8 + $0x18] sm:$0xff]  ;;  %v649_v50 = vld [vmem:[#allocation8 + $0xa0] sm:$0xff] }
  0x9c   : > { %751 = vmatpush.msra.mxu1 %v655_v25  ;;  %687 = vmatpush.msra.mxu0 %v638_v26  ;;  %v663_v51 = vld [vmem:[#allocation8 + $0x110] sm:$0xff]  ;;  %v648_v53 = vld [vmem:[#allocation8 + $0x98] sm:$0xff]  ;;  %v662_v54 = vld [vmem:[#allocation8 + $0x108] sm:$0xff] }
  0x9d   : > { %818 = vmatpush.msra.mxu2 %v669_v27  ;;  %v631_v52 = vld [vmem:[#allocation8 + $0x10] sm:$0xff]  ;;  %v630_v55 = vld [vmem:[#allocation8 + $0x8] sm:$0xff]  ;;  %v661_v57 = vld [vmem:[#allocation8 + $0x100] sm:$0xff] }
  0x9e   : > { %688 = vmatpush.msra.mxu0 %v637_v31  ;;  %752 = vmatpush.msra.mxu1 %v654_v32  ;;  %v647_v56 = vld [vmem:[#allocation8 + $0x90] sm:$0xff]  ;;  %v4120_v60 = vld [vmem:[%s4010_s5 + $0x40] sm:$0xff]  ;;  %v4125_v61 = vld [vmem:[%s5857_s9 + $0x68] sm:$0xff] }
  0x9f   : > { %819 = vmatpush.msra.mxu2 %v668_v33  ;;  %v4117_v58 = vld [vmem:[%s5857_s9 + $0x70] sm:$0xff]  ;;  %v4130_v62 = vld [vmem:[%s5857_s9 + $0x60] sm:$0xff]  ;;  %v646_v0 = vld [vmem:[#allocation8 + $0x88] sm:$0xff]  ;;  %v3679_v33 = vmov 2  }
  0xa0   : > { %689 = vmatpush.msra.mxu0 %v636_v34  ;;  %753 = vmatpush.msra.mxu1 %v653_v35  ;;  %v629_v63 = vld [vmem:[#allocation8] sm:$0xff]  ;;  %v4148_v8 = vld [vmem:[%s4010_s5 + $0x48] sm:$0xff]  ;;  %v4153_v9 = vld [vmem:[%s5857_s9 + $0x78] sm:$0xff] }
  0xa1   : > { %820 = vmatpush.msra.mxu2 %v667_v36  ;;  %v590_v4 = vld [vmem:[%s4018_s30] sm:$0xff]  ;;  %v591_v11 = vld [vmem:[%s4018_s30 + $0x8] sm:$0xff]  ;;  %v4167_v13 = vld [vmem:[%s4010_s5 + $0x50] sm:$0xff] }
  0xa2   : > { %985 = vperm.xlu2 %3211, %v4078_v28   ;;  %690 = vmatpush.msra.mxu0 %v635_v37  ;;  %v645_v6 = vld [vmem:[#allocation8 + $0x80] sm:$0xff]  ;;  %v4163_v12 = vld [vmem:[%s4010_s5 + $0x8] sm:$0xff]  ;;  %v592_v17 = vld [vmem:[%s4018_s30 + $0x10] sm:$0xff] }
  0xa3   : > { %980 = vperm.xlu1 %3210, %v4083_v29   ;;  %975 = vperm.xlu0 %3209, %v4088_v30   ;;  %v4144_v7 = vld [vmem:[%s4010_s5] sm:$0xff]  ;;  %v4175_v18 = vld [vmem:[%s4010_s5 + $0x10] sm:$0xff]  ;;  %v4181_v19 = vld [vmem:[%s4010_s5 + $0x58] sm:$0xff] }
  0xa4   : > { %754 = vmatpush.msra.mxu1 %v652_v38  ;;  %821 = vmatpush.msra.mxu2 %v666_v39  ;;  %v593_v20 = vld [vmem:[%s4018_s30 + $0x18] sm:$0xff]  ;;  %v4195_v22 = vld [vmem:[%s4010_s5 + $0x60] sm:$0xff]  ;;  %v4209_v25 = vld [vmem:[%s4010_s5 + $0x68] sm:$0xff]  ;;  %v3680_v38 = vmov 3  }
  0xa5   : > { %691 = vmatpush.msra.mxu0 %v634_v40  ;;  %v4189_v21 = vld [vmem:[%s4010_s5 + $0x18] sm:$0xff]  ;;  %v594_v23 = vld [vmem:[%s4018_s30 + $0x20] sm:$0xff]  ;;  %v595_v26 = vld [vmem:[%s4018_s30 + $0x28] sm:$0xff]  ;;  %v619_v40 = vstv %s618_s2  ;;  %s2788_s2 = sadd.s32 %s3027_s10, %s3017_s24 }
  0xa6   : > { %755 = vmatpush.msra.mxu1 %v651_v41  ;;  %822 = vmatpush.msra.mxu2 %v665_v42  ;;  %v4203_v24 = vld [vmem:[%s4010_s5 + $0x20] sm:$0xff]  ;;  %v4217_v27 = vld [vmem:[%s4010_s5 + $0x28] sm:$0xff]  ;;  %v4223_v31 = vld [vmem:[%s4010_s5 + $0x70] sm:$0xff]  ;;  %vm4258_vm1 = vcmp.eq.s32.totalorder %v619_v40, 1 }
  0xa7   : > { %692 = vmatpush.msra.mxu0 %v633_v46  ;;  %v596_v32 = vld [vmem:[%s4018_s30 + $0x30] sm:$0xff]  ;;  %v4239_v35 = vld [vmem:[%s4010_s5 + $0x78] sm:$0xff]  ;;  %v610_v41 = vld [vmem:[%s4025_s18] sm:$0xff] }
  0xa8   : > { %756 = vmatpush.msra.mxu1 %v650_v47  ;;  %823 = vmatpush.msra.mxu2 %v664_v48  ;;  %v4231_v34 = vld [vmem:[%s4010_s5 + $0x30] sm:$0xff]  ;;  %v597_v37 = vld [vmem:[%s4018_s30 + $0x38] sm:$0xff]  ;;  %v611_v47 = vld [vmem:[%s4025_s18 + $0x8] sm:$0xff]  ;;  %s3018_s30 = sshll.u32 %s2788_s2, 3 }
  0xa9   : > { %693 = vmatpush.msra.mxu0 %v632_v49  ;;  %v4249_v39 = vld [vmem:[%s4010_s5 + $0x38] sm:$0xff]  ;;  %v612_v49 = vld [vmem:[%s4025_s18 + $0x10] sm:$0xff]  ;;  %v615_v59 = vld [vmem:[%s4025_s18 + $0x28] sm:$0xff]  ;;  %s2790_s14 = scalar_lea.hbm %s6058_s13, %s3018_s30 }
  0xaa   : > { %1000 = vperm.xlu2 %3211, %v4096_v43   ;;  %757 = vmatpush.msra.mxu1 %v649_v50 }
  0xab   : > { %995 = vperm.xlu1 %3210, %v4101_v44   ;;  %990 = vperm.xlu0 %3209, %v4106_v45  }
  0xac   : > { %824 = vmatpush.msra.mxu2 %v663_v51  ;;  %694 = vmatpush.msra.mxu0 %v631_v52  ;;  %v613_v52 = vld [vmem:[%s4025_s18 + $0x18] sm:$0xff] }
  0xad   : > { %758 = vmatpush.msra.mxu1 %v648_v53 }
  0xae   : > { %825 = vmatpush.msra.mxu2 %v662_v54  ;;  %695 = vmatpush.msra.mxu0 %v630_v55  ;;  %v614_v55 = vld [vmem:[%s4025_s18 + $0x20] sm:$0xff] }
  0xaf   : > { %759 = vmatpush.msra.mxu1 %v647_v56 }
  0xb0   : > { %826 = vmatpush.msra.mxu2 %v661_v57  ;;  %696 = vmatpush.msra.mxu0 %v629_v63 }
  0xb1   : > { %827 = vmatmul.f32.vlgmr.msra.gmra.mxu2 %v4120_v60  ;;  %760 = vmatpush.msra.mxu1 %v646_v0  ;;  %v616_v0 = vld [vmem:[%s4025_s18 + $0x30] sm:$0xff] }
  0xb2   : > { %1015 = vperm.xlu2 %3211, %v4117_v58   ;;  %2998 = vmatmul.msk.f32.vlgmr.msra.gmra.mxu0 %vm4134_vm0, %v590_v4  ;;  %v5750_v4 = vmov 7  }
  0xb3   : > { %1010 = vperm.xlu1 %3210, %v4125_v61   ;;  %1005 = vperm.xlu0 %3209, %v4130_v62  }
  0xb4   : > { %761 = vmatpush.msra.mxu1 %v645_v6 }
  0xb5   : > { %762 = vmatmul.f32.vlgmr.msra.gmra.mxu1 %v4144_v7 }
  0xb9   : > { %830 = vmatmul.f32.gmra.mxu2 %v4148_v8 }
  0xba   : > { %3213 = vset.pattern.permute.xlu2 %v3678_v10  ;;  %2999 = vmatmul.msk.f32.gmra.mxu0 %vm4134_vm0, %v591_v11 }
  0xbb   : > { %3212 = vset.pattern.permute.xlu1 %v3678_v10  ;;  %1020 = vperm.xlu0 %3209, %v4153_v9  }
  0xbc   : > { %1044 = vperm.xlu2 %3213, %v4070_v16   ;;  %1040 = vperm.xlu1 %3212, %v4052_v3  }
  0xbd   : > { %765 = vmatmul.f32.gmra.mxu1 %v4163_v12 }
  0xc1   : > { %833 = vmatmul.f32.gmra.mxu2 %v4167_v13 }
  0xc2   : > { %3000 = vmatmul.msk.f32.gmra.mxu0 %vm4134_vm0, %v592_v17 }
  0xc3   : > { %3214 = vset.pattern.permute.xlu0 %v3678_v10 }
  0xc4   : > { %1056 = vperm.xlu2 %3213, %v4042_v1   ;;  %1052 = vperm.xlu1 %3212, %v4065_v15  }
  0xc5   : > { %1048 = vperm.xlu0 %3214, %v4047_v2   ;;  %768 = vmatmul.f32.gmra.mxu1 %v4175_v18 }
  0xc9   : > { %836 = vmatmul.f32.gmra.mxu2 %v4181_v19 }
  0xca   : > { %3001 = vmatmul.msk.f32.gmra.mxu0 %vm4134_vm0, %v593_v20  ;;  %v5746_v20 = vmov 8  }
  0xcc   : > { %1064 = vperm.xlu2 %3213, %v4088_v30   ;;  %1060 = vperm.xlu1 %3212, %v4060_v14  }
  0xcd   : > { %1068 = vperm.xlu0 %3214, %v4083_v29   ;;  %771 = vmatmul.f32.gmra.mxu1 %v4189_v21 }
  0xd1   : > { %839 = vmatmul.f32.gmra.mxu2 %v4195_v22 }
  0xd2   : > { %3002 = vmatmul.msk.f32.gmra.mxu0 %vm4134_vm0, %v594_v23 }
  0xd4   : > { %1076 = vperm.xlu2 %3213, %v4106_v45   ;;  %1072 = vperm.xlu1 %3212, %v4078_v28  }
  0xd5   : > { %1080 = vperm.xlu0 %3214, %v4101_v44   ;;  %774 = vmatmul.f32.gmra.mxu1 %v4203_v24 }
  0xd9   : > { %842 = vmatmul.f32.gmra.mxu2 %v4209_v25 }
  0xda   : > { %3003 = vmatmul.msk.f32.gmra.mxu0 %vm4134_vm0, %v595_v26 }
  0xdc   : > { %1088 = vperm.xlu2 %3213, %v4130_v62   ;;  %1084 = vperm.xlu1 %3212, %v4096_v43  }
  0xdd   : > { %1092 = vperm.xlu0 %3214, %v4125_v61   ;;  %777 = vmatmul.f32.gmra.mxu1 %v4217_v27 }
  0xe1   : > { %845 = vmatmul.f32.gmra.mxu2 %v4223_v31 }
  0xe2   : > { %3004 = vmatmul.msk.f32.gmra.mxu0 %vm4134_vm0, %v596_v32 }
  0xe4   : > { %1100 = vperm.xlu2 %3213, %v4153_v9   ;;  %1096 = vperm.xlu1 %3212, %v4117_v58  }
  0xe5   : > { %3215 = vset.pattern.permute.xlu0 %v3679_v33  ;;  %780 = vmatmul.f32.gmra.mxu1 %v4231_v34 }
  0xe6   : > { %1153 = vperm.xlu0 %3215, %v4052_v3  }
  0xe9   : > { %848 = vmatmul.f32.gmra.mxu2 %v4239_v35 }
  0xea   : > { %3005 = vmatmul.msk.f32.gmra.mxu0 %vm4134_vm0, %v597_v37 }
  0xec   : > { %v4241_v36 = vpop.permute.xlu2 %965  ;;  %3217 = vset.pattern.permute.xlu2 %v3680_v38  ;;  %3216 = vset.pattern.permute.xlu1 %v3679_v33 }
  0xed   : > { %1233 = vperm.xlu2 %3217, %v4052_v3   ;;  %1157 = vperm.xlu1 %3216, %v4070_v16  }
  0xee   : > { %3218 = vset.pattern.permute.xlu0 %v3680_v38  ;;  %783 = vmatmul.f32.gmra.mxu1 %v4249_v39 }
  0xef   : > { %1241 = vperm.xlu0 %3218, %v4047_v2  }
  0xf1   : > { %3006 = vmatmul.msk.f32.gmra.mxu2 %vm4258_vm1, %v610_v41 }
  0xf2   : > { %721 = vmatmul.f32.gmra.mxu0 %v4144_v7  ;;  %v617_v7 = vld [vmem:[%s4025_s18 + $0x38] sm:$0xff] }
  0xf4   : > { %v4262_v46 = vpop.permute.xlu2 %970 }
  0xf5   : > { %5863 = vst [vmem:[#allocation37_spill] sm:$0xff] %v4262_v46  ;;  %1237 = vperm.xlu2 %3217, %v4070_v16   ;;  %1161 = vperm.xlu1 %3216, %v4047_v2  }
  0xf6   : > { %786 = vmatmul.f32.gmra.mxu1 %v4120_v60 }
  0xf7   : > { %1253 = vperm.xlu0 %3218, %v4060_v14  }
  0xf9   : > { %3007 = vmatmul.msk.f32.gmra.mxu2 %vm4258_vm1, %v611_v47 }
  0xfa   : > { %724 = vmatmul.f32.gmra.mxu0 %v4163_v12 }
  0xfc   : > { %v4272_v48 = vpop.permute.xlu2 %985 }
  0xfd   : > { %5864 = vst [vmem:[#allocation38_spill] sm:$0xff] %v4272_v48  ;;  %3220 = vset.pattern.permute.xlu2 %v3679_v33  ;;  %3219 = vset.pattern.permute.xlu1 %v3680_v38  ;;  %v5888_v48 = vmov 5  }
  0xfe   : > { %1165 = vperm.xlu2 %3220, %v4065_v15   ;;  %1245 = vperm.xlu1 %3219, %v4065_v15  }
  0xff   : > { %3223 = vset.pattern.permute.xlu0 %v3679_v33  ;;  %789 = vmatmul.f32.gmra.mxu1 %v4148_v8 }
 0x100   : > { %1177 = vperm.xlu0 %3223, %v4088_v30  }
 0x101   : > { %3008 = vmatmul.msk.f32.gmra.mxu2 %vm4258_vm1, %v612_v49 }
 0x102   : > { %727 = vmatmul.f32.gmra.mxu0 %v4175_v18 }
 0x104   : > { %v4289_v51 = vpop.permute.xlu2 %1000 }
 0x105   : > { %v4285_v50 = vpop.permute.xlu1 %955  ;;  %5865 = vst [vmem:[#allocation39_spill] sm:$0xff] %v4289_v51 }
 0x106   : > { %1169 = vperm.xlu2 %3220, %v4042_v1   ;;  %1249 = vperm.xlu1 %3219, %v4042_v1  }
 0x107   : > { %792 = vmatmul.f32.gmra.mxu1 %v4167_v13 }
 0x108   : > { %1197 = vperm.xlu0 %3223, %v4096_v43  }
 0x109   : > { %3009 = vmatmul.msk.f32.gmra.mxu2 %vm4258_vm1, %v613_v52 }
 0x10a   : > { %730 = vmatmul.f32.gmra.mxu0 %v4189_v21 }
 0x10c   : > { %v4301_v54 = vpop.permute.xlu2 %1015 }
 0x10d   : > { %v4297_v53 = vpop.permute.xlu1 %960  ;;  %5866 = vst [vmem:[#allocation40_spill] sm:$0xff] %v4301_v54 }
 0x10e   : > { %3222 = vset.pattern.permute.xlu2 %v3680_v38  ;;  %3221 = vset.pattern.permute.xlu1 %v3679_v33 }
 0x10f   : > { %795 = vmatmul.f32.gmra.mxu1 %v4181_v19  ;;  %1257 = vperm.xlu2 %3222, %v4088_v30  }
 0x110   : > { %1173 = vperm.xlu1 %3221, %v4060_v14   ;;  %3228 = vset.pattern.permute.xlu0 %v3680_v38 }
 0x111   : > { %1269 = vperm.xlu0 %3228, %v4106_v45   ;;  %3010 = vmatmul.msk.f32.gmra.mxu2 %vm4258_vm1, %v614_v55 }
 0x112   : > { %733 = vmatmul.f32.gmra.mxu0 %v4203_v24 }
 0x115   : > { %v4314_v56 = vpop.permute.xlu1 %980 }
 0x116   : > { %5867 = vst [vmem:[#allocation41_spill] sm:$0xff] %v4314_v56  ;;  %v4317_v57 = vpop.permute.xlu2 %1044  ;;  %v1647_v56 = vld [vmem:[#allocation10 + $0x78] sm:$0xff] }
 0x117   : > { %798 = vmatmul.f32.gmra.mxu1 %v4195_v22  ;;  %3225 = vset.pattern.permute.xlu2 %v3679_v33 }
 0x118   : > { %3224 = vset.pattern.permute.xlu1 %v3680_v38  ;;  %1181 = vperm.xlu2 %3225, %v4083_v29  }
 0x119   : > { %1261 = vperm.xlu1 %3224, %v4083_v29   ;;  %1289 = vperm.xlu0 %3228, %v4117_v58  }
 0x11a   : > { %3011 = vmatmul.msk.f32.gmra.mxu2 %vm4258_vm1, %v615_v59  ;;  %736 = vmatmul.f32.gmra.mxu0 %v4217_v27 }
 0x11b   : > { %1780 = vmatpush.msra.mxu3 %v1647_v56  ;;  %v1659_v56 = vld [vmem:[#allocation10 + $0xd8] sm:$0xff] }
 0x11d   : > { %v4328_v60 = vpop.permute.xlu1 %995 }
 0x11e   : > { %5868 = vst [vmem:[#allocation42_spill] sm:$0xff] %v4328_v60  ;;  %v4331_v63 = vpop.permute.xlu2 %1056 }
 0x11f   : > { %801 = vmatmul.f32.gmra.mxu1 %v4209_v25 }
 0x120   : > { %1185 = vperm.xlu2 %3225, %v4078_v28  }
 0x121   : > { %1265 = vperm.xlu1 %3224, %v4078_v28   ;;  %3246 = vset.pattern.permute.xlu0 %v5750_v4  ;;  %v5752_v28 = vmov 5  }
 0x122   : > { %1489 = vperm.xlu0 %3246, %v4042_v1   ;;  %3012 = vmatmul.msk.f32.gmra.mxu2 %vm4258_vm1, %v616_v0 }
 0x123   : > { %739 = vmatmul.f32.gmra.mxu0 %v4231_v34 }
 0x125   : > { %v4341_v5 = vpop.permute.xlu1 %1010 }
 0x126   : > { %5869 = vst [vmem:[#allocation43_spill] sm:$0xff] %v4341_v5  ;;  %v4344_v6 = vpop.permute.xlu2 %1064 }
 0x127   : > { %5870 = vst [vmem:[#allocation44_spill] sm:$0xff] %v4344_v6  ;;  %804 = vmatmul.f32.gmra.mxu1 %v4223_v31  ;;  %v1646_v6 = vld [vmem:[#allocation10 + $0x70] sm:$0xff] }
 0x128   : > { %3227 = vset.pattern.permute.xlu2 %v3680_v38  ;;  %1781 = vmatpush.msra.mxu3 %v1646_v6 }
 0x129   : > { %3226 = vset.pattern.permute.xlu1 %v3679_v33  ;;  %1273 = vperm.xlu2 %3227, %v4101_v44  }
 0x12a   : > { %1189 = vperm.xlu1 %3226, %v4106_v45   ;;  %3247 = vset.pattern.permute.xlu0 %v5752_v28 }
 0x12b   : > { %1313 = vperm.xlu0 %3247, %v4052_v3   ;;  %3013 = vmatmul.msk.f32.gmra.mxu2 %vm4258_vm1, %v617_v7 }
 0x12c   : > { %742 = vmatmul.f32.gmra.mxu0 %v4249_v39 }
 0x12e   : > { %v4357_v8 = vpop.permute.xlu2 %1076  ;;  %v4359_v10 = vpop.permute.xlu1 %1040 }
 0x12f   : > { %5871 = vst [vmem:[#allocation45_spill] sm:$0xff] %v4357_v8  ;;  %807 = vmatmul.f32.gmra.mxu1 %v4239_v35  ;;  %v4363_v11 = vpop.f32.mrf.mxu0 }
 0x131   : > { %1277 = vperm.xlu2 %3227, %v4096_v43  }
 0x132   : > { %1193 = vperm.xlu1 %3226, %v4101_v44   ;;  %v4367_v12 = vpop.f32.mrf.mxu1 }
 0x133   : > { %1333 = vperm.xlu0 %3247, %v4060_v14  }
 0x134   : > { %v4369_v13 = vpop.f32.mrf.mxu2 }
 0x136   : > { %v4371_v17 = vpop.permute.xlu2 %1088  ;;  %v4373_v18 = vpop.permute.xlu1 %1052 }
 0x137   : > { %5872 = vst [vmem:[#allocation46_spill] sm:$0xff] %v4371_v17  ;;  %v4376_v19 = vpop.f32.mrf.mxu0  ;;  %v5882_v17 = vmov 7  }
 0x139   : > { %3230 = vset.pattern.permute.xlu2 %v3679_v33 }
 0x13a   : > { %3229 = vset.pattern.permute.xlu1 %v3680_v38  ;;  %1201 = vperm.xlu2 %3230, %v4130_v62   ;;  %v4383_v14 = vpop.f32.mrf.mxu1 }
 0x13b   : > { %1281 = vperm.xlu1 %3229, %v4130_v62   ;;  %3252 = vset.pattern.permute.xlu0 %v5746_v20 }
 0x13c   : > { %1557 = vperm.xlu0 %3252, %v4070_v16   ;;  %v4385_v21 = vpop.f32.mrf.mxu2 }
 0x13e   : > { %v4387_v22 = vpop.permute.xlu2 %1100  ;;  %v4389_v23 = vpop.permute.xlu1 %1060 }
 0x13f   : > { %5873 = vst [vmem:[#allocation47_spill] sm:$0xff] %v4387_v22  ;;  %v4391_v24 = vpop.f32.mrf.mxu0 }
 0x142   : > { %1205 = vperm.xlu2 %3230, %v4125_v61   ;;  %v4396_v25 = vpop.f32.mrf.mxu1 }
 0x143   : > { %1285 = vperm.xlu1 %3229, %v4125_v61   ;;  %v5748_v61 = vmov 6  }
 0x144   : > { %1577 = vperm.xlu0 %3252, %v4088_v30   ;;  %v4398_v26 = vpop.f32.mrf.mxu2 }
 0x146   : > { %v4402_v31 = vpop.permute.xlu1 %1072 }
 0x147   : > { %v4400_v27 = vpop.permute.xlu2 %1233  ;;  %5874 = vst [vmem:[#allocation48_spill] sm:$0xff] %v4402_v31  ;;  %v4404_v32 = vpop.f32.mrf.mxu0  ;;  %v1662_v31 = vld [vmem:[#allocation10 + $0xf0] sm:$0xff] }
 0x14a   : > { %3232 = vset.pattern.permute.xlu2 %v3680_v38  ;;  %v4411_v30 = vpop.f32.mrf.mxu1  ;;  %v4420_v38 = vpop.permute.xlu0 %945 }
 0x14b   : > { %3231 = vset.pattern.permute.xlu1 %v3679_v33  ;;  %1293 = vperm.xlu2 %3232, %v4153_v9  }
 0x14c   : > { %1209 = vperm.xlu1 %3231, %v4117_v58   ;;  %3257 = vset.pattern.permute.xlu0 %v5748_v61  ;;  %v4414_v34 = vpop.f32.mrf.mxu2 }
 0x14d   : > { %1401 = vperm.xlu0 %3257, %v4047_v2  }
 0x14e   : > { %v4418_v37 = vpop.permute.xlu1 %1084 }
 0x14f   : > { %v4416_v35 = vpop.permute.xlu2 %1237  ;;  %5875 = vst [vmem:[#allocation49_spill] sm:$0xff] %v4418_v37  ;;  %v4422_v33 = vpop.f32.mrf.mxu0 }
 0x152   : > { %v4426_v39 = vpop.f32.mrf.mxu1  ;;  %v4438_v49 = vpop.permute.xlu0 %950 }
 0x153   : > { %3233 = vset.pattern.permute.xlu2 %v5750_v4 }
 0x154   : > { %1213 = vperm.xlu1 %3231, %v4153_v9   ;;  %1473 = vperm.xlu2 %3233, %v4052_v3   ;;  %v4430_v40 = vpop.f32.mrf.mxu2 }
 0x155   : > { %1421 = vperm.xlu0 %3257, %v4083_v29  }
 0x156   : > { %v4432_v41 = vpop.permute.xlu1 %1096 }
 0x157   : > { %5876 = vst [vmem:[#allocation50_spill] sm:$0xff] %v4432_v41  ;;  %v4436_v47 = vpop.f32.mrf.mxu0  ;;  %v5880_v41 = vmov 6  }
 0x158   : > { %v4434_v42 = vpop.permute.xlu2 %1165 }
 0x15a   : > { %v4441_v52 = vpop.f32.mrf.mxu1 }
 0x15c   : > { %3234 = vset.pattern.permute.xlu1 %v5746_v20  ;;  %3235 = vset.pattern.permute.xlu2 %v5748_v61  ;;  %v4446_v29 = vpop.f32.mrf.mxu2  ;;  %v4458_v20 = vpop.permute.xlu0 %975 }
 0x15d   : > { %1553 = vperm.xlu1 %3234, %v4052_v3   ;;  %3266 = vset.pattern.permute.xlu0 %v5750_v4  ;;  %5877 = vst [vmem:[#allocation51_spill] sm:$0xff] %v4458_v20 }
 0x15e   : > { %1393 = vperm.xlu2 %3235, %v4052_v3   ;;  %1509 = vperm.xlu0 %3266, %v4106_v45  }
 0x15f   : > { %v4450_v55 = vpop.permute.xlu1 %1157  ;;  %v4454_v0 = vpop.f32.mrf.mxu0 }
 0x160   : > { %v4452_v59 = vpop.permute.xlu2 %1169 }
 0x162   : > { %v4456_v7 = vpop.f32.mrf.mxu1 }
 0x164   : > { %v4461_v61 = vpop.f32.mrf.mxu2  ;;  %v4479_v5 = vpop.permute.xlu0 %990 }
 0x165   : > { %3236 = vset.pattern.permute.xlu1 %v5750_v4  ;;  %5881 = vst [vmem:[#allocation54_spill] sm:$0xff] %v4479_v5  ;;  %v1663_v5 = vld [vmem:[#allocation10 + $0xf8] sm:$0xff] }
 0x166   : > { %3237 = vset.pattern.permute.xlu2 %v5752_v28  ;;  %1477 = vperm.xlu1 %3236, %v4070_v16  }
 0x167   : > { %3271 = vset.pattern.permute.xlu0 %v5752_v28  ;;  %1317 = vperm.xlu2 %3237, %v4070_v16   ;;  %v4467_v3 = vpop.permute.xlu1 %1161  ;;  %v4472_v22 = vpop.f32.mrf.mxu0  ;;  %v5883_v28 = vmov 8  }
 0x168   : > { %1353 = vperm.xlu0 %3271, %v4101_v44   ;;  %1845 = vmatpush.msrb.mxu0 %v1663_v5  ;;  %v1661_v5 = vld [vmem:[#allocation10 + $0xe8] sm:$0xff] }
 0x169   : > { %v4470_v45 = vpop.permute.xlu2 %1257 }
 0x16a   : > { %5878 = vst [vmem:[#allocation52_spill] sm:$0xff] %v4470_v45  ;;  %1846 = vmatpush.msrb.mxu0 %v1662_v31  ;;  %v1693_v31 = vld [vmem:[#allocation10 + $0x1e8] sm:$0xff] }
 0x16b   : > { %v4474_v54 = vpop.f32.mrf.mxu1 }
 0x16c   : > { %v4476_v4 = vpop.f32.mrf.mxu2  ;;  %1847 = vmatpush.msrb.mxu0 %v1661_v5 }
 0x16d   : > { %5879 = vst [vmem:[#allocation53_spill] sm:$0xff] %v4476_v4 }
 0x16e   : > { %3238 = vset.pattern.permute.xlu1 %v5880_v41 }
 0x16f   : > { %3239 = vset.pattern.permute.xlu2 %v5882_v17  ;;  %1397 = vperm.xlu1 %3238, %v4070_v16   ;;  %v4488_v51 = vpop.f32.mrf.mxu0 }
 0x170   : > { %3276 = vset.pattern.permute.xlu0 %v5883_v28  ;;  %1481 = vperm.xlu2 %3239, %v4047_v2   ;;  %v4485_v44 = vpop.permute.xlu1 %1245  ;;  %5884 = vst [vmem:[#allocation55_spill] sm:$0xff] %v4488_v51 }
 0x171   : > { %1597 = vperm.xlu0 %3276, %v4096_v43   ;;  %v4501_v43 = vpop.permute.xlu0 %1005 }
 0x172   : > { %v4490_v37 = vpop.permute.xlu2 %1181  ;;  %5889 = vst [vmem:[#allocation59_spill] sm:$0xff] %v4501_v43  ;;  %v1694_v43 = vld [vmem:[#allocation10 + $0x1f0] sm:$0xff] }
 0x173   : > { %5885 = vst [vmem:[#allocation56_spill] sm:$0xff] %v4490_v37  ;;  %v4492_v60 = vpop.f32.mrf.mxu1  ;;  %v1679_v37 = vld [vmem:[#allocation10 + $0x178] sm:$0xff] }
 0x174   : > { %5886 = vst [vmem:[#allocation57_spill] sm:$0xff] %v4492_v60  ;;  %v4494_v8 = vpop.f32.mrf.mxu2  ;;  %1910 = vmatpush.msrb.mxu1 %v1679_v37  ;;  %v1678_v60 = vld [vmem:[#allocation10 + $0x170] sm:$0xff]  ;;  %v1676_v37 = vld [vmem:[#allocation10 + $0x160] sm:$0xff] }
 0x175   : > { %5887 = vst [vmem:[#allocation58_spill] sm:$0xff] %v4494_v8  ;;  %v1695_v8 = vld [vmem:[#allocation10 + $0x1f8] sm:$0xff] }
 0x176   : > { %1975 = vmatpush.msrb.mxu2 %v1695_v8  ;;  %1911 = vmatpush.msrb.mxu1 %v1678_v60  ;;  %v1644_v8 = vld [vmem:[#allocation10 + $0x60] sm:$0xff] }
 0x177   : > { %3240 = vset.pattern.permute.xlu1 %v5888_v48  ;;  %v4506_v45 = vpop.f32.mrf.mxu0 }
 0x178   : > { %3241 = vset.pattern.permute.xlu2 %v5883_v28  ;;  %1321 = vperm.xlu1 %3240, %v4047_v2   ;;  %v4499_v16 = vpop.permute.xlu1 %1249  ;;  %5890 = vst [vmem:[#allocation60_spill] sm:$0xff] %v4506_v45  ;;  %v1677_v45 = vld [vmem:[#allocation10 + $0x168] sm:$0xff] }
 0x179   : > { %3281 = vset.pattern.permute.xlu0 %v5880_v41  ;;  %1561 = vperm.xlu2 %3241, %v4047_v2   ;;  %v1660_v2 = vld [vmem:[#allocation10 + $0xe0] sm:$0xff]  ;;  %v4523_v5 = vpop.permute.xlu0 %1020 }
 0x17a   : > { %1441 = vperm.xlu0 %3281, %v4130_v62   ;;  %v4508_v20 = vpop.permute.xlu2 %1185  ;;  %v1645_v62 = vld [vmem:[#allocation10 + $0x68] sm:$0xff]  ;;  %1976 = vmatpush.msrb.mxu2 %v1694_v43  ;;  %v1692_v43 = vld [vmem:[#allocation10 + $0x1e0] sm:$0xff]  ;;  %5896 = vst [vmem:[#allocation66_spill] sm:$0xff] %v4523_v5 }
 0x17b   : > { %5891 = vst [vmem:[#allocation61_spill] sm:$0xff] %v4508_v20  ;;  %1848 = vmatpush.msrb.mxu0 %v1660_v2  ;;  %1782 = vmatpush.msra.mxu3 %v1645_v62  ;;  %v1643_v62 = vld [vmem:[#allocation10 + $0x58] sm:$0xff] }
 0x17c   : > { %v4510_v51 = vpop.f32.mrf.mxu1  ;;  %v4512_v4 = vpop.f32.mrf.mxu2  ;;  %1912 = vmatpush.msrb.mxu1 %v1677_v45  ;;  %1977 = vmatpush.msrb.mxu2 %v1693_v31  ;;  %v1658_v45 = vld [vmem:[#allocation10 + $0xd0] sm:$0xff]  ;;  %v1675_v31 = vld [vmem:[#allocation10 + $0x158] sm:$0xff] }
 0x17d   : > { %5892 = vst [vmem:[#allocation62_spill] sm:$0xff] %v4510_v51  ;;  %1849 = vmatpush.msrb.mxu0 %v1659_v56  ;;  %1783 = vmatpush.msra.mxu3 %v1644_v8  ;;  %v1657_v51 = vld [vmem:[#allocation10 + $0xc8] sm:$0xff]  ;;  %v1656_v56 = vld [vmem:[#allocation10 + $0xc0] sm:$0xff] }
 0x17e   : > { %5893 = vst [vmem:[#allocation63_spill] sm:$0xff] %v4512_v4  ;;  %1913 = vmatpush.msrb.mxu1 %v1676_v37  ;;  %v1691_v4 = vld [vmem:[#allocation10 + $0x1d8] sm:$0xff]  ;;  %1978 = vmatpush.msrb.mxu2 %v1692_v43  ;;  %v1641_v37 = vld [vmem:[#allocation10 + $0x48] sm:$0xff] }
 0x17f   : > { %v4521_v6 = vpop.f32.mrf.mxu0  ;;  %1850 = vmatpush.msrb.mxu0 %v1658_v45  ;;  %1784 = vmatpush.msra.mxu3 %v1643_v62  ;;  %v1673_v43 = vld [vmem:[#allocation10 + $0x148] sm:$0xff]  ;;  %v1640_v62 = vld [vmem:[#allocation10 + $0x40] sm:$0xff] }
 0x180   : > { %3242 = vset.pattern.permute.xlu1 %v5882_v17  ;;  %5895 = vst [vmem:[#allocation65_spill] sm:$0xff] %v4521_v6  ;;  %v1642_v6 = vld [vmem:[#allocation10 + $0x50] sm:$0xff]  ;;  %1914 = vmatpush.msrb.mxu1 %v1675_v31  ;;  %v1672_v31 = vld [vmem:[#allocation10 + $0x140] sm:$0xff] }
 0x181   : > { %3243 = vset.pattern.permute.xlu2 %v5888_v48  ;;  %1485 = vperm.xlu1 %3242, %v4065_v15  }
 0x182   : > { %3286 = vset.pattern.permute.xlu0 %v5882_v17  ;;  %1325 = vperm.xlu2 %3243, %v4065_v15   ;;  %v4519_v60 = vpop.permute.xlu1 %1173 }
 0x183   : > { %5894 = vst [vmem:[#allocation64_spill] sm:$0xff] %v4519_v60  ;;  %1529 = vperm.xlu0 %3286, %v4117_v58   ;;  %v4526_v2 = vpop.permute.xlu2 %1273  ;;  %v1674_v60 = vld [vmem:[#allocation10 + $0x150] sm:$0xff]  ;;  %1979 = vmatpush.msrb.mxu2 %v1691_v4 }
 0x184   : > { %5897 = vst [vmem:[#allocation67_spill] sm:$0xff] %v4526_v2  ;;  %v4528_v20 = vpop.f32.mrf.mxu1  ;;  %v4530_v46 = vpop.f32.mrf.mxu2  ;;  %v1690_v58 = vld [vmem:[#allocation10 + $0x1d0] sm:$0xff]  ;;  %1851 = vmatpush.msrb.mxu0 %v1657_v51  ;;  %1785 = vmatpush.msra.mxu3 %v1642_v6  ;;  %v1689_v51 = vld [vmem:[#allocation10 + $0x1c8] sm:$0xff] }
 0x185   : > { %5898 = vst [vmem:[#allocation68_spill] sm:$0xff] %v4528_v20  ;;  %1915 = vmatpush.msrb.mxu1 %v1674_v60  ;;  %1980 = vmatpush.msrb.mxu2 %v1690_v58  ;;  %v1655_v60 = vld [vmem:[#allocation10 + $0xb8] sm:$0xff]  ;;  %v4546_v58 = vpop.permute.xlu0 %1048  ;;  %v1654_v2 = vld [vmem:[#allocation10 + $0xb0] sm:$0xff]  ;;  %v1664_v20 = vld [vmem:[#allocation10 + $0x100] sm:$0xff] }
 0x186   : > { %5899 = vst [vmem:[#allocation69_spill] sm:$0xff] %v4530_v46  ;;  %1852 = vmatpush.msrb.mxu0 %v1656_v56  ;;  %1786 = vmatpush.msra.mxu3 %v1641_v37  ;;  %v1639_v46 = vld [vmem:[#allocation10 + $0x38] sm:$0xff]  ;;  %v1653_v56 = vld [vmem:[#allocation10 + $0xa8] sm:$0xff]  ;;  %v1638_v37 = vld [vmem:[#allocation10 + $0x30] sm:$0xff] }
 0x187   : > { %v4535_v8 = vpop.f32.mrf.mxu0  ;;  %1916 = vmatpush.msrb.mxu1 %v1673_v43  ;;  %1981 = vmatpush.msrb.mxu2 %v1689_v51  ;;  %v1670_v43 = vld [vmem:[#allocation10 + $0x130] sm:$0xff] }
 0x188   : > { %5900 = vst [vmem:[#allocation70_spill] sm:$0xff] %v4535_v8  ;;  %1853 = vmatpush.msrb.mxu0 %v1655_v60  ;;  %v1671_v8 = vld [vmem:[#allocation10 + $0x138] sm:$0xff]  ;;  %1787 = vmatpush.msra.mxu3 %v1640_v62  ;;  %v1686_v60 = vld [vmem:[#allocation10 + $0x1b0] sm:$0xff]  ;;  %v1652_v62 = vld [vmem:[#allocation10 + $0xa0] sm:$0xff] }
 0x189   : > { %3244 = vset.pattern.permute.xlu1 %v5883_v28  ;;  %1917 = vmatpush.msrb.mxu1 %v1672_v31 }
 0x18a   : > { %3245 = vset.pattern.permute.xlu2 %v5880_v41  ;;  %1565 = vperm.xlu1 %3244, %v4065_v15  }
 0x18b   : > { %3291 = vset.pattern.permute.xlu0 %v5888_v48  ;;  %1405 = vperm.xlu2 %3245, %v4065_v15   ;;  %v4539_v4 = vpop.permute.xlu1 %1261  ;;  %v4544_v45 = vpop.permute.xlu2 %1277  ;;  %v1688_v15 = vld [vmem:[#allocation10 + $0x1c0] sm:$0xff] }
 0x18c   : > { %5901 = vst [vmem:[#allocation71_spill] sm:$0xff] %v4539_v4  ;;  %1373 = vperm.xlu0 %3291, %v4153_v9   ;;  %v4542_v6 = vpop.f32.mrf.mxu1  ;;  %v4548_v5 = vpop.f32.mrf.mxu2  ;;  %v1687_v9 = vld [vmem:[#allocation10 + $0x1b8] sm:$0xff]  ;;  %1982 = vmatpush.msrb.mxu2 %v1688_v15  ;;  %v1685_v15 = vld [vmem:[#allocation10 + $0x1a8] sm:$0xff] }
 0x18d   : > { %5902 = vst [vmem:[#allocation72_spill] sm:$0xff] %v4542_v6  ;;  %1854 = vmatpush.msrb.mxu0 %v1654_v2  ;;  %1788 = vmatpush.msra.mxu3 %v1639_v46  ;;  %v1637_v2 = vld [vmem:[#allocation10 + $0x28] sm:$0xff]  ;;  %v1668_v6 = vld [vmem:[#allocation10 + $0x120] sm:$0xff] }
 0x18e   : > { %5903 = vst [vmem:[#allocation73_spill] sm:$0xff] %v4544_v45  ;;  %1918 = vmatpush.msrb.mxu1 %v1671_v8  ;;  %1983 = vmatpush.msrb.mxu2 %v1687_v9  ;;  %v1669_v8 = vld [vmem:[#allocation10 + $0x128] sm:$0xff]  ;;  %v1651_v9 = vld [vmem:[#allocation10 + $0x98] sm:$0xff] }
 0x18f   : > { %5904 = vst [vmem:[#allocation74_spill] sm:$0xff] %v4548_v5  ;;  %v4551_v45 = vpop.f32.mrf.mxu0  ;;  %1855 = vmatpush.msrb.mxu0 %v1653_v56  ;;  %1789 = vmatpush.msra.mxu3 %v1638_v37  ;;  %v1636_v5 = vld [vmem:[#allocation10 + $0x20] sm:$0xff]  ;;  %v1650_v56 = vld [vmem:[#allocation10 + $0x90] sm:$0xff] }
 0x190   : > { %5905 = vst [vmem:[#allocation75_spill] sm:$0xff] %v4551_v45  ;;  %1919 = vmatpush.msrb.mxu1 %v1670_v43  ;;  %1984 = vmatpush.msrb.mxu2 %v1686_v60  ;;  %v1667_v43 = vld [vmem:[#allocation10 + $0x118] sm:$0xff] }
 0x191   : > { %1856 = vmatpush.msrb.mxu0 %v1652_v62  ;;  %1790 = vmatpush.msra.mxu3 %v1637_v2  ;;  %v1683_v60 = vld [vmem:[#allocation10 + $0x198] sm:$0xff]  ;;  %v3297_v62 = vld [vmem:[%s5857_s9 + $0x20] sm:$0xff] }
 0x192   : > { %3248 = vset.pattern.permute.xlu1 %v5888_v48  ;;  %1920 = vmatpush.msrb.mxu1 %v1669_v8  ;;  %v1634_v8 = vld [vmem:[#allocation10 + $0x10] sm:$0xff] }
 0x193   : > { %3249 = vset.pattern.permute.xlu2 %v5883_v28  ;;  %1329 = vperm.xlu1 %3248, %v4042_v1   ;;  %v4555_v51 = vpop.permute.xlu1 %1265 }
 0x194   : > { %5906 = vst [vmem:[#allocation76_spill] sm:$0xff] %v4555_v51  ;;  %1569 = vperm.xlu2 %3249, %v4042_v1   ;;  %v4558_v46 = vpop.f32.mrf.mxu1  ;;  %v4560_v31 = vpop.f32.mrf.mxu2  ;;  %v1684_v1 = vld [vmem:[#allocation10 + $0x1a0] sm:$0xff]  ;;  %1985 = vmatpush.msrb.mxu2 %v1685_v15  ;;  %v3298_v15 = vld [vmem:[%s5857_s9 + $0x28] sm:$0xff] }
 0x195   : > { %5907 = vst [vmem:[#allocation77_spill] sm:$0xff] %v4558_v46  ;;  %v4562_v45 = vpop.permute.xlu2 %1201  ;;  %v4564_v51 = vpop.permute.xlu0 %1068  ;;  %1857 = vmatpush.msrb.mxu0 %v1651_v9  ;;  %v1635_v46 = vld [vmem:[#allocation10 + $0x18] sm:$0xff]  ;;  %1791 = vmatpush.msra.mxu3 %v1636_v5  ;;  %v1666_v9 = vld [vmem:[#allocation10 + $0x110] sm:$0xff] }
 0x196   : > { %5908 = vst [vmem:[#allocation78_spill] sm:$0xff] %v4560_v31  ;;  %1921 = vmatpush.msrb.mxu1 %v1668_v6  ;;  %1986 = vmatpush.msrb.mxu2 %v1684_v1  ;;  %v1649_v6 = vld [vmem:[#allocation10 + $0x88] sm:$0xff]  ;;  %v1682_v1 = vld [vmem:[#allocation10 + $0x190] sm:$0xff] }
 0x197   : > { %5909 = vst [vmem:[#allocation79_spill] sm:$0xff] %v4562_v45  ;;  %v4566_v37 = vpop.f32.mrf.mxu0  ;;  %1858 = vmatpush.msrb.mxu0 %v1650_v56  ;;  %1792 = vmatpush.msra.mxu3 %v1635_v46  ;;  %v4585_v56 = vld [vmem:[%s5914_s29] ss:$0 sm:$0xff]  ;;  %v1633_v45 = vld [vmem:[#allocation10 + $0x8] sm:$0xff]  ;;  %s2793_s29 = sshll.u32 %s2790_s14, 4  ;;  %s2794_s29 = int_to_ptr.hbm [resolvable:$true] %s2793_s29 }
 0x198   : > { %5910 = vst [vmem:[#allocation80_spill] sm:$0xff] %v4566_v37  ;;  %1922 = vmatpush.msrb.mxu1 %v1667_v43  ;;  %1987 = vmatpush.msrb.mxu2 %v1683_v60  ;;  %v1681_v37 = vld [vmem:[#allocation10 + $0x188] sm:$0xff]  ;;  %v699_v43 = vadd.f32 %v4585_v56, %v4363_v11  ;;  %s3520_s6 = sshra.s32 %s2794_s29, 4  ;;  %s3521_s6 = int_to_ptr.hbm [resolvable:$true] %s3520_s6 }
 0x199   : > { %1859 = vmatpush.msrb.mxu0 %v1649_v6  ;;  %1793 = vmatpush.msra.mxu3 %v1634_v8  ;;  %v1680_v8 = vld [vmem:[#allocation10 + $0x180] sm:$0xff]  ;;  %s3522_s27 = scalar_lea.hbm %s3521_s6, 256  ;;  %p3527_p0 = scmp.lt.s32.totalorder %s3521_s6, %s6059_s28 }
 0x19a   : > { %1923 = vmatpush.msrb.mxu1 %v1666_v9  ;;  %1988 = vmatpush.msrb.mxu2 %v1682_v1  ;;  %p3523_p2 = scmp.ne.s32.totalorder %s3521_s6, %s3522_s27  ;;  %p3528_p4 = scmp.lt.s32.totalorder %s3526_s1, %s3522_s27 }
 0x19b   : > { %3250 = vset.pattern.permute.xlu1 %v5880_v41  ;;  %1794 = vmatpush.msra.mxu3 %v1633_v45  ;;  %v1711_v45 = vld [vmem:[#allocation10 + $0x278] sm:$0xff] }
 0x19c   : > { %3251 = vset.pattern.permute.xlu2 %v5882_v17  ;;  %1409 = vperm.xlu1 %3250, %v3297_v62   ;;  %v4573_v2 = vpop.permute.xlu1 %1189  ;;  %v4575_v5 = vpop.f32.mrf.mxu1  ;;  %v1648_v62 = vld [vmem:[#allocation10 + $0x80] sm:$0xff]  ;;  %p3524_p8 = pnand %p3523_p2, %p3943_p5  ;;  %p3529_p10 = por %p3528_p4, %p3527_p0 }
 0x19d   : > { %5911 = vst [vmem:[#allocation81_spill] sm:$0xff] %v4573_v2  ;;  %1493 = vperm.xlu2 %3251, %v3298_v15   ;;  %v4580_v46 = vpop.f32.mrf.mxu2  ;;  %v4587_v31 = vpop.permute.xlu2 %1205  ;;  %1860 = vmatpush.msrb.mxu0 %v1648_v62  ;;  %v1709_v62 = vld [vmem:[#allocation10 + $0x268] sm:$0xff] }
 0x19e   : > { %5912 = vst [vmem:[#allocation82_spill] sm:$0xff] %v4575_v5  ;;  %v1665_v5 = vld [vmem:[#allocation10 + $0x108] sm:$0xff]  ;;  %v4589_v2 = vpop.permute.xlu0 %1080  ;;  %1989 = vmatpush.msrb.mxu2 %v1681_v37  ;;  %3294 = vset.pattern.permute.xlu0 %v5883_v28  ;;  %v1710_v37 = vld [vmem:[#allocation10 + $0x270] sm:$0xff]  ;;  %p3525_p9 = pneg %p3524_p8 }
 0x19f   : > { %5913 = vst [vmem:[#allocation83_spill] sm:$0xff] %v4580_v46  ;;  %v1632_v46 = vld [vmem:[#allocation10] sm:$0xff]  ;;  %1924 = vmatpush.msrb.mxu1 %v1665_v5  ;;  %v764_v5 = vadd.f32 %v4367_v12, %v699_v43 }
 0x1a0   : > { %5915 = vst [vmem:[#allocation84_spill] sm:$0xff] %v4587_v31  ;;  %v740_v60 = vpop.f32.mrf.mxu0  ;;  %1795 = vmatpush.msra.mxu3 %v1632_v46  ;;  %1990 = vmatpush.msrb.mxu2 %v1680_v8  ;;  %p3530_p13 = pnand %p3529_p10, %p3525_p9 }
 0x1a1   : > { %5916 = vst [vmem:[#allocation85_spill] sm:$0xff] %v4589_v2  ;;  %v741_v6 = vadd.f32 %v4585_v56, %v740_v60  ;;  %1925 = vmatpush.msrb.mxu1 %v1664_v20  ;;  %v702_v60 = vadd.f32 %v4585_v56, %v4376_v19  ;;  %v829_v31 = vadd.f32 %v4369_v13, %v764_v5  ;;  %v3299_v13 = vld [vmem:[%s5857_s9 + $0x30] sm:$0xff]  ;;  %v1708_v5 = vld [vmem:[#allocation10 + $0x260] sm:$0xff] }
 0x1a2   : > { %2040 = vmatpush.msrb.mxu3 %v1711_v45 }
 0x1a4   : > { %3253 = vset.pattern.permute.xlu1 %v5883_v28  ;;  %v4596_v9 = vpop.permute.xlu1 %1193  ;;  %v805_v1 = vpop.f32.mrf.mxu1  ;;  %2041 = vmatpush.msrb.mxu3 %v1710_v37 }
 0x1a5   : > { %5917 = vst [vmem:[#allocation86_spill] sm:$0xff] %v4596_v9  ;;  %3254 = vset.pattern.permute.xlu2 %v5880_v41  ;;  %1573 = vperm.xlu1 %3253, %v3298_v15   ;;  %v870_v11 = vpop.f32.mrf.mxu2  ;;  %v806_v46 = vadd.f32 %v805_v1, %v741_v6  ;;  %v4603_v20 = vpop.permute.xlu2 %1293  ;;  %v767_v6 = vadd.f32 %v4383_v14, %v702_v60  ;;  %v4612_v1 = vmax.f32 %v829_v31, 0.0 }
 0x1a6   : > { %1413 = vperm.xlu2 %3254, %v3298_v15   ;;  %v4605_v2 = vpop.permute.xlu0 %1092  ;;  %2042 = vmatpush.msrb.mxu3 %v1709_v62  ;;  %v924_v15 = vlaneseq  ;;  %v705_v31 = vadd.f32 %v4585_v56, %v4391_v24 }
 0x1a7   : > { %v871_v4 = vadd.f32 %v870_v11, %v806_v46  ;;  %v832_v37 = vadd.f32 %v4385_v21, %v767_v6  ;;  %v908_v62 = vrot.slane %v4612_v1, 7  ;;  %v1119_v60 = vrot.slane %v4612_v1, 1 }
 0x1a8   : > { %v4620_v14 = vshrl.u32 %v924_v15, 7  ;;  %2043 = vmatpush.msrb.mxu3 %v1708_v5  ;;  %v770_v5 = vadd.f32 %v4396_v25, %v705_v31 }
 0x1a9   : > { %v743_v9 = vpop.f32.mrf.mxu0  ;;  %v4618_v45 = vmax.f32 %v871_v4, 0.0  ;;  %v4638_v24 = vmax.f32 %v832_v37, 0.0 }
 0x1aa   : > { %v744_v12 = vadd.f32 %v4585_v56, %v743_v9  ;;  %vm926_vm2 = vcmp.lt.s32.totalorder %v4620_v14, 1  ;;  %vm1135_vm3 = vcmp.lt.s32.totalorder %v4620_v14, 7  ;;  %v835_v25 = vadd.f32 %v4398_v26, %v770_v5 }
 0x1ab   : > { %v1120_v31 = vrot.slane %v4638_v24, 1 }
 0x1ac   : > { %v808_v43 = vpop.f32.mrf.mxu1 }
 0x1ad   : > { %v809_v8 = vadd.f32 %v808_v43, %v744_v12  ;;  %3255 = vset.pattern.permute.xlu1 %v5882_v17  ;;  %v4610_v19 = vpop.permute.xlu1 %1281  ;;  %v5754_v12 = vrot.slane %v4618_v45, 7 }
 0x1ae   : > { %3256 = vset.pattern.permute.xlu2 %v5888_v48  ;;  %1497 = vperm.xlu1 %3255, %v3299_v13   ;;  %v873_v9 = vpop.f32.mrf.mxu2  ;;  %v4636_v21 = vpop.permute.xlu2 %1473 }
 0x1af   : > { %v874_v11 = vadd.f32 %v873_v9, %v809_v8  ;;  %1337 = vperm.xlu2 %3256, %v3299_v13   ;;  %v1154_v6 = vpop.permute.xlu0 %1153 }
 0x1b1   : > { %v4623_v46 = vmax.f32 %v874_v11, 0.0 }
 0x1b3   : > { %v1103_v4 = vmul.f32 %v4359_v10, %v4623_v46  ;;  %v923_v15 = vrot.slane %v4623_v46, 7  ;;  %v5755_v43 = vrot.slane %v4623_v46, 1 }
 0x1b5   : > { %v4640_v8 = vpop.permute.xlu1 %1285  ;;  %1861 = vmatmul.f32.vlgmr.msrb.gmra.mxu0 %v1103_v4  ;;  %v4646_v10 = vsel %vm926_vm2, %v5754_v12, %v923_v15  ;;  %v4652_v9 = vsel %vm1135_vm3, %v5755_v43, %v1119_v60  ;;  %v4656_v11 = vsel %vm926_vm2, %v923_v15, %v908_v62  ;;  %v1707_v43 = vld [vmem:[#allocation10 + $0x258] sm:$0xff] }
 0x1b6   : > { %5918 = vst [vmem:[#allocation87_spill] sm:$0xff] %v4652_v9  ;;  %3258 = vset.pattern.permute.xlu1 %v5880_v41  ;;  %v1023_v37 = vmul.f32 %v4420_v38, %v4646_v10  ;;  %v1216_v4 = vmul.f32 %v1154_v6, %v4652_v9  ;;  %v1296_v12 = vmul.f32 %v4400_v27, %v4656_v11  ;;  %v3300_v15 = vld [vmem:[%s5857_s9 + $0x38] sm:$0xff]  ;;  %v909_v27 = vrot.slane %v4638_v24, 7 }
 0x1b7   : > { %5919 = vst [vmem:[#allocation88_spill] sm:$0xff] %v4656_v11  ;;  %3259 = vset.pattern.permute.xlu2 %v5882_v17  ;;  %1417 = vperm.xlu1 %3258, %v3299_v13   ;;  %v708_v38 = vadd.f32 %v4585_v56, %v4404_v32  ;;  %v1104_v13 = vmul.f32 %v4317_v57, %v4612_v1  ;;  %v4676_v6 = vmax.f32 %v835_v25, 0.0  ;;  %v1242_v25 = vpop.permute.xlu0 %1241 }
 0x1b8   : > { %1501 = vperm.xlu2 %3259, %v3300_v15   ;;  %1796 = vmatmul.f32.vlgmr.msra.gmra.mxu3 %v1023_v37  ;;  %v4683_v26 = vpop.permute.xlu2 %1393  ;;  %v1311_v14 = vmul.f32 %v4603_v20, %v4646_v10  ;;  %v5128_v20 = vld [vmem:[%s6003_s3] ss:$0 sm:$0xff] }
 0x1b9   : > { %1926 = vmatmul.f32.vlgmr.msrb.gmra.mxu1 %v1216_v4  ;;  %1991 = vmatmul.f32.vlgmr.msrb.gmra.mxu2 %v1296_v12  ;;  %v773_v37 = vadd.f32 %v4411_v30, %v708_v38  ;;  %v4681_v12 = vsel %vm1135_vm3, %v1119_v60, %v1120_v31  ;;  %v1024_v30 = vmul.f32 %v4438_v49, %v4656_v11  ;;  %v1706_v4 = vld [vmem:[#allocation10 + $0x250] sm:$0xff]  ;;  %v910_v49 = vrot.slane %v4676_v6, 7 }
 0x1ba   : > { %2044 = vmatpush.msrb.mxu3 %v1707_v43  ;;  %v4689_v43 = vsel %vm926_vm2, %v908_v62, %v909_v27  ;;  %v1217_v57 = vmul.f32 %v4450_v55, %v4681_v12  ;;  %v711_v62 = vadd.f32 %v4585_v56, %v4422_v33  ;;  %v1121_v55 = vrot.slane %v4676_v6, 1 }
 0x1bb   : > { %v1297_v60 = vmul.f32 %v4416_v35, %v4689_v43  ;;  %v838_v5 = vadd.f32 %v4414_v34, %v773_v37  ;;  %v1105_v35 = vmul.f32 %v4546_v58, %v4638_v24  ;;  %v1025_v37 = vmul.f32 %v4285_v50, %v4689_v43 }
 0x1bc   : > { %2045 = vmatpush.msrb.mxu3 %v1706_v4  ;;  %v776_v34 = vadd.f32 %v4426_v39, %v711_v62  ;;  %v4711_v33 = vsel %vm1135_vm3, %v1120_v31, %v1121_v55 }
 0x1bd   : > { %1864 = vmatmul.f32.gmra.mxu0 %v1104_v13  ;;  %v4706_v38 = vmax.f32 %v838_v5, 0.0  ;;  %v1218_v58 = vmul.f32 %v4467_v3, %v4711_v33  ;;  %v1705_v3 = vld [vmem:[#allocation10 + $0x248] sm:$0xff] }
 0x1be   : > { %v4685_v32 = vpop.permute.xlu1 %1209  ;;  %v841_v39 = vadd.f32 %v4430_v40, %v776_v34  ;;  %v1106_v40 = vmul.f32 %v4373_v18, %v4676_v6  ;;  %2046 = vmatpush.msrb.mxu3 %v1705_v3 }
 0x1bf   : > { %3260 = vset.pattern.permute.xlu1 %v5888_v48  ;;  %v1122_v31 = vrot.slane %v4706_v38, 1  ;;  %v911_v50 = vrot.slane %v4706_v38, 7 }
 0x1c0   : > { %3261 = vset.pattern.permute.xlu2 %v5883_v28  ;;  %1341 = vperm.xlu1 %3260, %v3300_v15   ;;  %v4738_v5 = vmax.f32 %v841_v39, 0.0 }
 0x1c1   : > { %1799 = vmatmul.f32.gmra.mxu3 %v1024_v30  ;;  %1929 = vmatmul.f32.gmra.mxu1 %v1217_v57  ;;  %v4724_v30 = vpop.permute.xlu2 %1317 }
 0x1c2   : > { %1994 = vmatmul.f32.gmra.mxu2 %v1297_v60  ;;  %1581 = vperm.xlu2 %3261, %v3300_v15   ;;  %v4717_v15 = vsel %vm926_vm2, %v909_v27, %v910_v49  ;;  %v714_v27 = vadd.f32 %v4585_v56, %v4436_v47  ;;  %v3301_v60 = vld [vmem:[%s5857_s9 + $0x40] sm:$0xff]  ;;  %v4742_v47 = vsel %vm1135_vm3, %v1121_v55, %v1122_v31 }
 0x1c3   : > { %v1298_v57 = vmul.f32 %v1242_v25, %v4717_v15  ;;  %v1219_v4 = vmul.f32 %v4434_v42, %v4742_v47  ;;  %v1026_v18 = vmul.f32 %v4297_v53, %v4717_v15  ;;  %v717_v55 = vadd.f32 %v4585_v56, %v4454_v0 }
 0x1c4   : > { %v779_v62 = vadd.f32 %v4441_v52, %v714_v27  ;;  %v1123_v42 = vrot.slane %v4738_v5, 1  ;;  %v1107_v53 = vmul.f32 %v4331_v63, %v4706_v38 }
 0x1c5   : > { %1867 = vmatmul.f32.gmra.mxu0 %v1105_v35  ;;  %v4749_v35 = vsel %vm926_vm2, %v910_v49, %v911_v50  ;;  %v1704_v49 = vld [vmem:[#allocation10 + $0x240] sm:$0xff]  ;;  %v782_v0 = vadd.f32 %v4456_v7, %v717_v55  ;;  %v720_v7 = vadd.f32 %v4585_v56, %v4472_v22 }
 0x1c6   : > { %v4713_v13 = vpop.permute.xlu1 %1213  ;;  %v1299_v34 = vmul.f32 %v4485_v44, %v4749_v35  ;;  %v844_v52 = vadd.f32 %v4446_v29, %v779_v62  ;;  %2047 = vmatpush.msrb.mxu3 %v1704_v49  ;;  %v4773_v44 = vsel %vm1135_vm3, %v1122_v31, %v1123_v42  ;;  %v1027_v63 = vmul.f32 %v4241_v36, %v4749_v35  ;;  %v3302_v62 = vld [vmem:[%s5857_s9 + $0x48] sm:$0xff]  ;;  %v5928_v49 = vld [vmem:[#allocation53_spill] sm:$0xff] }
 0x1c7   : > { %v847_v31 = vadd.f32 %v4461_v61, %v782_v0  ;;  %v785_v36 = vadd.f32 %v4474_v54, %v720_v7  ;;  %v1108_v61 = vmul.f32 %v4389_v23, %v4738_v5 }
 0x1c8   : > { %3262 = vset.pattern.permute.xlu1 %v5882_v17  ;;  %v4769_v29 = vmax.f32 %v844_v52, 0.0 }
 0x1c9   : > { %1802 = vmatmul.f32.gmra.mxu3 %v1025_v37  ;;  %1932 = vmatmul.f32.gmra.mxu1 %v1218_v58  ;;  %v912_v37 = vrot.slane %v4738_v5, 7 }
 0x1ca   : > { %1997 = vmatmul.f32.gmra.mxu2 %v1298_v57  ;;  %3263 = vset.pattern.permute.xlu2 %v5888_v48  ;;  %v4761_v58 = vpop.permute.xlu2 %1481  ;;  %5921 = vst [vmem:[#allocation90_spill] sm:$0xff] %v4769_v29  ;;  %v1220_v57 = vmul.f32 %v4452_v59, %v4773_v44  ;;  %v1254_v59 = vpop.permute.xlu0 %1253 }
 0x1cb   : > { %1505 = vperm.xlu1 %3262, %v3301_v60   ;;  %1345 = vperm.xlu2 %3263, %v3301_v60   ;;  %v4779_v39 = vsel %vm926_vm2, %v911_v50, %v912_v37  ;;  %v1703_v50 = vld [vmem:[#allocation10 + $0x238] sm:$0xff] }
 0x1cc   : > { %v1300_v27 = vmul.f32 %v4499_v16, %v4779_v39  ;;  %2048 = vmatpush.msrb.mxu3 %v1703_v50  ;;  %v4799_v16 = vmax.f32 %v847_v31, 0.0  ;;  %v5932_v50 = vld [vmem:[#allocation57_spill] sm:$0xff] }
 0x1cd   : > { %1870 = vmatmul.f32.gmra.mxu0 %v1106_v40  ;;  %v913_v40 = vrot.slane %v4769_v29, 7 }
 0x1ce   : > { %5923 = vst [vmem:[#allocation92_spill] sm:$0xff] %v4799_v16  ;;  %v914_v0 = vrot.slane %v4799_v16, 7  ;;  %v1125_v7 = vrot.slane %v4799_v16, 1 }
 0x1cf   : > { %v4751_v25 = vpop.permute.xlu1 %1553 }
 0x1d0   : > { %5920 = vst [vmem:[#allocation89_spill] sm:$0xff] %v4751_v25  ;;  %v5947_v25 = vld [vmem:[#allocation65_spill] sm:$0xff] }
 0x1d1   : > { %1805 = vmatmul.f32.gmra.mxu3 %v1026_v18  ;;  %1935 = vmatmul.f32.gmra.mxu1 %v1219_v4  ;;  %v4810_v4 = vsel %vm926_vm2, %v912_v37, %v913_v40  ;;  %v5926_v18 = vld [vmem:[#allocation64_spill] sm:$0xff]  ;;  %v1702_v37 = vld [vmem:[#allocation10 + $0x230] sm:$0xff] }
 0x1d2   : > { %2000 = vmatmul.f32.gmra.mxu2 %v1299_v34  ;;  %5925 = vst [vmem:[#allocation94_spill] sm:$0xff] %v4810_v4  ;;  %v5927_v34 = vld [vmem:[#allocation37_spill] sm:$0xff]  ;;  %v1301_v52 = vmul.f32 %v1254_v59, %v4810_v4  ;;  %2049 = vmatpush.msrb.mxu3 %v1702_v37  ;;  %v1178_v31 = vpop.permute.xlu0 %1177  ;;  %v4828_v59 = vsel %vm926_vm2, %v913_v40, %v914_v0  ;;  %v3303_v40 = vld [vmem:[%s5857_s9 + $0x50] sm:$0xff] }
 0x1d3   : > { %3264 = vset.pattern.permute.xlu1 %v5883_v28  ;;  %3265 = vset.pattern.permute.xlu2 %v5880_v41  ;;  %v4793_v22 = vpop.permute.xlu2 %1561  ;;  %v1028_v55 = vmul.f32 %v5927_v34, %v4779_v39  ;;  %5931 = vst [vmem:[#allocation37_spill] sm:$0xff] %v4828_v59 }
 0x1d4   : > { %1585 = vperm.xlu1 %3264, %v3301_v60   ;;  %1425 = vperm.xlu2 %3265, %v3301_v60   ;;  %v1124_v60 = vrot.slane %v4769_v29, 1  ;;  %5922 = vst [vmem:[#allocation91_spill] sm:$0xff] %v4793_v22 }
 0x1d5   : > { %1873 = vmatmul.f32.gmra.mxu0 %v1107_v53  ;;  %v850_v53 = vadd.f32 %v5928_v49, %v785_v36 }
 0x1d6   : > { %v4806_v54 = vsel %vm1135_vm3, %v1123_v42, %v1124_v60 }
 0x1d7   : > { %5924 = vst [vmem:[#allocation93_spill] sm:$0xff] %v4806_v54  ;;  %v1221_v23 = vmul.f32 %v5926_v18, %v4806_v54 }
 0x1d8   : > { %v4787_v3 = vpop.permute.xlu1 %1477 }
 0x1d9   : > { %1808 = vmatmul.f32.gmra.mxu3 %v1027_v63  ;;  %1938 = vmatmul.f32.gmra.mxu1 %v1220_v57  ;;  %v5929_v57 = vld [vmem:[#allocation55_spill] sm:$0xff] }
 0x1da   : > { %2003 = vmatmul.f32.gmra.mxu2 %v1300_v27  ;;  %v723_v42 = vadd.f32 %v4585_v56, %v5929_v57  ;;  %v4824_v27 = vmax.f32 %v850_v53, 0.0  ;;  %v5936_v53 = vld [vmem:[#allocation52_spill] sm:$0xff]  ;;  %v4886_v9 = vpop.permute.xlu0 %1197 }
 0x1db   : > { %v1302_v57 = vmul.f32 %v5936_v53, %v4828_v59  ;;  %v5942_v53 = vld [vmem:[#allocation56_spill] sm:$0xff] }
 0x1dc   : > { %3267 = vset.pattern.permute.xlu1 %v5888_v48  ;;  %3268 = vset.pattern.permute.xlu2 %v5883_v28  ;;  %5930 = vst [vmem:[#allocation64_spill] sm:$0xff] %v4824_v27  ;;  %v788_v36 = vadd.f32 %v5932_v50, %v723_v42  ;;  %v4839_v34 = vpop.permute.xlu2 %1325  ;;  %v5937_v42 = vld [vmem:[#allocation58_spill] sm:$0xff]  ;;  %v5938_v50 = vld [vmem:[#allocation60_spill] sm:$0xff] }
 0x1dd   : > { %1349 = vperm.xlu1 %3267, %v3302_v62   ;;  %1589 = vperm.xlu2 %3268, %v3302_v62  }
 0x1de   : > { %1876 = vmatmul.f32.gmra.mxu0 %v1108_v61  ;;  %v5933_v61 = vld [vmem:[#allocation44_spill] sm:$0xff]  ;;  %v853_v37 = vadd.f32 %v5937_v42, %v788_v36  ;;  %v1110_v36 = vmul.f32 %v4564_v51, %v4799_v16  ;;  %v5945_v51 = vld [vmem:[#allocation71_spill] sm:$0xff] }
 0x1df   : > { %v1109_v18 = vmul.f32 %v5933_v61, %v4769_v29  ;;  %v726_v61 = vadd.f32 %v4585_v56, %v5938_v50  ;;  %v5956_v16 = vld [vmem:[#allocation76_spill] sm:$0xff]  ;;  %v5961_v29 = vld [vmem:[#allocation45_spill] sm:$0xff] }
 0x1e1   : > { %1811 = vmatmul.f32.gmra.mxu3 %v1028_v55  ;;  %1941 = vmatmul.f32.gmra.mxu1 %v1221_v23  ;;  %v4821_v63 = vpop.permute.xlu1 %1397  ;;  %v4837_v23 = vsel %vm1135_vm3, %v1124_v60, %v1125_v7  ;;  %v1126_v60 = vrot.slane %v4824_v27, 1 }
 0x1e2   : > { %2006 = vmatmul.f32.gmra.mxu2 %v1301_v52  ;;  %5934 = vst [vmem:[#allocation53_spill] sm:$0xff] %v4837_v23  ;;  %v1222_v55 = vmul.f32 %v1178_v31, %v4837_v23  ;;  %v5935_v52 = vld [vmem:[#allocation51_spill] sm:$0xff]  ;;  %v915_v31 = vrot.slane %v4824_v27, 7  ;;  %v1743_v23 = vld [vmem:[#allocation10 + $0x378] sm:$0xff] }
 0x1e3   : > { %v1029_v49 = vmul.f32 %v5935_v52, %v4810_v4  ;;  %v4860_v52 = vmax.f32 %v853_v37, 0.0  ;;  %2170 = vmatpush.msra.mxu1 %v1743_v23  ;;  %v1742_v23 = vld [vmem:[#allocation10 + $0x370] sm:$0xff] }
 0x1e4   : > { %v4871_v42 = vsel %vm926_vm2, %v914_v0, %v915_v31 }
 0x1e5   : > { %3269 = vset.pattern.permute.xlu1 %v5880_v41  ;;  %3270 = vset.pattern.permute.xlu2 %v5882_v17  ;;  %5940 = vst [vmem:[#allocation57_spill] sm:$0xff] %v4860_v52  ;;  %v1303_v50 = vmul.f32 %v5945_v51, %v4871_v42  ;;  %v1112_v4 = vmul.f32 %v5961_v29, %v4860_v52  ;;  %v5966_v29 = vld [vmem:[#allocation54_spill] sm:$0xff] }
 0x1e6   : > { %1429 = vperm.xlu1 %3269, %v3302_v62   ;;  %1513 = vperm.xlu2 %3270, %v3303_v40   ;;  %v1701_v62 = vld [vmem:[#allocation10 + $0x228] sm:$0xff]  ;;  %5943 = vst [vmem:[#allocation44_spill] sm:$0xff] %v4871_v42 }
 0x1e7   : > { %1879 = vmatmul.f32.gmra.mxu0 %v1109_v18  ;;  %2050 = vmatpush.msrb.mxu3 %v1701_v62  ;;  %v4858_v18 = vsel %vm1135_vm3, %v1125_v7, %v1126_v60  ;;  %v5944_v7 = vld [vmem:[#allocation41_spill] sm:$0xff] }
 0x1e8   : > { %5939 = vst [vmem:[#allocation55_spill] sm:$0xff] %v4858_v18  ;;  %v1030_v37 = vmul.f32 %v5944_v7, %v4828_v59  ;;  %v1700_v62 = vld [vmem:[#allocation10 + $0x220] sm:$0xff]  ;;  %v916_v7 = vrot.slane %v4860_v52, 7  ;;  %v1699_v59 = vld [vmem:[#allocation10 + $0x218] sm:$0xff]  ;;  %2171 = vmatpush.msra.mxu1 %v1742_v23 }
 0x1e9   : > { %1814 = vmatmul.f32.gmra.mxu3 %v1029_v49  ;;  %1944 = vmatmul.f32.gmra.mxu1 %v1222_v55  ;;  %v5941_v55 = vld [vmem:[#allocation62_spill] sm:$0xff] }
 0x1ea   : > { %2009 = vmatmul.f32.gmra.mxu2 %v1302_v57  ;;  %v4853_v22 = vpop.permute.xlu1 %1321  ;;  %v791_v49 = vadd.f32 %v5941_v55, %v726_v61  ;;  %v1223_v57 = vmul.f32 %v5942_v53, %v4858_v18  ;;  %v4877_v61 = vpop.permute.xlu2 %1405  ;;  %2051 = vmatpush.msrb.mxu3 %v1700_v62  ;;  %v1127_v55 = vrot.slane %v4860_v52, 1  ;;  %v5946_v53 = vld [vmem:[#allocation63_spill] sm:$0xff]  ;;  %v5950_v62 = vld [vmem:[#allocation48_spill] sm:$0xff] }
 0x1ec   : > { %v856_v0 = vadd.f32 %v5946_v53, %v791_v49  ;;  %v5952_v49 = vld [vmem:[#allocation68_spill] sm:$0xff]  ;;  %2052 = vmatpush.msrb.mxu3 %v1699_v59 }
 0x1ee   : > { %3272 = vset.pattern.permute.xlu1 %v5883_v28  ;;  %3273 = vset.pattern.permute.xlu2 %v5880_v41 }
 0x1ef   : > { %1593 = vperm.xlu1 %3272, %v3303_v40   ;;  %1882 = vmatmul.f32.gmra.mxu0 %v1110_v36  ;;  %v729_v36 = vadd.f32 %v4585_v56, %v5947_v25  ;;  %v4899_v25 = vsel %vm926_vm2, %v915_v31, %v916_v7  ;;  %v1727_v31 = vld [vmem:[#allocation10 + $0x2f8] sm:$0xff] }
 0x1f0   : > { %1433 = vperm.xlu2 %3273, %v3303_v40   ;;  %v4890_v40 = vsel %vm1135_vm3, %v1126_v60, %v1127_v55  ;;  %5953 = vst [vmem:[#allocation60_spill] sm:$0xff] %v4899_v25  ;;  %v5955_v60 = vld [vmem:[#allocation61_spill] sm:$0xff]  ;;  %2105 = vmatpush.msra.mxu0 %v1727_v31  ;;  %v1032_v59 = vmul.f32 %v5966_v29, %v4899_v25 }
 0x1f1   : > { %1817 = vmatmul.f32.gmra.mxu3 %v1030_v37  ;;  %1947 = vmatmul.f32.gmra.mxu1 %v1223_v57  ;;  %5949 = vst [vmem:[#allocation52_spill] sm:$0xff] %v4890_v40  ;;  %v1111_v37 = vmul.f32 %v5950_v62, %v4824_v27  ;;  %v4894_v57 = vmax.f32 %v856_v0, 0.0  ;;  %v794_v51 = vadd.f32 %v5952_v49, %v729_v36  ;;  %v3304_v0 = vld [vmem:[%s5857_s9 + $0x58] sm:$0xff]  ;;  %v3305_v29 = vld [vmem:[%s5857_s9 + $0x60] sm:$0xff] }
 0x1f2   : > { %2012 = vmatmul.f32.gmra.mxu2 %v1303_v50  ;;  %v5954_v50 = vld [vmem:[#allocation38_spill] sm:$0xff]  ;;  %v1224_v18 = vmul.f32 %v5955_v60, %v4890_v40  ;;  %v1304_v62 = vmul.f32 %v5956_v16, %v4899_v25  ;;  %v5959_v16 = vld [vmem:[#allocation69_spill] sm:$0xff]  ;;  %v1726_v40 = vld [vmem:[#allocation10 + $0x2f0] sm:$0xff] }
 0x1f3   : > { %v4884_v11 = vpop.permute.xlu1 %1485  ;;  %5951 = vst [vmem:[#allocation58_spill] sm:$0xff] %v4894_v57  ;;  %v1031_v53 = vmul.f32 %v5954_v50, %v4871_v42  ;;  %v917_v36 = vrot.slane %v4894_v57, 7  ;;  %v4915_v50 = vpop.permute.xlu2 %1569  ;;  %v859_v60 = vadd.f32 %v5959_v16, %v794_v51  ;;  %v1128_v27 = vrot.slane %v4894_v57, 1  ;;  %2106 = vmatpush.msra.mxu0 %v1726_v40  ;;  %v5963_v51 = vld [vmem:[#allocation72_spill] sm:$0xff]  ;;  %v5967_v40 = vld [vmem:[#allocation81_spill] sm:$0xff] }
 0x1f4   : > { %5948 = vst [vmem:[#allocation51_spill] sm:$0xff] %v4884_v11  ;;  %v1740_v25 = vld [vmem:[#allocation10 + $0x360] sm:$0xff] }
 0x1f5   : > { %5958 = vst [vmem:[#allocation62_spill] sm:$0xff] %v4915_v50  ;;  %v1270_v50 = vpop.permute.xlu0 %1269  ;;  %v4928_v31 = vmax.f32 %v859_v60, 0.0  ;;  %v4932_v16 = vsel %vm1135_vm3, %v1127_v55, %v1128_v27  ;;  %v5968_v60 = vld [vmem:[#allocation74_spill] sm:$0xff]  ;;  %v5969_v55 = vld [vmem:[#allocation75_spill] sm:$0xff]  ;;  %v1756_v11 = vld [vmem:[#allocation10 + $0x3e0] sm:$0xff] }
 0x1f6   : > { %5965 = vst [vmem:[#allocation63_spill] sm:$0xff] %v4932_v16 }
 0x1f7   : > { %3274 = vset.pattern.permute.xlu1 %v5882_v17  ;;  %1885 = vmatmul.f32.gmra.mxu0 %v1111_v37  ;;  %v5957_v37 = vld [vmem:[#allocation70_spill] sm:$0xff]  ;;  %5964 = vst [vmem:[#allocation71_spill] sm:$0xff] %v4928_v31 }
 0x1f8   : > { %3275 = vset.pattern.permute.xlu2 %v5888_v48  ;;  %1517 = vperm.xlu1 %3274, %v3304_v0   ;;  %v732_v49 = vadd.f32 %v4585_v56, %v5957_v37  ;;  %v1725_v37 = vld [vmem:[#allocation10 + $0x2e8] sm:$0xff] }
 0x1f9   : > { %1357 = vperm.xlu2 %3275, %v3304_v0   ;;  %1820 = vmatmul.f32.gmra.mxu3 %v1031_v53  ;;  %v1759_v53 = vld [vmem:[#allocation10 + $0x3f8] sm:$0xff] }
 0x1fa   : > { %1950 = vmatmul.f32.gmra.mxu1 %v1224_v18  ;;  %2015 = vmatmul.f32.gmra.mxu2 %v1304_v62  ;;  %v4925_v18 = vsel %vm926_vm2, %v916_v7, %v917_v36  ;;  %v797_v62 = vadd.f32 %v5963_v51, %v732_v49  ;;  %v1225_v49 = vmul.f32 %v5967_v40, %v4932_v16  ;;  %v918_v40 = vrot.slane %v4928_v31, 7 }
 0x1fb   : > { %5962 = vst [vmem:[#allocation41_spill] sm:$0xff] %v4925_v18  ;;  %2235 = vmatpush.msra.mxu2 %v1759_v53  ;;  %2107 = vmatpush.msra.mxu0 %v1725_v37  ;;  %v1305_v7 = vmul.f32 %v1270_v50, %v4925_v18  ;;  %v735_v51 = vadd.f32 %v4585_v56, %v5969_v55  ;;  %v1724_v50 = vld [vmem:[#allocation10 + $0x2e0] sm:$0xff]  ;;  %v1698_v37 = vld [vmem:[#allocation10 + $0x210] sm:$0xff]  ;;  %v1129_v16 = vrot.slane %v4928_v31, 1 }
 0x1fc   : > { %v4919_v42 = vpop.permute.xlu1 %1565  ;;  %v862_v53 = vadd.f32 %v5968_v60, %v797_v62  ;;  %v4949_v62 = vpop.permute.xlu2 %1493  ;;  %v5971_v55 = vld [vmem:[#allocation85_spill] sm:$0xff]  ;;  %2053 = vmatpush.msrb.mxu3 %v1698_v37  ;;  %v4960_v23 = vsel %vm926_vm2, %v917_v36, %v918_v40  ;;  %v5977_v36 = vld [vmem:[#allocation67_spill] sm:$0xff] }
 0x1fd   : > { %5960 = vst [vmem:[#allocation56_spill] sm:$0xff] %v4919_v42  ;;  %v1757_v42 = vld [vmem:[#allocation10 + $0x3e8] sm:$0xff]  ;;  %v1113_v52 = vmul.f32 %v5971_v55, %v4894_v57  ;;  %2108 = vmatpush.msra.mxu0 %v1724_v50  ;;  %v4966_v50 = vpop.permute.xlu0 %1289 }
 0x1fe   : > { %5970 = vst [vmem:[#allocation65_spill] sm:$0xff] %v4949_v62  ;;  %v4955_v54 = vmax.f32 %v862_v53, 0.0  ;;  %v5975_v53 = vld [vmem:[#allocation86_spill] sm:$0xff] }
 0x1ff   : > { %1888 = vmatmul.f32.gmra.mxu0 %v1112_v4  ;;  %v1758_v4 = vld [vmem:[#allocation10 + $0x3f0] sm:$0xff]  ;;  %5973 = vst [vmem:[#allocation48_spill] sm:$0xff] %v4960_v23 }
 0x200   : > { %3277 = vset.pattern.permute.xlu1 %v5880_v41  ;;  %2236 = vmatpush.msra.mxu2 %v1758_v4  ;;  %v4964_v4 = vsel %vm1135_vm3, %v1128_v27, %v1129_v16  ;;  %v1130_v27 = vrot.slane %v4955_v54, 1 }
 0x201   : > { %3278 = vset.pattern.permute.xlu2 %v5882_v17  ;;  %1437 = vperm.xlu1 %3277, %v3304_v0   ;;  %v1741_v0 = vld [vmem:[#allocation10 + $0x368] sm:$0xff]  ;;  %5974 = vst [vmem:[#allocation68_spill] sm:$0xff] %v4964_v4  ;;  %v1226_v37 = vmul.f32 %v5975_v53, %v4964_v4  ;;  %v1739_v53 = vld [vmem:[#allocation10 + $0x358] sm:$0xff]  ;;  %v5786_v4 = vrot.slane %v4955_v54, 7 }
 0x202   : > { %1521 = vperm.xlu2 %3278, %v3305_v29   ;;  %1823 = vmatmul.f32.gmra.mxu3 %v1032_v59  ;;  %v1723_v59 = vld [vmem:[#allocation10 + $0x2d8] sm:$0xff] }
 0x203   : > { %1953 = vmatmul.f32.gmra.mxu1 %v1225_v49  ;;  %2018 = vmatmul.f32.gmra.mxu2 %v1305_v7  ;;  %v5972_v7 = vld [vmem:[#allocation77_spill] sm:$0xff] }
 0x204   : > { %v800_v49 = vadd.f32 %v5972_v7, %v735_v51  ;;  %2172 = vmatpush.msra.mxu1 %v1741_v0  ;;  %2237 = vmatpush.msra.mxu2 %v1757_v42  ;;  %v5976_v42 = vld [vmem:[#allocation42_spill] sm:$0xff]  ;;  %v1722_v7 = vld [vmem:[#allocation10 + $0x2d0] sm:$0xff] }
 0x205   : > { %v4951_v60 = vpop.permute.xlu1 %1329  ;;  %2109 = vmatpush.msra.mxu0 %v1723_v59  ;;  %v1033_v51 = vmul.f32 %v5976_v42, %v4925_v18  ;;  %v5978_v0 = vld [vmem:[#allocation78_spill] sm:$0xff]  ;;  %v5979_v59 = vld [vmem:[#allocation80_spill] sm:$0xff]  ;;  %v1738_v42 = vld [vmem:[#allocation10 + $0x350] sm:$0xff] }
 0x206   : > { %2173 = vmatpush.msra.mxu1 %v1740_v25  ;;  %2238 = vmatpush.msra.mxu2 %v1756_v11  ;;  %v865_v55 = vadd.f32 %v5978_v0, %v800_v49  ;;  %v738_v25 = vadd.f32 %v4585_v56, %v5979_v59  ;;  %v1755_v11 = vld [vmem:[#allocation10 + $0x3d8] sm:$0xff]  ;;  %v5980_v49 = vld [vmem:[#allocation49_spill] sm:$0xff]  ;;  %v1721_v56 = vld [vmem:[#allocation10 + $0x2c8] sm:$0xff] }
 0x207   : > { %1891 = vmatmul.f32.gmra.mxu0 %v1113_v52  ;;  %v1306_v52 = vmul.f32 %v5977_v36, %v4960_v23  ;;  %v1697_v36 = vld [vmem:[#allocation10 + $0x208] sm:$0xff]  ;;  %v1114_v0 = vmul.f32 %v5980_v49, %v4928_v31  ;;  %v1754_v59 = vld [vmem:[#allocation10 + $0x3d0] sm:$0xff] }
 0x208   : > { %2110 = vmatpush.msra.mxu0 %v1722_v7  ;;  %2174 = vmatpush.msra.mxu1 %v1739_v53  ;;  %v4983_v57 = vmax.f32 %v865_v55, 0.0  ;;  %v5982_v18 = vld [vmem:[#allocation82_spill] sm:$0xff]  ;;  %v4998_v7 = vsel %vm926_vm2, %v918_v40, %v5786_v4  ;;  %v5985_v53 = vld [vmem:[#allocation73_spill] sm:$0xff]  ;;  %v5986_v49 = vld [vmem:[#allocation83_spill] sm:$0xff] }
 0x209   : > { %3279 = vset.pattern.permute.xlu1 %v5888_v48  ;;  %v803_v62 = vadd.f32 %v5982_v18, %v738_v25  ;;  %2239 = vmatpush.msra.mxu2 %v1755_v11  ;;  %v1720_v18 = vld [vmem:[#allocation10 + $0x2c0] sm:$0xff]  ;;  %v1307_v11 = vmul.f32 %v5985_v53, %v4998_v7  ;;  %v1717_v31 = vld [vmem:[#allocation10 + $0x2a8] sm:$0xff] }
 0x20a   : > { %3280 = vset.pattern.permute.xlu2 %v5883_v28  ;;  %1361 = vperm.xlu1 %3279, %v3305_v29   ;;  %5981 = vst [vmem:[#allocation38_spill] sm:$0xff] %v4983_v57 }
 0x20b   : > { %1826 = vmatmul.f32.gmra.mxu3 %v1033_v51  ;;  %1956 = vmatmul.f32.gmra.mxu1 %v1226_v37  ;;  %v4988_v51 = vsel %vm1135_vm3, %v1129_v16, %v1130_v27  ;;  %v4990_v37 = vpop.permute.xlu2 %1413  ;;  %v5984_v16 = vld [vmem:[#allocation39_spill] sm:$0xff]  ;;  %v868_v40 = vadd.f32 %v5986_v49, %v803_v62  ;;  %v5987_v62 = vld [vmem:[#allocation46_spill] sm:$0xff]  ;;  %v1696_v49 = vld [vmem:[#allocation10 + $0x200] sm:$0xff] }
 0x20c   : > { %2021 = vmatmul.f32.gmra.mxu2 %v1306_v52  ;;  %1601 = vperm.xlu2 %3280, %v3305_v29   ;;  %5983 = vst [vmem:[#allocation61_spill] sm:$0xff] %v4988_v51  ;;  %v1737_v52 = vld [vmem:[#allocation10 + $0x348] sm:$0xff]  ;;  %v1034_v55 = vmul.f32 %v5984_v16, %v4960_v23  ;;  %v1227_v25 = vmul.f32 %v4886_v9, %v4988_v51  ;;  %v1736_v9 = vld [vmem:[#allocation10 + $0x340] sm:$0xff]  ;;  %v1751_v51 = vld [vmem:[#allocation10 + $0x3b8] sm:$0xff] }
 0x20d   : > { %2054 = vmatpush.msrb.mxu3 %v1697_v36  ;;  %2175 = vmatpush.msra.mxu1 %v1738_v42  ;;  %v1131_v36 = vrot.slane %v4983_v57, 1  ;;  %v5009_v42 = vpop.permute.xlu0 %1489  ;;  %v1752_v16 = vld [vmem:[#allocation10 + $0x3c0] sm:$0xff]  ;;  %v5022_v53 = vmax.f32 %v868_v40, 0.0  ;;  %v5992_v40 = vrot.slane %v4955_v54, 7 }
 0x20e   : > { %v4992_v29 = vpop.permute.xlu1 %1409  ;;  %2111 = vmatpush.msra.mxu0 %v1721_v56  ;;  %2240 = vmatpush.msra.mxu2 %v1754_v59  ;;  %v1719_v56 = vld [vmem:[#allocation10 + $0x2b8] sm:$0xff]  ;;  %v920_v59 = vrot.slane %v4983_v57, 7 }
 0x20f   : > { %1894 = vmatmul.f32.gmra.mxu0 %v1114_v0  ;;  %2176 = vmatpush.msra.mxu1 %v1737_v52  ;;  %v1753_v0 = vld [vmem:[#allocation10 + $0x3c8] sm:$0xff]  ;;  %5989 = vst [vmem:[#allocation70_spill] sm:$0xff] %v5022_v53 }
 0x210   : > { %2112 = vmatpush.msra.mxu0 %v1720_v18  ;;  %v3306_v52 = vld [vmem:[%s5857_s9 + $0x68] sm:$0xff]  ;;  %v1115_v18 = vmul.f32 %v5987_v62, %v4955_v54  ;;  %2241 = vmatpush.msra.mxu2 %v1753_v0  ;;  %v5991_v62 = vld [vmem:[#allocation79_spill] sm:$0xff]  ;;  %v5034_v0 = vsel %vm926_vm2, %v5992_v40, %v920_v59  ;;  %v921_v40 = vrot.slane %v5022_v53, 7 }
 0x211   : > { %2177 = vmatpush.msra.mxu1 %v1736_v9  ;;  %v1734_v9 = vld [vmem:[#allocation10 + $0x330] sm:$0xff]  ;;  %2055 = vmatpush.msrb.mxu3 %v1696_v49  ;;  %v1716_v49 = vld [vmem:[#allocation10 + $0x2a0] sm:$0xff] }
 0x212   : > { %3282 = vset.pattern.permute.xlu1 %v5882_v17  ;;  %2113 = vmatpush.msra.mxu0 %v1719_v56  ;;  %v5993_v56 = vld [vmem:[#allocation59_spill] sm:$0xff] }
 0x213   : > { %1829 = vmatmul.f32.gmra.mxu3 %v1034_v55  ;;  %1959 = vmatmul.f32.gmra.mxu1 %v1227_v25  ;;  %v1718_v55 = vld [vmem:[#allocation10 + $0x2b0] sm:$0xff]  ;;  %v5020_v25 = vsel %vm1135_vm3, %v1130_v27, %v1131_v36  ;;  %v5026_v23 = vpop.permute.xlu2 %1337 }
 0x214   : > { %2024 = vmatmul.f32.gmra.mxu2 %v1307_v11  ;;  %3283 = vset.pattern.permute.xlu2 %v5888_v48  ;;  %5988 = vst [vmem:[#allocation76_spill] sm:$0xff] %v5020_v25  ;;  %v1735_v11 = vld [vmem:[#allocation10 + $0x338] sm:$0xff]  ;;  %v1228_v27 = vmul.f32 %v5991_v62, %v5020_v25  ;;  %v1714_v25 = vld [vmem:[#allocation10 + $0x290] sm:$0xff] }
 0x215   : > { %1525 = vperm.xlu1 %3282, %v3306_v52   ;;  %1365 = vperm.xlu2 %3283, %v3306_v52   ;;  %v5041_v62 = vpop.permute.xlu0 %1313 }
 0x216   : > { %2242 = vmatpush.msra.mxu2 %v1752_v16  ;;  %2114 = vmatpush.msra.mxu0 %v1718_v55  ;;  %v1308_v16 = vmul.f32 %v4610_v19, %v5034_v0  ;;  %v1750_v55 = vld [vmem:[#allocation10 + $0x3b0] sm:$0xff]  ;;  %v1733_v19 = vld [vmem:[#allocation10 + $0x328] sm:$0xff] }
 0x217   : > { %1897 = vmatmul.f32.gmra.mxu0 %v1115_v18  ;;  %v5024_v4 = vpop.permute.xlu1 %1573  ;;  %v1035_v18 = vmul.f32 %v5993_v56, %v4998_v7  ;;  %2178 = vmatpush.msra.mxu1 %v1735_v11  ;;  %v1116_v11 = vmul.f32 %v4605_v2, %v4983_v57  ;;  %v1715_v56 = vld [vmem:[#allocation10 + $0x298] sm:$0xff]  ;;  %v5058_v57 = vsel %vm926_vm2, %v920_v59, %v921_v40  ;;  %v1133_v59 = vrot.slane %v4618_v45, 1 }
 0x218   : > { %5990 = vst [vmem:[#allocation69_spill] sm:$0xff] %v5024_v4  ;;  %v1132_v4 = vrot.slane %v5022_v53, 1  ;;  %2243 = vmatpush.msra.mxu2 %v1751_v51  ;;  %2115 = vmatpush.msra.mxu0 %v1717_v31  ;;  %v1749_v51 = vld [vmem:[#allocation10 + $0x3a8] sm:$0xff]  ;;  %v5995_v2 = vld [vmem:[#allocation84_spill] sm:$0xff] }
 0x219   : > { %2179 = vmatpush.msra.mxu1 %v1734_v9 }
 0x21a   : > { %v5050_v31 = vsel %vm1135_vm3, %v1131_v36, %v1132_v4  ;;  %2244 = vmatpush.msra.mxu2 %v1750_v55  ;;  %2116 = vmatpush.msra.mxu0 %v1716_v49  ;;  %v5996_v36 = vld [vmem:[#allocation43_spill] sm:$0xff]  ;;  %v1309_v55 = vmul.f32 %v4640_v8, %v5058_v57  ;;  %v1748_v49 = vld [vmem:[#allocation10 + $0x3a0] sm:$0xff]  ;;  %v5997_v8 = vld [vmem:[#allocation50_spill] sm:$0xff] }
 0x21b   : > { %1832 = vmatmul.f32.gmra.mxu3 %v1035_v18  ;;  %1962 = vmatmul.f32.gmra.mxu1 %v1228_v27  ;;  %5994 = vst [vmem:[#allocation45_spill] sm:$0xff] %v5050_v31  ;;  %v1775_v27 = vld [vmem:[#allocation10 + $0x478] sm:$0xff]  ;;  %v1732_v18 = vld [vmem:[#allocation10 + $0x320] sm:$0xff] }
 0x21c   : > { %2027 = vmatmul.f32.gmra.mxu2 %v1308_v16  ;;  %2180 = vmatpush.msra.mxu1 %v1733_v19  ;;  %v1229_v16 = vmul.f32 %v5995_v2, %v5050_v31  ;;  %v1731_v19 = vld [vmem:[#allocation10 + $0x318] sm:$0xff]  ;;  %v1729_v31 = vld [vmem:[#allocation10 + $0x308] sm:$0xff] }
 0x21d   : > { %3284 = vset.pattern.permute.xlu1 %v5883_v28  ;;  %3285 = vset.pattern.permute.xlu2 %v5880_v41  ;;  %v5071_v2 = vpop.permute.xlu0 %1333 }
 0x21e   : > { %1605 = vperm.xlu1 %3284, %v3306_v52   ;;  %1445 = vperm.xlu2 %3285, %v3306_v52   ;;  %v1036_v52 = vmul.f32 %v5996_v36, %v5034_v0  ;;  %v1746_v36 = vld [vmem:[#allocation10 + $0x390] sm:$0xff] }
 0x21f   : > { %1900 = vmatmul.f32.gmra.mxu0 %v1116_v11  ;;  %2245 = vmatpush.msra.mxu2 %v1749_v51  ;;  %v5064_v11 = vpop.permute.xlu2 %1501  ;;  %v1747_v51 = vld [vmem:[#allocation10 + $0x398] sm:$0xff] }
 0x220   : > { %v5052_v9 = vpop.permute.xlu1 %1497  ;;  %2300 = vmatpush.msra.mxu3 %v1775_v27  ;;  %2117 = vmatpush.msra.mxu0 %v1715_v56  ;;  %v1117_v27 = vmul.f32 %v5997_v8, %v5022_v53  ;;  %v1713_v56 = vld [vmem:[#allocation10 + $0x288] sm:$0xff] }
 0x221   : > { %2181 = vmatpush.msra.mxu1 %v1732_v18  ;;  %2246 = vmatpush.msra.mxu2 %v1748_v49  ;;  %v1730_v18 = vld [vmem:[#allocation10 + $0x310] sm:$0xff] }
 0x222   : > { %2118 = vmatpush.msra.mxu0 %v1714_v25  ;;  %v5998_v25 = vrot.slane %v4618_v45, 7 }
 0x223   : > { %1835 = vmatmul.f32.gmra.mxu3 %v1036_v52  ;;  %1965 = vmatmul.f32.gmra.mxu1 %v1229_v16  ;;  %v3307_v16 = vld [vmem:[%s5857_s9 + $0x70] sm:$0xff] }
 0x224   : > { %2030 = vmatmul.f32.gmra.mxu2 %v1309_v55  ;;  %2182 = vmatpush.msra.mxu1 %v1731_v19  ;;  %v1774_v52 = vld [vmem:[#allocation10 + $0x470] sm:$0xff]  ;;  %v5084_v55 = vsel %vm1135_vm3, %v1132_v4, %v1133_v59  ;;  %v5999_v19 = vld [vmem:[#allocation40_spill] sm:$0xff]  ;;  %v1745_v4 = vld [vmem:[#allocation10 + $0x388] sm:$0xff] }
 0x225   : > { %2247 = vmatpush.msra.mxu2 %v1747_v51  ;;  %v1230_v49 = vmul.f32 %v4685_v32, %v5084_v55  ;;  %v1037_v8 = vmul.f32 %v5999_v19, %v5058_v57  ;;  %2119 = vmatpush.msra.mxu0 %v1713_v56  ;;  %v1773_v32 = vld [vmem:[#allocation10 + $0x468] sm:$0xff] }
 0x226   : > { %3287 = vset.pattern.permute.xlu1 %v5888_v48  ;;  %3288 = vset.pattern.permute.xlu2 %v5883_v28  ;;  %v5080_v48 = vsel %vm926_vm2, %v921_v40, %v5998_v25  ;;  %v1712_v40 = vld [vmem:[#allocation10 + $0x280] sm:$0xff]  ;;  %v6002_v19 = vld [vmem:[#allocation66_spill] sm:$0xff] }
 0x227   : > { %1369 = vperm.xlu1 %3287, %v3307_v16   ;;  %1609 = vperm.xlu2 %3288, %v3307_v16   ;;  %v1310_v25 = vmul.f32 %v4966_v50, %v5080_v48  ;;  %v5094_v51 = vpop.permute.xlu2 %1581  ;;  %v6000_v50 = vld [vmem:[#allocation47_spill] sm:$0xff] }
 0x228   : > { %1903 = vmatmul.f32.gmra.mxu0 %v1117_v27  ;;  %2183 = vmatpush.msra.mxu1 %v1730_v18  ;;  %v1728_v27 = vld [vmem:[#allocation10 + $0x300] sm:$0xff]  ;;  %v1118_v56 = vmul.f32 %v6000_v50, %v4618_v45 }
 0x229   : > { %v5090_v53 = vpop.permute.xlu1 %1417  ;;  %2248 = vmatpush.msra.mxu2 %v1746_v36  ;;  %2301 = vmatpush.msra.mxu3 %v1774_v52  ;;  %v1744_v18 = vld [vmem:[#allocation10 + $0x380] sm:$0xff]  ;;  %v6001_v36 = vrot.slane %v4623_v46, 1 }
 0x22a   : > { %2120 = vmatpush.msra.mxu0 %v1712_v40  ;;  %2184 = vmatpush.msra.mxu1 %v1729_v31  ;;  %v3308_v31 = vld [vmem:[%s5857_s9 + $0x78] sm:$0xff]  ;;  %v1772_v40 = vld [vmem:[#allocation10 + $0x460] sm:$0xff] }
 0x22b   : > { %1838 = vmatmul.f32.gmra.mxu3 %v1037_v8  ;;  %1968 = vmatmul.f32.gmra.mxu1 %v1230_v49  ;;  %v5104_v52 = vsel %vm1135_vm3, %v1133_v59, %v6001_v36  ;;  %v5109_v49 = vpop.permute.xlu0 %1557  ;;  %v1038_v8 = vmul.f32 %v6002_v19, %v5080_v48  ;;  %v1457_v19 = vmul.f32 %v4821_v63, %v4717_v15 }
 0x22c   : > { %2033 = vmatmul.f32.gmra.mxu2 %v1310_v25  ;;  %2302 = vmatpush.msra.mxu3 %v1773_v32  ;;  %v1456_v32 = vmul.f32 %v4683_v26, %v4689_v43 }
 0x22d   : > { %2249 = vmatpush.msra.mxu2 %v1745_v4  ;;  %2185 = vmatpush.msra.mxu1 %v1728_v27  ;;  %v1376_v4 = vmul.f32 %v5041_v62, %v4681_v12  ;;  %v1536_v27 = vmul.f32 %v4636_v21, %v4638_v24  ;;  %v1377_v21 = vmul.f32 %v4724_v30, %v4711_v33 }
 0x22e   : > { %2303 = vmatpush.msra.mxu3 %v1772_v40 }
 0x22f   : > { %3289 = vset.pattern.permute.xlu1 %v5880_v41  ;;  %3290 = vset.pattern.permute.xlu2 %v5882_v17  ;;  %v1231_v17 = vmul.f32 %v4713_v13, %v5104_v52  ;;  %v5119_v25 = vpop.permute.xlu2 %1345 }
 0x230   : > { %1449 = vperm.xlu1 %3289, %v3307_v16   ;;  %1533 = vperm.xlu2 %3290, %v3308_v31  }
 0x231   : > { %1906 = vmatmul.f32.gmra.mxu0 %v1118_v56  ;;  %2250 = vmatpush.msra.mxu2 %v1744_v18  ;;  %v1771_v18 = vld [vmem:[#allocation10 + $0x458] sm:$0xff] }
 0x232   : > { %v1862_v59 = vpop.f32.mrf.mxu0  ;;  %v5117_v16 = vpop.permute.xlu1 %1341  ;;  %2304 = vmatpush.msra.mxu3 %v1771_v18 }
 0x233   : > { %1841 = vmatmul.f32.gmra.mxu3 %v1038_v8  ;;  %1971 = vmatmul.f32.gmra.mxu1 %v1231_v17  ;;  %v5134_v62 = vpop.permute.xlu0 %1577  ;;  %v1537_v8 = vmul.f32 %v4787_v3, %v4676_v6  ;;  %v1378_v3 = vmul.f32 %v4853_v22, %v4742_v47 }
 0x234   : > { %2036 = vmatmul.f32.gmra.mxu2 %v1311_v14 }
 0x236   : > { %v1927_v13 = vpop.f32.mrf.mxu1 }
 0x238   : > { %3292 = vset.pattern.permute.xlu1 %v5883_v28  ;;  %3293 = vset.pattern.permute.xlu2 %v5880_v41 }
 0x239   : > { %1613 = vperm.xlu1 %3292, %v3308_v31   ;;  %2121 = vmatmul.f32.vlgmr.msra.gmra.mxu0 %v1376_v4  ;;  %v1770_v4 = vld [vmem:[#allocation10 + $0x450] sm:$0xff] }
 0x23a   : > { %1453 = vperm.xlu2 %3293, %v3308_v31   ;;  %v1865_v50 = vpop.f32.mrf.mxu0  ;;  %v5142_v31 = vpop.permute.xlu2 %1425  ;;  %2305 = vmatpush.msra.mxu3 %v1770_v4 }
 0x23b   : > { %2056 = vmatmul.f32.vlgmr.msrb.gmra.mxu3 %v4612_v1  ;;  %2186 = vmatmul.f32.vlgmr.msra.gmra.mxu1 %v1456_v32  ;;  %v1797_v28 = vpop.f32.mrf.mxu3  ;;  %v1402_v30 = vpop.permute.xlu0 %1401 }
 0x23c   : > { %2251 = vmatmul.f32.vlgmr.msra.gmra.mxu2 %v1536_v27  ;;  %v1798_v41 = vadd.f32 %v5128_v20, %v1797_v28  ;;  %v1992_v56 = vpop.f32.mrf.mxu2  ;;  %v1458_v28 = vmul.f32 %v1402_v30, %v4749_v35 }
 0x23d   : > { %v5138_v36 = vpop.permute.xlu1 %1505 }
 0x23e   : > { %v1863_v26 = vadd.f32 %v1862_v59, %v1798_v41  ;;  %v1930_v43 = vpop.f32.mrf.mxu1  ;;  %v1538_v41 = vmul.f32 %v4761_v58, %v4706_v38 }
 0x240   : > { %v1928_v17 = vadd.f32 %v1927_v13, %v1863_v26 }
 0x241   : > { %2124 = vmatmul.f32.gmra.mxu0 %v1377_v21  ;;  %v1769_v21 = vld [vmem:[#allocation10 + $0x448] sm:$0xff] }
 0x242   : > { %v5148_v14 = vadd.f32 %v1992_v56, %v1928_v17  ;;  %v1868_v59 = vpop.f32.mrf.mxu0  ;;  %v5159_v56 = vpop.permute.xlu2 %1589  ;;  %2306 = vmatpush.msra.mxu3 %v1769_v21 }
 0x243   : > { %2059 = vmatmul.f32.gmra.mxu3 %v4638_v24  ;;  %2189 = vmatmul.f32.gmra.mxu1 %v1457_v19 }
 0x244   : > { %2254 = vmatmul.f32.gmra.mxu2 %v1537_v8  ;;  %v1800_v40 = vpop.f32.mrf.mxu3  ;;  %v1459_v8 = vmul.f32 %v4877_v61, %v4779_v39  ;;  %v6005_v39 = vld [vmem:[#allocation93_spill] sm:$0xff] }
 0x245   : > { %v1801_v32 = vadd.f32 %v5128_v20, %v1800_v40  ;;  %v1995_v13 = vpop.f32.mrf.mxu2  ;;  %v6004_v40 = vld [vmem:[#allocation51_spill] sm:$0xff]  ;;  %v1380_v61 = vmul.f32 %v4951_v60, %v6005_v39 }
 0x246   : > { %v5152_v27 = vpop.permute.xlu1 %1585  ;;  %v1933_v15 = vpop.f32.mrf.mxu1  ;;  %v1539_v4 = vmul.f32 %v6004_v40, %v4738_v5 }
 0x247   : > { %v1866_v63 = vadd.f32 %v1865_v50, %v1801_v32 }
 0x249   : > { %v1931_v24 = vadd.f32 %v1930_v43, %v1866_v63  ;;  %2127 = vmatmul.f32.gmra.mxu0 %v1378_v3  ;;  %v1379_v43 = vmul.f32 %v4839_v34, %v4773_v44 }
 0x24a   : > { %v1871_v35 = vpop.f32.mrf.mxu0  ;;  %v5176_v32 = vpop.permute.xlu2 %1513 }
 0x24b   : > { %v5161_v18 = vadd.f32 %v1995_v13, %v1931_v24  ;;  %2062 = vmatmul.f32.gmra.mxu3 %v4676_v6  ;;  %2192 = vmatmul.f32.gmra.mxu1 %v1458_v28  ;;  %v6006_v24 = vld [vmem:[#allocation94_spill] sm:$0xff] }
 0x24c   : > { %2257 = vmatmul.f32.gmra.mxu2 %v1538_v41  ;;  %v1803_v26 = vpop.f32.mrf.mxu3 }
 0x24d   : > { %v1804_v22 = vadd.f32 %v5128_v20, %v1803_v26  ;;  %v1998_v50 = vpop.f32.mrf.mxu2  ;;  %v6007_v26 = vld [vmem:[#allocation90_spill] sm:$0xff] }
 0x24e   : > { %v1936_v19 = vpop.f32.mrf.mxu1  ;;  %v1540_v21 = vmul.f32 %v5009_v42, %v6007_v26  ;;  %v6009_v42 = vld [vmem:[#allocation37_spill] sm:$0xff] }
 0x24f   : > { %v1869_v17 = vadd.f32 %v1868_v59, %v1804_v22  ;;  %v5167_v58 = vpop.permute.xlu1 %1349  ;;  %v1768_v59 = vld [vmem:[#allocation10 + $0x440] sm:$0xff]  ;;  %v1461_v40 = vmul.f32 %v4990_v37, %v6009_v42 }
 0x250   : > { %2307 = vmatpush.msra.mxu3 %v1768_v59  ;;  %v6011_v59 = vld [vmem:[#allocation65_spill] sm:$0xff] }
 0x251   : > { %v1934_v6 = vadd.f32 %v1933_v15, %v1869_v17  ;;  %2130 = vmatmul.f32.gmra.mxu0 %v1379_v43 }
 0x252   : > { %v1874_v63 = vpop.f32.mrf.mxu0 }
 0x253   : > { %v5173_v30 = vadd.f32 %v1998_v50, %v1934_v6  ;;  %2065 = vmatmul.f32.gmra.mxu3 %v4706_v38  ;;  %2195 = vmatmul.f32.gmra.mxu1 %v1459_v8  ;;  %v1460_v38 = vmul.f32 %v4992_v29, %v6006_v24  ;;  %v5191_v8 = vpop.permute.xlu2 %1433  ;;  %v6008_v29 = vld [vmem:[#allocation53_spill] sm:$0xff] }
 0x254   : > { %2260 = vmatmul.f32.gmra.mxu2 %v1539_v4  ;;  %v1806_v34 = vpop.f32.mrf.mxu3 }
 0x255   : > { %v1807_v13 = vadd.f32 %v5128_v20, %v1806_v34  ;;  %v2001_v3 = vpop.f32.mrf.mxu2  ;;  %v6010_v34 = vld [vmem:[#allocation92_spill] sm:$0xff] }
 0x256   : > { %v1939_v22 = vpop.f32.mrf.mxu1 }
 0x257   : > { %v1872_v15 = vadd.f32 %v1871_v35, %v1807_v13  ;;  %v1767_v35 = vld [vmem:[#allocation10 + $0x438] sm:$0xff]  ;;  %v1541_v13 = vmul.f32 %v6011_v59, %v6010_v34 }
 0x258   : > { %v5181_v28 = vpop.permute.xlu1 %1429  ;;  %2308 = vmatpush.msra.mxu3 %v1767_v35 }
 0x259   : > { %v1937_v41 = vadd.f32 %v1936_v19, %v1872_v15  ;;  %2133 = vmatmul.f32.gmra.mxu0 %v1380_v61  ;;  %v1381_v19 = vmul.f32 %v5071_v2, %v6008_v29 }
 0x25b   : > { %v5187_v50 = vadd.f32 %v2001_v3, %v1937_v41  ;;  %2068 = vmatmul.f32.gmra.mxu3 %v4738_v5  ;;  %2198 = vmatmul.f32.gmra.mxu1 %v1460_v38  ;;  %v1877_v3 = vpop.f32.mrf.mxu0  ;;  %v6012_v38 = vld [vmem:[#allocation55_spill] sm:$0xff] }
 0x25c   : > { %2263 = vmatmul.f32.gmra.mxu2 %v1540_v21  ;;  %v1809_v60 = vpop.f32.mrf.mxu3  ;;  %v1382_v41 = vmul.f32 %v5026_v23, %v6012_v38 }
 0x25d   : > { %v1810_v43 = vadd.f32 %v5128_v20, %v1809_v60  ;;  %v2004_v17 = vpop.f32.mrf.mxu2  ;;  %v6013_v60 = vld [vmem:[#allocation44_spill] sm:$0xff] }
 0x25e   : > { %v1942_v15 = vpop.f32.mrf.mxu1  ;;  %v1462_v35 = vmul.f32 %v5090_v53, %v6013_v60  ;;  %v1422_v53 = vpop.permute.xlu0 %1421 }
 0x25f   : > { %v1875_v6 = vadd.f32 %v1874_v63, %v1810_v43  ;;  %v1766_v63 = vld [vmem:[#allocation10 + $0x430] sm:$0xff] }
 0x260   : > { %2309 = vmatpush.msra.mxu3 %v1766_v63 }
 0x261   : > { %v1940_v4 = vadd.f32 %v1939_v22, %v1875_v6  ;;  %2136 = vmatmul.f32.gmra.mxu0 %v1381_v19  ;;  %v5197_v5 = vpop.permute.xlu1 %1593  ;;  %v5207_v22 = vpop.permute.xlu2 %1357 }
 0x263   : > { %v5201_v61 = vadd.f32 %v2004_v17, %v1940_v4  ;;  %2071 = vmatmul.f32.gmra.mxu3 %v6007_v26  ;;  %2201 = vmatmul.f32.gmra.mxu1 %v1461_v40  ;;  %v6014_v26 = vld [vmem:[#allocation64_spill] sm:$0xff]  ;;  %v1765_v40 = vld [vmem:[#allocation10 + $0x428] sm:$0xff] }
 0x264   : > { %2266 = vmatmul.f32.gmra.mxu2 %v1541_v13  ;;  %v1812_v2 = vpop.f32.mrf.mxu3  ;;  %v1542_v17 = vmul.f32 %v5052_v9, %v6014_v26  ;;  %v1880_v42 = vpop.f32.mrf.mxu0  ;;  %2310 = vmatpush.msra.mxu3 %v1765_v40  ;;  %v6015_v13 = vld [vmem:[#allocation52_spill] sm:$0xff] }
 0x265   : > { %v1813_v24 = vadd.f32 %v5128_v20, %v1812_v2  ;;  %v2007_v37 = vpop.f32.mrf.mxu2  ;;  %v6016_v2 = vld [vmem:[#allocation60_spill] sm:$0xff] }
 0x266   : > { %v1945_v59 = vpop.f32.mrf.mxu1  ;;  %v1463_v63 = vmul.f32 %v1422_v53, %v6016_v2  ;;  %v6019_v53 = vld [vmem:[#allocation41_spill] sm:$0xff] }
 0x267   : > { %v1878_v21 = vadd.f32 %v1877_v3, %v1813_v24  ;;  %v1383_v3 = vmul.f32 %v5117_v16, %v6015_v13 }
 0x269   : > { %v1943_v43 = vadd.f32 %v1942_v15, %v1878_v21  ;;  %2139 = vmatmul.f32.gmra.mxu0 %v1382_v41  ;;  %v5224_v41 = vpop.permute.xlu2 %1521 }
 0x26a   : > { %v5213_v19 = vpop.permute.xlu1 %1517 }
 0x26b   : > { %v5215_v6 = vadd.f32 %v2007_v37, %v1943_v43  ;;  %2074 = vmatmul.f32.gmra.mxu3 %v6010_v34  ;;  %2204 = vmatmul.f32.gmra.mxu1 %v1462_v35  ;;  %v6017_v34 = vld [vmem:[#allocation57_spill] sm:$0xff] }
 0x26c   : > { %2269 = vmatmul.f32.gmra.mxu2 %v1542_v17  ;;  %v1815_v23 = vpop.f32.mrf.mxu3  ;;  %v1543_v37 = vmul.f32 %v5064_v11, %v6017_v34  ;;  %v1764_v43 = vld [vmem:[#allocation10 + $0x420] sm:$0xff]  ;;  %v1883_v17 = vpop.f32.mrf.mxu0 }
 0x26d   : > { %v1816_v4 = vadd.f32 %v5128_v20, %v1815_v23  ;;  %v2010_v15 = vpop.f32.mrf.mxu2  ;;  %2311 = vmatpush.msra.mxu3 %v1764_v43  ;;  %v1510_v11 = vpop.permute.xlu0 %1509 }
 0x26f   : > { %v1881_v9 = vadd.f32 %v1880_v42, %v1816_v4  ;;  %v6018_v42 = vld [vmem:[#allocation63_spill] sm:$0xff]  ;;  %v1948_v4 = vpop.f32.mrf.mxu1 }
 0x270   : > { %v1384_v23 = vmul.f32 %v5119_v25, %v6018_v42 }
 0x271   : > { %v1946_v24 = vadd.f32 %v1945_v59, %v1881_v9  ;;  %2142 = vmatmul.f32.gmra.mxu0 %v1383_v3  ;;  %v1464_v59 = vmul.f32 %v5142_v31, %v6019_v53  ;;  %v6021_v31 = vld [vmem:[#allocation68_spill] sm:$0xff] }
 0x273   : > { %v5226_v21 = vadd.f32 %v2010_v15, %v1946_v24  ;;  %2077 = vmatmul.f32.gmra.mxu3 %v6014_v26  ;;  %2207 = vmatmul.f32.gmra.mxu1 %v1463_v63  ;;  %v1438_v60 = vpop.permute.xlu1 %1437  ;;  %v6020_v26 = vld [vmem:[#allocation58_spill] sm:$0xff]  ;;  %v1763_v63 = vld [vmem:[#allocation10 + $0x418] sm:$0xff] }
 0x274   : > { %2272 = vmatmul.f32.gmra.mxu2 %v1543_v37  ;;  %v1818_v35 = vpop.f32.mrf.mxu3  ;;  %v1544_v9 = vmul.f32 %v5138_v36, %v6020_v26  ;;  %2312 = vmatpush.msra.mxu3 %v1763_v63  ;;  %v1385_v37 = vmul.f32 %v5167_v58, %v6021_v31  ;;  %v1466_v58 = vmul.f32 %v5191_v8, %v4998_v7  ;;  %v6026_v8 = vld [vmem:[#allocation38_spill] sm:$0xff] }
 0x275   : > { %v1819_v16 = vadd.f32 %v5128_v20, %v1818_v35  ;;  %v2013_v15 = vpop.f32.mrf.mxu2  ;;  %v5239_v20 = vpop.permute.xlu2 %1601  ;;  %v6022_v35 = vld [vmem:[#allocation48_spill] sm:$0xff]  ;;  %v1467_v7 = vmul.f32 %v1438_v60, %v5034_v0  ;;  %v6028_v0 = vld [vmem:[#allocation70_spill] sm:$0xff] }
 0x276   : > { %v1465_v36 = vmul.f32 %v5181_v28, %v6022_v35  ;;  %v1546_v28 = vmul.f32 %v5176_v32, %v4955_v54  ;;  %v1547_v32 = vmul.f32 %v5213_v19, %v6026_v8  ;;  %v1760_v35 = vld [vmem:[#allocation10 + $0x400] sm:$0xff]  ;;  %v1548_v60 = vmul.f32 %v5224_v41, %v6028_v0 }
 0x277   : > { %v1884_v40 = vadd.f32 %v1883_v17, %v1819_v16  ;;  %v6023_v16 = vld [vmem:[#allocation71_spill] sm:$0xff]  ;;  %v1354_v17 = vpop.permute.xlu0 %1353 }
 0x278   : > { %v1545_v43 = vmul.f32 %v1510_v11, %v6023_v16 }
 0x279   : > { %v1949_v3 = vadd.f32 %v1948_v4, %v1884_v40  ;;  %2145 = vmatmul.f32.gmra.mxu0 %v1384_v23  ;;  %v1762_v23 = vld [vmem:[#allocation10 + $0x410] sm:$0xff]  ;;  %v6024_v4 = vld [vmem:[#allocation61_spill] sm:$0xff] }
 0x27a   : > { %2313 = vmatpush.msra.mxu3 %v1762_v23  ;;  %v1386_v53 = vmul.f32 %v1354_v17, %v6024_v4 }
 0x27b   : > { %v5236_v2 = vadd.f32 %v2013_v15, %v1949_v3  ;;  %2080 = vmatmul.f32.gmra.mxu3 %v6017_v34  ;;  %2210 = vmatmul.f32.gmra.mxu1 %v1464_v59  ;;  %v1761_v3 = vld [vmem:[#allocation10 + $0x408] sm:$0xff] }
 0x27c   : > { %2275 = vmatmul.f32.gmra.mxu2 %v1544_v9  ;;  %v5241_v25 = vpop.f32.mrf.mxu3  ;;  %v1362_v24 = vpop.permute.xlu1 %1361  ;;  %2314 = vmatpush.msra.mxu3 %v1761_v3  ;;  %v6025_v9 = vld [vmem:[#allocation76_spill] sm:$0xff] }
 0x27d   : > { %v1366_v40 = vpop.permute.xlu2 %1365  ;;  %v1387_v15 = vmul.f32 %v5207_v22, %v6025_v9  ;;  %v2444_v3 = vld [vmem:[#allocation11 + $0x1f8] sm:$0xff] }
 0x27e   : > { %2315 = vmatpush.msra.mxu3 %v1760_v35  ;;  %v2410_v35 = vld [vmem:[#allocation11 + $0xe8] sm:$0xff] }
 0x27f   : > { %v5257_v11 = vpop.permute.xlu0 %1597 }
 0x280   : > { %2646 = vmatpush.msrb.mxu3 %v2444_v3  ;;  %v2440_v3 = vld [vmem:[#allocation11 + $0x1d8] sm:$0xff] }
 0x281   : > { %2148 = vmatmul.f32.gmra.mxu0 %v1385_v37 }
 0x283   : > { %2083 = vmatmul.f32.gmra.mxu3 %v6020_v26  ;;  %2213 = vmatmul.f32.gmra.mxu1 %v1465_v36 }
 0x284   : > { %2278 = vmatmul.f32.gmra.mxu2 %v1545_v43  ;;  %v6027_v43 = vld [vmem:[#allocation45_spill] sm:$0xff] }
 0x285   : > { %v5249_v34 = vpop.f32.mrf.mxu3  ;;  %v1446_v63 = vpop.permute.xlu2 %1445  ;;  %v1388_v22 = vmul.f32 %v1362_v24, %v6027_v43 }
 0x287   : > { %v1526_v59 = vpop.permute.xlu1 %1525  ;;  %v1442_v36 = vpop.permute.xlu0 %1441 }
 0x288   : > { %v1468_v17 = vmul.f32 %v1442_v36, %v5058_v57  ;;  %v1549_v57 = vmul.f32 %v1526_v59, %v4618_v45 }
 0x289   : > { %2151 = vmatmul.f32.gmra.mxu0 %v1386_v53  ;;  %v1389_v53 = vmul.f32 %v1366_v40, %v5084_v55 }
 0x28b   : > { %2086 = vmatmul.f32.gmra.mxu3 %v6023_v16  ;;  %2216 = vmatmul.f32.gmra.mxu1 %v1466_v58  ;;  %v1469_v58 = vmul.f32 %v1446_v63, %v5080_v48 }
 0x28c   : > { %2281 = vmatmul.f32.gmra.mxu2 %v1546_v28  ;;  %v2412_v28 = vld [vmem:[#allocation11 + $0xf8] sm:$0xff] }
 0x28d   : > { %v5275_v19 = vpop.permute.xlu2 %1609  ;;  %2581 = vmatpush.msrb.mxu2 %v2412_v28 }
 0x28e   : > { %v5259_v26 = vpop.f32.mrf.mxu3 }
 0x28f   : > { %v1530_v24 = vpop.permute.xlu0 %1529  ;;  %2582 = vmatpush.msrb.mxu2 %v2410_v35  ;;  %v1617_v35 = vmul.f32 %v5109_v49, %v4742_v47  ;;  %v5320_v49 = vpop.f32.mrf.mxu1 }
 0x290   : > { %v5266_v37 = vpop.permute.xlu1 %1605  ;;  %v1550_v63 = vmul.f32 %v1530_v24, %v4623_v46  ;;  %v2441_v24 = vld [vmem:[#allocation11 + $0x1e0] sm:$0xff] }
 0x291   : > { %2154 = vmatmul.f32.gmra.mxu0 %v1387_v15 }
 0x293   : > { %2089 = vmatmul.f32.gmra.mxu3 %v4955_v54  ;;  %2219 = vmatmul.f32.gmra.mxu1 %v1467_v7 }
 0x294   : > { %2284 = vmatmul.f32.gmra.mxu2 %v1547_v32  ;;  %v2443_v32 = vld [vmem:[#allocation11 + $0x1f0] sm:$0xff] }
 0x295   : > { %v1534_v41 = vpop.permute.xlu2 %1533  ;;  %2516 = vmatpush.msrb.mxu1 %v2443_v32 }
 0x296   : > { %v5269_v16 = vpop.f32.mrf.mxu3 }
 0x297   : > { %v1374_v59 = vpop.permute.xlu0 %1373  ;;  %2517 = vmatpush.msrb.mxu1 %v2441_v24 }
 0x299   : > { %2157 = vmatmul.f32.gmra.mxu0 %v1388_v22  ;;  %v1370_v54 = vpop.permute.xlu1 %1369 }
 0x29a   : > { %v1390_v40 = vmul.f32 %v1370_v54, %v5104_v52  ;;  %v6030_v54 = vld [vmem:[#allocation88_spill] sm:$0xff] }
 0x29b   : > { %2092 = vmatmul.f32.gmra.mxu3 %v6026_v8  ;;  %2222 = vmatmul.f32.gmra.mxu1 %v1468_v17  ;;  %v2411_v8 = vld [vmem:[#allocation11 + $0xf0] sm:$0xff]  ;;  %v2442_v17 = vld [vmem:[#allocation11 + $0x1e8] sm:$0xff] }
 0x29c   : > { %2287 = vmatmul.f32.gmra.mxu2 %v1548_v60  ;;  %2451 = vmatpush.msrb.mxu0 %v2411_v8  ;;  %v2438_v8 = vld [vmem:[#allocation11 + $0x1c8] sm:$0xff] }
 0x29d   : > { %v1454_v36 = vpop.permute.xlu2 %1453  ;;  %2647 = vmatpush.msrb.mxu3 %v2442_v17  ;;  %v2405_v17 = vld [vmem:[#allocation11 + $0xc0] sm:$0xff] }
 0x29e   : > { %v5278_v23 = vpop.f32.mrf.mxu3 }
 0x29f   : > { %2648 = vmatpush.msrb.mxu3 %v2440_v3  ;;  %v2435_v3 = vld [vmem:[#allocation11 + $0x1b0] sm:$0xff] }
 0x2a1   : > { %2160 = vmatmul.f32.gmra.mxu0 %v1389_v53  ;;  %v1551_v53 = vmul.f32 %v1534_v41, %v4612_v1  ;;  %v2439_v41 = vld [vmem:[#allocation11 + $0x1d0] sm:$0xff]  ;;  %2649 = vmatpush.msrb.mxu3 %v2438_v8 }
 0x2a2   : > { %v1450_v15 = vpop.permute.xlu1 %1449  ;;  %2518 = vmatpush.msrb.mxu1 %v2439_v41 }
 0x2a3   : > { %2095 = vmatmul.f32.gmra.mxu3 %v6028_v0  ;;  %2225 = vmatmul.f32.gmra.mxu1 %v1469_v58  ;;  %v1470_v48 = vmul.f32 %v1450_v15, %v4646_v10  ;;  %v6029_v0 = vld [vmem:[#allocation87_spill] sm:$0xff]  ;;  %v5293_v10 = vpop.f32.mrf.mxu0  ;;  %v2409_v58 = vld [vmem:[#allocation11 + $0xe0] sm:$0xff]  ;;  %v5300_v15 = vpop.f32.mrf.mxu2 }
 0x2a4   : > { %2290 = vmatmul.f32.gmra.mxu2 %v1549_v57  ;;  %v1391_v60 = vmul.f32 %v1374_v59, %v6029_v0  ;;  %v2408_v57 = vld [vmem:[#allocation11 + $0xd8] sm:$0xff]  ;;  %2452 = vmatpush.msrb.mxu0 %v2409_v58  ;;  %v6033_v58 = vld [vmem:[#allocation91_spill] sm:$0xff] }
 0x2a5   : > { %2583 = vmatpush.msrb.mxu2 %v2408_v57  ;;  %v1618_v47 = vmul.f32 %v6033_v58, %v4773_v44  ;;  %v2403_v57 = vld [vmem:[#allocation11 + $0xb0] sm:$0xff]  ;;  %v6034_v44 = vld [vmem:[#allocation56_spill] sm:$0xff] }
 0x2a6   : > { %v5284_v7 = vpop.f32.mrf.mxu3 }
 0x2a9   : > { %2163 = vmatmul.f32.gmra.mxu0 %v1390_v40  ;;  %v6032_v40 = vld [vmem:[#allocation89_spill] sm:$0xff] }
 0x2ab   : > { %2098 = vmatmul.f32.gmra.mxu3 %v4618_v45  ;;  %2228 = vmatmul.f32.gmra.mxu1 %v1470_v48  ;;  %v1471_v45 = vmul.f32 %v1454_v36, %v6030_v54  ;;  %v1616_v48 = vmul.f32 %v6032_v40, %v4711_v33  ;;  %v5304_v1 = vpop.f32.mrf.mxu0  ;;  %v5311_v36 = vpop.f32.mrf.mxu2  ;;  %v2404_v54 = vld [vmem:[#allocation11 + $0xb8] sm:$0xff]  ;;  %v2402_v40 = vld [vmem:[#allocation11 + $0xa8] sm:$0xff] }
 0x2ac   : > { %2293 = vmatmul.f32.gmra.mxu2 %v1550_v63  ;;  %v2406_v63 = vld [vmem:[#allocation11 + $0xc8] sm:$0xff] }
 0x2ad   : > { %2584 = vmatpush.msrb.mxu2 %v2406_v63  ;;  %v1619_v63 = vmul.f32 %v6034_v44, %v6005_v39 }
 0x2ae   : > { %v5290_v22 = vpop.f32.mrf.mxu3 }
 0x2af   : > { %2585 = vmatpush.msrb.mxu2 %v2404_v54 }
 0x2b1   : > { %2166 = vmatmul.f32.gmra.mxu0 %v1391_v60  ;;  %v2437_v60 = vld [vmem:[#allocation11 + $0x1c0] sm:$0xff]  ;;  %2586 = vmatpush.msrb.mxu2 %v2402_v40 }
 0x2b2   : > { %2519 = vmatpush.msrb.mxu1 %v2437_v60  ;;  %v2400_v60 = vld [vmem:[#allocation11 + $0x98] sm:$0xff] }
 0x2b3   : > { %2101 = vmatmul.f32.gmra.mxu3 %v4623_v46  ;;  %2231 = vmatmul.f32.gmra.mxu1 %v1471_v45  ;;  %v2407_v46 = vld [vmem:[#allocation11 + $0xd0] sm:$0xff]  ;;  %v5313_v33 = vpop.f32.mrf.mxu0  ;;  %v5322_v24 = vpop.f32.mrf.mxu2 }
 0x2b4   : > { %2296 = vmatmul.f32.gmra.mxu2 %v1551_v53  ;;  %2453 = vmatpush.msrb.mxu0 %v2407_v46  ;;  %v2436_v53 = vld [vmem:[#allocation11 + $0x1b8] sm:$0xff]  ;;  %v2434_v46 = vld [vmem:[#allocation11 + $0x1a8] sm:$0xff] }
 0x2b5   : > { %2650 = vmatpush.msrb.mxu3 %v2436_v53  ;;  %2520 = vmatpush.msrb.mxu1 %v2435_v3  ;;  %v6035_v53 = vld [vmem:[#allocation62_spill] sm:$0xff] }
 0x2b6   : > { %v5298_v28 = vpop.f32.mrf.mxu3  ;;  %2454 = vmatpush.msrb.mxu0 %v2405_v17  ;;  %v2433_v17 = vld [vmem:[#allocation11 + $0x1a0] sm:$0xff]  ;;  %2587 = vmatpush.msrb.mxu2 %v2400_v60  ;;  %v1620_v39 = vmul.f32 %v6035_v53, %v6008_v29  ;;  %v2398_v3 = vld [vmem:[#allocation11 + $0x88] sm:$0xff]  ;;  %v2428_v53 = vld [vmem:[#allocation11 + $0x178] sm:$0xff] }
 0x2b7   : > { %6031 = vst [vmem:[#allocation72_spill] sm:$0xff] %v5298_v28  ;;  %2651 = vmatpush.msrb.mxu3 %v2434_v46  ;;  %2521 = vmatpush.msrb.mxu1 %v2433_v17  ;;  %v2430_v46 = vld [vmem:[#allocation11 + $0x188] sm:$0xff]  ;;  %v6036_v29 = vld [vmem:[#allocation69_spill] sm:$0xff] }
 0x2b8   : > { %2455 = vmatpush.msrb.mxu0 %v2403_v57  ;;  %v2431_v57 = vld [vmem:[#allocation11 + $0x190] sm:$0xff]  ;;  %2588 = vmatpush.msrb.mxu2 %v2398_v3  ;;  %v2397_v17 = vld [vmem:[#allocation11 + $0x80] sm:$0xff] }
 0x2b9   : > { %2522 = vmatpush.msrb.mxu1 %v2431_v57  ;;  %v2429_v60 = vld [vmem:[#allocation11 + $0x180] sm:$0xff]  ;;  %v2395_v3 = vld [vmem:[#allocation11 + $0x70] sm:$0xff] }
 0x2bb   : > { %2316 = vmatmul.f32.vlgmr.msra.gmra.mxu3 %v1616_v48  ;;  %v5324_v41 = vpop.f32.mrf.mxu0  ;;  %v5333_v8 = vpop.f32.mrf.mxu2  ;;  %2523 = vmatpush.msrb.mxu1 %v2429_v60  ;;  %v2393_v60 = vld [vmem:[#allocation11 + $0x60] sm:$0xff] }
 0x2be   : > { %v2057_v59 = vpop.f32.mrf.mxu3 }
 0x2bf   : > { %v5307_v32 = vadd.f32 %v2057_v59, %v5148_v14  ;;  %v5331_v59 = vpop.f32.mrf.mxu1 }
 0x2c3   : > { %2319 = vmatmul.f32.gmra.mxu3 %v1617_v35  ;;  %v2401_v35 = vld [vmem:[#allocation11 + $0xa0] sm:$0xff]  ;;  %v5340_v58 = vpop.f32.mrf.mxu0  ;;  %v5344_v44 = vpop.f32.mrf.mxu2 }
 0x2c4   : > { %2456 = vmatpush.msrb.mxu0 %v2401_v35 }
 0x2c6   : > { %v2060_v45 = vpop.f32.mrf.mxu3 }
 0x2c7   : > { %v5316_v14 = vadd.f32 %v2060_v45, %v5161_v18  ;;  %v2432_v45 = vld [vmem:[#allocation11 + $0x198] sm:$0xff]  ;;  %v5342_v40 = vpop.f32.mrf.mxu1 }
 0x2c8   : > { %2652 = vmatpush.msrb.mxu3 %v2432_v45 }
 0x2ca   : > { %2653 = vmatpush.msrb.mxu3 %v2430_v46  ;;  %v2394_v46 = vld [vmem:[#allocation11 + $0x68] sm:$0xff] }
 0x2cb   : > { %2322 = vmatmul.f32.gmra.mxu3 %v1618_v47  ;;  %v2399_v47 = vld [vmem:[#allocation11 + $0x90] sm:$0xff]  ;;  %v5351_v35 = vpop.f32.mrf.mxu0 }
 0x2cc   : > { %2457 = vmatpush.msrb.mxu0 %v2399_v47  ;;  %2654 = vmatpush.msrb.mxu3 %v2428_v53  ;;  %v5360_v47 = vpop.f32.mrf.mxu2 }
 0x2ce   : > { %v2063_v48 = vpop.f32.mrf.mxu3  ;;  %2458 = vmatpush.msrb.mxu0 %v2397_v17 }
 0x2cf   : > { %v5327_v18 = vadd.f32 %v2063_v48, %v5173_v30 }
 0x2d0   : > { %2459 = vmatpush.msrb.mxu0 %v2395_v3 }
 0x2d2   : > { %2460 = vmatpush.msrb.mxu0 %v2393_v60  ;;  %v2422_v60 = vld [vmem:[#allocation11 + $0x148] sm:$0xff] }
 0x2d3   : > { %2325 = vmatmul.f32.gmra.mxu3 %v1619_v63  ;;  %v1621_v63 = vmul.f32 %v6036_v29, %v6012_v38  ;;  %v1622_v38 = vmul.f32 %v5134_v62, %v6015_v13  ;;  %v5362_v57 = vpop.f32.mrf.mxu0  ;;  %v1623_v62 = vmul.f32 %v5094_v51, %v6018_v42  ;;  %v1624_v51 = vmul.f32 %v5152_v27, %v6021_v31  ;;  %v2389_v27 = vld [vmem:[#allocation11 + $0x40] sm:$0xff] }
 0x2d4   : > { %6037 = vst [vmem:[#allocation54_spill] sm:$0xff] %v5362_v57  ;;  %v5371_v17 = vpop.f32.mrf.mxu2  ;;  %v2421_v31 = vld [vmem:[#allocation11 + $0x140] sm:$0xff] }
 0x2d5   : > { %6038 = vst [vmem:[#allocation81_spill] sm:$0xff] %v5371_v17  ;;  %v3310_v17 = vld [vmem:[%s4010_s5 + $0x8] sm:$0xff] }
 0x2d6   : > { %v2066_v54 = vpop.f32.mrf.mxu3 }
 0x2d7   : > { %v5336_v30 = vadd.f32 %v2066_v54, %v5187_v50  ;;  %v2396_v54 = vld [vmem:[#allocation11 + $0x78] sm:$0xff] }
 0x2d8   : > { %2589 = vmatpush.msrb.mxu2 %v2396_v54  ;;  %v2425_v54 = vld [vmem:[#allocation11 + $0x160] sm:$0xff] }
 0x2da   : > { %2590 = vmatpush.msrb.mxu2 %v2394_v46  ;;  %v2391_v46 = vld [vmem:[#allocation11 + $0x50] sm:$0xff] }
 0x2db   : > { %2328 = vmatmul.f32.gmra.mxu3 %v1620_v39  ;;  %v5373_v3 = vpop.f32.mrf.mxu0  ;;  %2461 = vmatpush.msrb.mxu0 %v2391_v46 }
 0x2dc   : > { %6039 = vst [vmem:[#allocation74_spill] sm:$0xff] %v5373_v3 }
 0x2dd   : > { %2462 = vmatpush.msrb.mxu0 %v2389_v27  ;;  %v2418_v27 = vld [vmem:[#allocation11 + $0x128] sm:$0xff] }
 0x2de   : > { %v2069_v48 = vpop.f32.mrf.mxu3 }
 0x2df   : > { %v5347_v50 = vadd.f32 %v2069_v48, %v5201_v61  ;;  %v5356_v61 = vpop.f32.mrf.mxu1  ;;  %v2427_v48 = vld [vmem:[#allocation11 + $0x170] sm:$0xff] }
 0x2e0   : > { %2524 = vmatpush.msrb.mxu1 %v2427_v48  ;;  %v5382_v48 = vpop.f32.mrf.mxu2 }
 0x2e1   : > { %6040 = vst [vmem:[#allocation75_spill] sm:$0xff] %v5382_v48  ;;  %v2384_v48 = vld [vmem:[#allocation11 + $0x18] sm:$0xff] }
 0x2e2   : > { %2525 = vmatpush.msrb.mxu1 %v2425_v54 }
 0x2e3   : > { %2331 = vmatmul.f32.gmra.mxu3 %v1621_v63  ;;  %v5388_v54 = vpop.f32.mrf.mxu0 }
 0x2e6   : > { %v2072_v45 = vpop.f32.mrf.mxu3 }
 0x2e7   : > { %v5354_v39 = vadd.f32 %v2072_v45, %v5215_v6  ;;  %v2426_v6 = vld [vmem:[#allocation11 + $0x168] sm:$0xff]  ;;  %v5369_v13 = vpop.f32.mrf.mxu1  ;;  %v2392_v45 = vld [vmem:[#allocation11 + $0x58] sm:$0xff] }
 0x2e8   : > { %2655 = vmatpush.msrb.mxu3 %v2426_v6  ;;  %2591 = vmatpush.msrb.mxu2 %v2392_v45  ;;  %v2390_v6 = vld [vmem:[#allocation11 + $0x48] sm:$0xff]  ;;  %v2388_v45 = vld [vmem:[#allocation11 + $0x38] sm:$0xff]  ;;  %v5394_v46 = vpop.f32.mrf.mxu2 }
 0x2ea   : > { %2592 = vmatpush.msrb.mxu2 %v2390_v6  ;;  %v2419_v6 = vld [vmem:[#allocation11 + $0x130] sm:$0xff] }
 0x2eb   : > { %2334 = vmatmul.f32.gmra.mxu3 %v1622_v38  ;;  %v2424_v38 = vld [vmem:[#allocation11 + $0x158] sm:$0xff] }
 0x2ec   : > { %2656 = vmatpush.msrb.mxu3 %v2424_v38  ;;  %2593 = vmatpush.msrb.mxu2 %v2388_v45  ;;  %v1627_v45 = vmul.f32 %v5257_v11, %v6027_v43 }
 0x2ee   : > { %v2075_v29 = vpop.f32.mrf.mxu3  ;;  %2657 = vmatpush.msrb.mxu3 %v2422_v60  ;;  %v2386_v60 = vld [vmem:[#allocation11 + $0x28] sm:$0xff] }
 0x2ef   : > { %v5365_v63 = vadd.f32 %v2075_v29, %v5226_v21  ;;  %v5380_v42 = vpop.f32.mrf.mxu1  ;;  %v2423_v29 = vld [vmem:[#allocation11 + $0x150] sm:$0xff]  ;;  %2594 = vmatpush.msrb.mxu2 %v2386_v60 }
 0x2f0   : > { %2526 = vmatpush.msrb.mxu1 %v2423_v29  ;;  %v2387_v29 = vld [vmem:[#allocation11 + $0x30] sm:$0xff] }
 0x2f1   : > { %2463 = vmatpush.msrb.mxu0 %v2387_v29  ;;  %v2416_v29 = vld [vmem:[#allocation11 + $0x118] sm:$0xff]  ;;  %2595 = vmatpush.msrb.mxu2 %v2384_v48  ;;  %v2383_v60 = vld [vmem:[#allocation11 + $0x10] sm:$0xff]  ;;  %v2381_v48 = vld [vmem:[#allocation11] sm:$0xff] }
 0x2f2   : > { %2527 = vmatpush.msrb.mxu1 %v2421_v31 }
 0x2f3   : > { %2337 = vmatmul.f32.gmra.mxu3 %v1623_v62 }
 0x2f4   : > { %2528 = vmatpush.msrb.mxu1 %v2419_v6  ;;  %v1628_v6 = vmul.f32 %v5239_v20, %v5084_v55  ;;  %v1629_v55 = vmul.f32 %v5266_v37, %v5104_v52  ;;  %v2413_v20 = vld [vmem:[#allocation11 + $0x100] sm:$0xff]  ;;  %v1614_v52 = vpop.permute.xlu1 %1613 }
 0x2f6   : > { %v2078_v53 = vpop.f32.mrf.mxu3 }
 0x2f7   : > { %v5376_v21 = vadd.f32 %v2078_v53, %v5236_v2  ;;  %v1625_v2 = vmul.f32 %v5159_v56, %v6024_v4  ;;  %v5390_v53 = vpop.f32.mrf.mxu1  ;;  %v1626_v56 = vmul.f32 %v5197_v5, %v6025_v9  ;;  %v5398_v4 = vpop.f32.mrf.mxu0  ;;  %v2385_v9 = vld [vmem:[#allocation11 + $0x20] sm:$0xff] }
 0x2f8   : > { %6041 = vst [vmem:[#allocation85_spill] sm:$0xff] %v5390_v53  ;;  %2464 = vmatpush.msrb.mxu0 %v2385_v9  ;;  %v2414_v9 = vld [vmem:[#allocation11 + $0x108] sm:$0xff] }
 0x2fa   : > { %2465 = vmatpush.msrb.mxu0 %v2383_v60 }
 0x2fb   : > { %2340 = vmatmul.f32.gmra.mxu3 %v1624_v51  ;;  %v2420_v51 = vld [vmem:[#allocation11 + $0x138] sm:$0xff] }
 0x2fc   : > { %2658 = vmatpush.msrb.mxu3 %v2420_v51  ;;  %v5406_v51 = vpop.f32.mrf.mxu2  ;;  %2466 = vmatpush.msrb.mxu0 %v2381_v48 }
 0x2fe   : > { %v5384_v62 = vpop.f32.mrf.mxu3  ;;  %2659 = vmatpush.msrb.mxu3 %v2418_v27  ;;  %v2415_v27 = vld [vmem:[#allocation11 + $0x110] sm:$0xff] }
 0x2ff   : > { %v5402_v31 = vpop.f32.mrf.mxu1  ;;  %v5408_v5 = vpop.f32.mrf.mxu0 }
 0x300   : > { %6042 = vst [vmem:[#allocation77_spill] sm:$0xff] %v5402_v31  ;;  %2660 = vmatpush.msrb.mxu3 %v2416_v29  ;;  %v3309_v29 = vld [vmem:[%s4010_s5] sm:$0xff] }
 0x301   : > { %2467 = vmatmul.f32.vlgmr.msrb.gmra.mxu0 %v3309_v29 }
 0x302   : > { %2661 = vmatpush.msrb.mxu3 %v2414_v9 }
 0x303   : > { %2343 = vmatmul.f32.gmra.mxu3 %v1625_v2 }
 0x304   : > { %v5414_v43 = vpop.f32.mrf.mxu2 }
 0x306   : > { %v5392_v38 = vpop.f32.mrf.mxu3 }
 0x307   : > { %v2187_v11 = vpop.f32.mrf.mxu1 }
 0x309   : > { %2470 = vmatmul.f32.gmra.mxu0 %v3310_v17 }
 0x30b   : > { %2346 = vmatmul.f32.gmra.mxu3 %v1626_v56  ;;  %v2417_v56 = vld [vmem:[#allocation11 + $0x120] sm:$0xff] }
 0x30c   : > { %2529 = vmatpush.msrb.mxu1 %v2417_v56  ;;  %v5418_v56 = vpop.f32.mrf.mxu0  ;;  %v5423_v60 = vpop.f32.mrf.mxu2 }
 0x30e   : > { %v5400_v2 = vpop.f32.mrf.mxu3  ;;  %2530 = vmatpush.msrb.mxu1 %v2415_v27 }
 0x310   : > { %2531 = vmatpush.msrb.mxu1 %v2413_v20  ;;  %v1631_v20 = vmul.f32 %v1614_v52, %v4681_v12  ;;  %v2126_v12 = vadd.f32 %v5398_v4, %v5316_v14  ;;  %v2129_v14 = vadd.f32 %v5408_v5, %v5327_v18 }
 0x313   : > { %2349 = vmatmul.f32.gmra.mxu3 %v1627_v45  ;;  %v2382_v45 = vld [vmem:[#allocation11 + $0x8] sm:$0xff] }
 0x314   : > { %2596 = vmatpush.msrb.mxu2 %v2382_v45  ;;  %v1630_v45 = vmul.f32 %v5275_v19, %v6029_v0  ;;  %v2134_v9 = vpop.f32.mrf.mxu0  ;;  %v2123_v19 = vadd.f32 %v5388_v54, %v5307_v32  ;;  %v3313_v32 = vld [vmem:[%s4010_s5 + $0x20] sm:$0xff] }
 0x315   : > { %2597 = vmatmul.f32.vlgmr.msrb.gmra.mxu2 %v3309_v29  ;;  %v5432_v29 = vpop.f32.mrf.mxu2 }
 0x316   : > { %v5410_v3 = vpop.f32.mrf.mxu3 }
 0x31b   : > { %2352 = vmatmul.f32.gmra.mxu3 %v1628_v6  ;;  %v2190_v6 = vpop.f32.mrf.mxu1 }
 0x31c   : > { %v5436_v28 = vpop.f32.mrf.mxu0  ;;  %v2191_v54 = vadd.f32 %v2190_v6, %v2126_v12 }
 0x31d   : > { %2600 = vmatmul.f32.gmra.mxu2 %v3310_v17  ;;  %v5443_v53 = vpop.f32.mrf.mxu2 }
 0x31e   : > { %v5416_v31 = vpop.f32.mrf.mxu3 }
 0x323   : > { %2355 = vmatmul.f32.gmra.mxu3 %v1629_v55  ;;  %v2193_v37 = vpop.f32.mrf.mxu1  ;;  %v3311_v55 = vld [vmem:[%s4010_s5 + $0x10] sm:$0xff] }
 0x324   : > { %2473 = vmatmul.f32.gmra.mxu0 %v3311_v55  ;;  %v5448_v52 = vpop.f32.mrf.mxu0  ;;  %v2194_v6 = vadd.f32 %v2193_v37, %v2129_v14 }
 0x325   : > { %2603 = vmatmul.f32.gmra.mxu2 %v3311_v55 }
 0x326   : > { %v5425_v27 = vpop.f32.mrf.mxu3 }
 0x327   : > { %6043 = vst [vmem:[#allocation86_spill] sm:$0xff] %v5425_v27 }
 0x32b   : > { %2358 = vmatmul.f32.gmra.mxu3 %v1630_v45  ;;  %v2196_v17 = vpop.f32.mrf.mxu1  ;;  %v3312_v45 = vld [vmem:[%s4010_s5 + $0x18] sm:$0xff] }
 0x32c   : > { %2476 = vmatmul.f32.gmra.mxu0 %v3312_v45 }
 0x32d   : > { %2606 = vmatmul.f32.gmra.mxu2 %v3312_v45 }
 0x32e   : > { %v5430_v48 = vpop.f32.mrf.mxu3 }
 0x32f   : > { %6044 = vst [vmem:[#allocation42_spill] sm:$0xff] %v5430_v48  ;;  %v2188_v48 = vadd.f32 %v2187_v11, %v2123_v19  ;;  %v5451_v11 = vpop.f32.mrf.mxu2  ;;  %v3314_v19 = vld [vmem:[%s4010_s5 + $0x28] sm:$0xff] }
 0x331   : > { %v2253_v27 = vadd.f32 %v5394_v46, %v2188_v48  ;;  %v2256_v46 = vadd.f32 %v5406_v51, %v2191_v54  ;;  %v5456_v48 = vpop.f32.mrf.mxu0  ;;  %v2132_v51 = vadd.f32 %v5418_v56, %v5336_v30 }
 0x333   : > { %2361 = vmatmul.f32.gmra.mxu3 %v1631_v20  ;;  %v2199_v57 = vpop.f32.mrf.mxu1 }
 0x334   : > { %2479 = vmatmul.f32.gmra.mxu0 %v3313_v32 }
 0x335   : > { %2609 = vmatmul.f32.gmra.mxu2 %v3313_v32  ;;  %v2197_v32 = vadd.f32 %v2196_v17, %v2132_v51  ;;  %v3317_v51 = vld [vmem:[%s4010_s5 + $0x40] sm:$0xff] }
 0x336   : > { %v5440_v0 = vpop.f32.mrf.mxu3 }
 0x337   : > { %6045 = vst [vmem:[#allocation67_spill] sm:$0xff] %v5440_v0 }
 0x339   : > { %v5465_v54 = vpop.f32.mrf.mxu0 }
 0x33b   : > { %v2202_v12 = vpop.f32.mrf.mxu1 }
 0x33c   : > { %2482 = vmatmul.f32.gmra.mxu0 %v3314_v19 }
 0x33d   : > { %2612 = vmatmul.f32.gmra.mxu2 %v3314_v19 }
 0x33e   : > { %v2317_v55 = vpop.f32.mrf.mxu3 }
 0x33f   : > { %v2318_v20 = vadd.f32 %v2317_v55, %v2253_v27  ;;  %v5462_v55 = vpop.f32.mrf.mxu2 }
 0x341   : > { %v2365_v0 = vmax.f32 %v2318_v20, 0.0  ;;  %v3315_v20 = vld [vmem:[%s4010_s5 + $0x30] sm:$0xff] }
 0x343   : > { %2532 = vmatmul.f32.vlgmr.msrb.gmra.mxu1 %v2365_v0  ;;  %2662 = vmatmul.f32.vlgmr.msrb.gmra.mxu3 %v2365_v0  ;;  %v2259_v0 = vadd.f32 %v5414_v43, %v2194_v6  ;;  %v2135_v43 = vadd.f32 %v2134_v9, %v5347_v50  ;;  %v2205_v14 = vpop.f32.mrf.mxu1  ;;  %v5472_v6 = vpop.f32.mrf.mxu0  ;;  %v2138_v50 = vadd.f32 %v5436_v28, %v5354_v39 }
 0x344   : > { %2485 = vmatmul.f32.gmra.mxu0 %v3315_v20  ;;  %v2141_v39 = vadd.f32 %v5448_v52, %v5365_v63 }
 0x345   : > { %2615 = vmatmul.f32.gmra.mxu2 %v3315_v20  ;;  %v2200_v19 = vadd.f32 %v2199_v57, %v2135_v43  ;;  %v5483_v20 = vld [vmem:[%s6003_s3] ss:$0 sm:$0xff]  ;;  %v3319_v43 = vld [vmem:[%s4010_s5 + $0x48] sm:$0xff] }
 0x346   : > { %v2320_v4 = vpop.f32.mrf.mxu3 }
 0x347   : > { %v2321_v27 = vadd.f32 %v2320_v4, %v2256_v46  ;;  %v2262_v46 = vadd.f32 %v5423_v60, %v2197_v32  ;;  %v5469_v56 = vpop.f32.mrf.mxu2 }
 0x349   : > { %v2366_v45 = vmax.f32 %v2321_v27, 0.0  ;;  %v3316_v27 = vld [vmem:[%s4010_s5 + $0x38] sm:$0xff] }
 0x34b   : > { %2535 = vmatmul.f32.gmra.mxu1 %v2366_v45  ;;  %2665 = vmatmul.f32.gmra.mxu3 %v2366_v45  ;;  %v2265_v45 = vadd.f32 %v5432_v29, %v2200_v19  ;;  %v1822_v29 = vadd.f32 %v5483_v20, %v5241_v25 }
 0x34c   : > { %2488 = vmatmul.f32.gmra.mxu0 %v3316_v27 }
 0x34d   : > { %2618 = vmatmul.f32.gmra.mxu2 %v3316_v27 }
 0x34e   : > { %v2323_v18 = vpop.f32.mrf.mxu3 }
 0x34f   : > { %v2324_v5 = vadd.f32 %v2323_v18, %v2259_v0  ;;  %v2208_v0 = vpop.f32.mrf.mxu1  ;;  %v2203_v18 = vadd.f32 %v2202_v12, %v2138_v50  ;;  %v5490_v12 = vpop.f32.mrf.mxu0  ;;  %v3320_v50 = vld [vmem:[%s4010_s5 + $0x50] sm:$0xff] }
 0x351   : > { %v2367_v37 = vmax.f32 %v2324_v5, 0.0  ;;  %v5478_v5 = vpop.f32.mrf.mxu2  ;;  %v2268_v28 = vadd.f32 %v5443_v53, %v2203_v18  ;;  %v1825_v53 = vadd.f32 %v5483_v20, %v5249_v34 }
 0x353   : > { %2538 = vmatmul.f32.gmra.mxu1 %v2367_v37  ;;  %2668 = vmatmul.f32.gmra.mxu3 %v2367_v37  ;;  %v1887_v37 = vadd.f32 %v5293_v10, %v1822_v29  ;;  %v2144_v10 = vadd.f32 %v5456_v48, %v5376_v21  ;;  %v1828_v21 = vadd.f32 %v5483_v20, %v5259_v26  ;;  %v3321_v29 = vld [vmem:[%s4010_s5 + $0x58] sm:$0xff] }
 0x354   : > { %2491 = vmatmul.f32.gmra.mxu0 %v3317_v51 }
 0x355   : > { %2621 = vmatmul.f32.gmra.mxu2 %v3317_v51  ;;  %v1952_v25 = vadd.f32 %v5320_v49, %v1887_v37  ;;  %v2209_v34 = vadd.f32 %v2208_v0, %v2144_v10 }
 0x356   : > { %v2326_v30 = vpop.f32.mrf.mxu3 }
 0x357   : > { %v2327_v4 = vadd.f32 %v2326_v30, %v2262_v46  ;;  %v2206_v30 = vadd.f32 %v2205_v14, %v2141_v39  ;;  %v2211_v27 = vpop.f32.mrf.mxu1  ;;  %v2017_v14 = vadd.f32 %v5300_v15, %v1952_v25 }
 0x359   : > { %v2368_v17 = vmax.f32 %v2327_v4, 0.0  ;;  %v5497_v19 = vpop.f32.mrf.mxu2  ;;  %v2271_v63 = vadd.f32 %v5451_v11, %v2206_v30 }
 0x35b   : > { %2541 = vmatmul.f32.gmra.mxu1 %v2368_v17  ;;  %2671 = vmatmul.f32.gmra.mxu3 %v2368_v17  ;;  %v1890_v17 = vadd.f32 %v5304_v1, %v1825_v53  ;;  %v2274_v1 = vadd.f32 %v5462_v55, %v2209_v34 }
 0x35c   : > { %2494 = vmatmul.f32.gmra.mxu0 %v3319_v43 }
 0x35d   : > { %2624 = vmatmul.f32.gmra.mxu2 %v3319_v43  ;;  %v1955_v11 = vadd.f32 %v5331_v59, %v1890_v17 }
 0x35e   : > { %v2329_v60 = vpop.f32.mrf.mxu3 }
 0x35f   : > { %v2330_v9 = vadd.f32 %v2329_v60, %v2265_v45  ;;  %v5504_v45 = vpop.f32.mrf.mxu0  ;;  %v2082_v60 = vadd.f32 %v5384_v62, %v2017_v14  ;;  %v2214_v15 = vpop.f32.mrf.mxu1  ;;  %v2020_v18 = vadd.f32 %v5311_v36, %v1955_v11  ;;  %v1893_v62 = vadd.f32 %v5313_v33, %v1828_v21  ;;  %v3323_v14 = vld [vmem:[%s4010_s5 + $0x68] sm:$0xff]  ;;  %v3324_v11 = vld [vmem:[%s4010_s5 + $0x70] sm:$0xff] }
 0x361   : > { %v2369_v57 = vmax.f32 %v2330_v9, 0.0  ;;  %v2147_v48 = vadd.f32 %v5465_v54, %v2082_v60  ;;  %v5513_v51 = vpop.f32.mrf.mxu2  ;;  %v2085_v26 = vadd.f32 %v5392_v38, %v2020_v18  ;;  %v1958_v55 = vadd.f32 %v5342_v40, %v1893_v62 }
 0x362   : > { %v1831_v54 = vadd.f32 %v5483_v20, %v5269_v16 }
 0x363   : > { %2544 = vmatmul.f32.gmra.mxu1 %v2369_v57  ;;  %2674 = vmatmul.f32.gmra.mxu3 %v2369_v57  ;;  %v2212_v59 = vadd.f32 %v2211_v27, %v2147_v48  ;;  %v2150_v33 = vadd.f32 %v5472_v6, %v2085_v26  ;;  %v2023_v38 = vadd.f32 %v5322_v24, %v1958_v55 }
 0x364   : > { %2497 = vmatmul.f32.gmra.mxu0 %v3320_v50  ;;  %v1834_v6 = vadd.f32 %v5483_v20, %v5278_v23 }
 0x365   : > { %2627 = vmatmul.f32.gmra.mxu2 %v3320_v50  ;;  %v2277_v36 = vadd.f32 %v5469_v56, %v2212_v59  ;;  %v2215_v40 = vadd.f32 %v2214_v15, %v2150_v33  ;;  %v2088_v16 = vadd.f32 %v5400_v2, %v2023_v38  ;;  %v6047_v59 = vld [vmem:[#allocation86_spill] sm:$0xff] }
 0x366   : > { %v2332_v32 = vpop.f32.mrf.mxu3  ;;  %v1899_v10 = vadd.f32 %v5340_v58, %v1834_v6 }
 0x367   : > { %v2333_v46 = vadd.f32 %v2332_v32, %v2268_v28  ;;  %v5519_v28 = vpop.f32.mrf.mxu0  ;;  %v2217_v32 = vpop.f32.mrf.mxu1  ;;  %v2280_v24 = vadd.f32 %v5478_v5, %v2215_v40 }
 0x368   : > { %v1964_v5 = vadd.f32 %v5369_v13, %v1899_v10  ;;  %v6054_v10 = vld [vmem:[#allocation75_spill] sm:$0xff] }
 0x369   : > { %v2370_v4 = vmax.f32 %v2333_v46, 0.0  ;;  %v1896_v46 = vadd.f32 %v5324_v41, %v1831_v54  ;;  %v5528_v43 = vpop.f32.mrf.mxu2  ;;  %v2153_v41 = vadd.f32 %v5490_v12, %v2088_v16  ;;  %v1837_v12 = vadd.f32 %v5483_v20, %v5284_v7  ;;  %v6049_v54 = vld [vmem:[#allocation72_spill] sm:$0xff] }
 0x36a   : > { %v2029_v60 = vadd.f32 %v5344_v44, %v1964_v5 }
 0x36b   : > { %2547 = vmatmul.f32.gmra.mxu1 %v2370_v4  ;;  %2677 = vmatmul.f32.gmra.mxu3 %v2370_v4  ;;  %v3322_v4 = vld [vmem:[%s4010_s5 + $0x60] sm:$0xff]  ;;  %v1961_v56 = vadd.f32 %v5356_v61, %v1896_v46  ;;  %v2218_v61 = vadd.f32 %v2217_v32, %v2153_v41  ;;  %v6051_v46 = vld [vmem:[#allocation74_spill] sm:$0xff] }
 0x36c   : > { %2500 = vmatmul.f32.gmra.mxu0 %v3321_v29  ;;  %v2094_v13 = vadd.f32 %v5416_v31, %v2029_v60  ;;  %v6046_v31 = vld [vmem:[#allocation54_spill] sm:$0xff] }
 0x36d   : > { %2630 = vmatmul.f32.gmra.mxu2 %v3321_v29  ;;  %v3325_v29 = vld [vmem:[%s4010_s5 + $0x78] sm:$0xff] }
 0x36e   : > { %v2335_v52 = vpop.f32.mrf.mxu3 }
 0x36f   : > { %v2336_v49 = vadd.f32 %v2335_v52, %v2271_v63  ;;  %v2161_v25 = vpop.f32.mrf.mxu0  ;;  %v2026_v63 = vadd.f32 %v5333_v8, %v1961_v56  ;;  %v2220_v52 = vpop.f32.mrf.mxu1  ;;  %v2283_v8 = vadd.f32 %v5497_v19, %v2218_v61 }
 0x371   : > { %v2371_v9 = vmax.f32 %v2336_v49, 0.0  ;;  %v2091_v23 = vadd.f32 %v5410_v3, %v2026_v63  ;;  %v2291_v17 = vpop.f32.mrf.mxu2  ;;  %v1902_v3 = vadd.f32 %v5351_v35, %v1837_v12  ;;  %v2159_v35 = vadd.f32 %v5519_v28, %v2094_v13  ;;  %v2445_v13 = vld [vmem:[%s6056_s4] sm:$0x3] }
 0x373   : > { %2550 = vmatmul.f32.gmra.mxu1 %v2371_v9  ;;  %2680 = vmatmul.f32.gmra.mxu3 %v2371_v9  ;;  %v2156_v58 = vadd.f32 %v5504_v45, %v2091_v23  ;;  %v1967_v19 = vadd.f32 %v5380_v42, %v1902_v3  ;;  %v1840_v45 = vadd.f32 %v5483_v20, %v5290_v22  ;;  %v6055_v23 = vld [vmem:[#allocation67_spill] sm:$0xff] }
 0x374   : > { %2503 = vmatmul.f32.gmra.mxu0 %v3322_v4 }
 0x375   : > { %2633 = vmatmul.f32.gmra.mxu2 %v3322_v4  ;;  %v2221_v21 = vadd.f32 %v2220_v52, %v2156_v58  ;;  %v1905_v18 = vadd.f32 %v6046_v31, %v1840_v45  ;;  %v5572_v45 = vperm.slane %v2445_v13, 0 }
 0x376   : > { %v2338_v0 = vpop.f32.mrf.mxu3 }
 0x377   : > { %v2339_v57 = vadd.f32 %v2338_v0, %v2274_v1  ;;  %v2164_v50 = vpop.f32.mrf.mxu0  ;;  %v2223_v15 = vpop.f32.mrf.mxu1  ;;  %v2286_v44 = vadd.f32 %v5513_v51, %v2221_v21  ;;  %v2032_v0 = vadd.f32 %v5360_v47, %v1967_v19  ;;  %v1843_v51 = vadd.f32 %v5483_v20, %v6049_v54 }
 0x378   : > { %v2224_v42 = vadd.f32 %v2223_v15, %v2159_v35  ;;  %v5576_v35 = vperm.slane %v2445_v13, 1 }
 0x379   : > { %v2372_v39 = vmax.f32 %v2339_v57, 0.0  ;;  %v2294_v1 = vpop.f32.mrf.mxu2  ;;  %v2097_v26 = vadd.f32 %v6047_v59, %v2032_v0 }
 0x37a   : > { %v2289_v47 = vadd.f32 %v5528_v43, %v2224_v42 }
 0x37b   : > { %2553 = vmatmul.f32.gmra.mxu1 %v2372_v39  ;;  %2683 = vmatmul.f32.gmra.mxu3 %v2372_v39  ;;  %v6048_v39 = vld [vmem:[#allocation85_spill] sm:$0xff] }
 0x37c   : > { %2506 = vmatmul.f32.gmra.mxu0 %v3323_v14  ;;  %v1970_v55 = vadd.f32 %v6048_v39, %v1905_v18 }
 0x37d   : > { %2636 = vmatmul.f32.gmra.mxu2 %v3323_v14 }
 0x37e   : > { %v2341_v37 = vpop.f32.mrf.mxu3 }
 0x37f   : > { %v2342_v30 = vadd.f32 %v2341_v37, %v2277_v36  ;;  %v2167_v62 = vpop.f32.mrf.mxu0  ;;  %v2226_v28 = vpop.f32.mrf.mxu1  ;;  %v2162_v36 = vadd.f32 %v2161_v25, %v2097_v26  ;;  %v6050_v37 = vld [vmem:[#allocation81_spill] sm:$0xff] }
 0x380   : > { %v2035_v38 = vadd.f32 %v6050_v37, %v1970_v55 }
 0x381   : > { %v2373_v27 = vmax.f32 %v2342_v30, 0.0  ;;  %v2297_v33 = vpop.f32.mrf.mxu2  ;;  %v1908_v30 = vadd.f32 %v6051_v46, %v1843_v51  ;;  %v2227_v16 = vadd.f32 %v2226_v28, %v2162_v36 }
 0x383   : > { %2556 = vmatmul.f32.gmra.mxu1 %v2373_v27  ;;  %2686 = vmatmul.f32.gmra.mxu3 %v2373_v27  ;;  %v6052_v27 = vld [vmem:[#allocation42_spill] sm:$0xff]  ;;  %v2292_v41 = vadd.f32 %v2291_v17, %v2227_v16 }
 0x384   : > { %2509 = vmatmul.f32.gmra.mxu0 %v3324_v11  ;;  %v2100_v56 = vadd.f32 %v6052_v27, %v2035_v38 }
 0x385   : > { %2639 = vmatmul.f32.gmra.mxu2 %v3324_v11 }
 0x386   : > { %v2344_v53 = vpop.f32.mrf.mxu3 }
 0x387   : > { %v2345_v2 = vadd.f32 %v2344_v53, %v2280_v24  ;;  %v2468_v40 = vpop.f32.mrf.mxu0  ;;  %v6053_v24 = vld [vmem:[#allocation77_spill] sm:$0xff]  ;;  %v2165_v53 = vadd.f32 %v2164_v50, %v2100_v56  ;;  %v2229_v25 = vpop.f32.mrf.mxu1 }
 0x388   : > { %v1973_v20 = vadd.f32 %v6053_v24, %v1908_v30 }
 0x389   : > { %v2374_v49 = vmax.f32 %v2345_v2, 0.0  ;;  %v2230_v61 = vadd.f32 %v2229_v25, %v2165_v53 }
 0x38a   : > { %v2038_v2 = vadd.f32 %v6054_v10, %v1973_v20 }
 0x38b   : > { %2559 = vmatmul.f32.gmra.mxu1 %v2374_v49  ;;  %2689 = vmatmul.f32.gmra.mxu3 %v2374_v49  ;;  %v2295_v12 = vadd.f32 %v2294_v1, %v2230_v61 }
 0x38c   : > { %2512 = vmatmul.f32.gmra.mxu0 %v3325_v29  ;;  %v2103_v49 = vadd.f32 %v6055_v23, %v2038_v2 }
 0x38d   : > { %2642 = vmatmul.f32.gmra.mxu2 %v3325_v29 }
 0x38e   : > { %v2347_v34 = vpop.f32.mrf.mxu3 }
 0x38f   : > { %v2348_v9 = vadd.f32 %v2347_v34, %v2283_v8  ;;  %v2471_v14 = vpop.f32.mrf.mxu0  ;;  %v2168_v8 = vadd.f32 %v2167_v62, %v2103_v49  ;;  %v2232_v17 = vpop.f32.mrf.mxu1 }
 0x390   : > { %v2472_v29 = vadd.f32 %v2471_v14, %v5572_v45 }
 0x391   : > { %v2375_v7 = vmax.f32 %v2348_v9, 0.0  ;;  %v2233_v3 = vadd.f32 %v2232_v17, %v2168_v8 }
 0x393   : > { %2562 = vmatmul.f32.gmra.mxu1 %v2375_v7  ;;  %2692 = vmatmul.f32.gmra.mxu3 %v2375_v7  ;;  %v2298_v11 = vadd.f32 %v2297_v33, %v2233_v3 }
 0x396   : > { %v2350_v48 = vpop.f32.mrf.mxu3 }
 0x397   : > { %v2351_v57 = vadd.f32 %v2350_v48, %v2286_v44  ;;  %v2469_v44 = vadd.f32 %v2468_v40, %v5572_v45 }
 0x398   : > { %v2598_v43 = vpop.f32.mrf.mxu2 }
 0x399   : > { %v2376_v22 = vmax.f32 %v2351_v57, 0.0  ;;  %v2599_v62 = vadd.f32 %v2598_v43, %v5576_v35 }
 0x39b   : > { %2565 = vmatmul.f32.gmra.mxu1 %v2376_v22  ;;  %2695 = vmatmul.f32.gmra.mxu3 %v2376_v22 }
 0x39e   : > { %v2353_v32 = vpop.f32.mrf.mxu3 }
 0x39f   : > { %v2354_v4 = vadd.f32 %v2353_v32, %v2289_v47 }
 0x3a0   : > { %v2601_v58 = vpop.f32.mrf.mxu2 }
 0x3a1   : > { %v2377_v6 = vmax.f32 %v2354_v4, 0.0  ;;  %v2474_v50 = vpop.f32.mrf.mxu0  ;;  %v2602_v51 = vadd.f32 %v2601_v58, %v5576_v35 }
 0x3a2   : > { %v2475_v28 = vadd.f32 %v2474_v50, %v5572_v45 }
 0x3a3   : > { %2568 = vmatmul.f32.gmra.mxu1 %v2377_v6  ;;  %2698 = vmatmul.f32.gmra.mxu3 %v2377_v6 }
 0x3a6   : > { %v2356_v63 = vpop.f32.mrf.mxu3 }
 0x3a7   : > { %v2357_v52 = vadd.f32 %v2356_v63, %v2292_v41 }
 0x3a8   : > { %v2604_v7 = vpop.f32.mrf.mxu2 }
 0x3a9   : > { %v2378_v5 = vmax.f32 %v2357_v52, 0.0  ;;  %v2477_v1 = vpop.f32.mrf.mxu0  ;;  %v2605_v30 = vadd.f32 %v2604_v7, %v5576_v35 }
 0x3aa   : > { %v2478_v40 = vadd.f32 %v2477_v1, %v5572_v45 }
 0x3ab   : > { %2571 = vmatmul.f32.gmra.mxu1 %v2378_v5  ;;  %2701 = vmatmul.f32.gmra.mxu3 %v2378_v5 }
 0x3ae   : > { %v2359_v34 = vpop.f32.mrf.mxu3 }
 0x3af   : > { %v2360_v60 = vadd.f32 %v2359_v34, %v2295_v12 }
 0x3b0   : > { %v2607_v0 = vpop.f32.mrf.mxu2 }
 0x3b1   : > { %v2379_v9 = vmax.f32 %v2360_v60, 0.0  ;;  %v2480_v57 = vpop.f32.mrf.mxu0  ;;  %v2608_v53 = vadd.f32 %v2607_v0, %v5576_v35 }
 0x3b2   : > { %v2481_v43 = vadd.f32 %v2480_v57, %v5572_v45 }
 0x3b3   : > { %2574 = vmatmul.f32.gmra.mxu1 %v2379_v9  ;;  %2704 = vmatmul.f32.gmra.mxu3 %v2379_v9 }
 0x3b6   : > { %v2362_v21 = vpop.f32.mrf.mxu3 }
 0x3b7   : > { %v2363_v15 = vadd.f32 %v2362_v21, %v2298_v11 }
 0x3b8   : > { %v2610_v55 = vpop.f32.mrf.mxu2 }
 0x3b9   : > { %v2380_v19 = vmax.f32 %v2363_v15, 0.0  ;;  %v2483_v36 = vpop.f32.mrf.mxu0  ;;  %v2611_v49 = vadd.f32 %v2610_v55, %v5576_v35 }
 0x3ba   : > { %v2484_v5 = vadd.f32 %v2483_v36, %v5572_v45 }
 0x3bb   : > { %2577 = vmatmul.f32.gmra.mxu1 %v2380_v19  ;;  %2707 = vmatmul.f32.gmra.mxu3 %v2380_v19 }
 0x3c0   : > { %v2533_v48 = vpop.f32.mrf.mxu1  ;;  %v2613_v4 = vpop.f32.mrf.mxu2 }
 0x3c1   : > { %v2534_v31 = vadd.f32 %v2533_v48, %v2469_v44  ;;  %v2486_v6 = vpop.f32.mrf.mxu0  ;;  %v2614_v3 = vadd.f32 %v2613_v4, %v5576_v35 }
 0x3c2   : > { %v2487_v11 = vadd.f32 %v2486_v6, %v5572_v45 }
 0x3c3   : > { %v2711_v18 = vmax.f32 %v2534_v31, 0.0 }
 0x3c5   : > { %2743 = vst [vmem:[%s5579_s11] sm:$0xff] %v2711_v18 }
 0x3c6   : > { %v2663_v42 = vpop.f32.mrf.mxu3 }
 0x3c7   : > { %v2664_v59 = vadd.f32 %v2663_v42, %v2599_v62 }
 0x3c8   : > { %v2536_v26 = vpop.f32.mrf.mxu1  ;;  %v2616_v63 = vpop.f32.mrf.mxu2 }
 0x3c9   : > { %v2712_v22 = vmax.f32 %v2664_v59, 0.0  ;;  %v2537_v39 = vadd.f32 %v2536_v26, %v2472_v29  ;;  %v2489_v61 = vpop.f32.mrf.mxu0  ;;  %v2617_v48 = vadd.f32 %v2616_v63, %v5576_v35 }
 0x3ca   : > { %v2490_v0 = vadd.f32 %v2489_v61, %v5572_v45 }
 0x3cb   : > { %2744 = vst [vmem:[%s5579_s11 + $0x8] sm:$0xff] %v2712_v22  ;;  %v2713_v54 = vmax.f32 %v2537_v39, 0.0 }
 0x3cd   : > { %2745 = vst [vmem:[%s5579_s11 + $0x10] sm:$0xff] %v2713_v54 }
 0x3ce   : > { %v2666_v47 = vpop.f32.mrf.mxu3 }
 0x3cf   : > { %v2667_v33 = vadd.f32 %v2666_v47, %v2602_v51 }
 0x3d0   : > { %v2539_v32 = vpop.f32.mrf.mxu1  ;;  %v2619_v34 = vpop.f32.mrf.mxu2 }
 0x3d1   : > { %v2714_v37 = vmax.f32 %v2667_v33, 0.0  ;;  %v2540_v38 = vadd.f32 %v2539_v32, %v2475_v28  ;;  %v2492_v9 = vpop.f32.mrf.mxu0  ;;  %v2620_v26 = vadd.f32 %v2619_v34, %v5576_v35 }
 0x3d2   : > { %v2493_v39 = vadd.f32 %v2492_v9, %v5572_v45 }
 0x3d3   : > { %2746 = vst [vmem:[%s5579_s11 + $0x18] sm:$0xff] %v2714_v37  ;;  %v2715_v46 = vmax.f32 %v2540_v38, 0.0 }
 0x3d5   : > { %2747 = vst [vmem:[%s5579_s11 + $0x20] sm:$0xff] %v2715_v46 }
 0x3d6   : > { %v2669_v16 = vpop.f32.mrf.mxu3 }
 0x3d7   : > { %v2670_v27 = vadd.f32 %v2669_v16, %v2605_v30 }
 0x3d8   : > { %v2542_v56 = vpop.f32.mrf.mxu1  ;;  %v2622_v1 = vpop.f32.mrf.mxu2 }
 0x3d9   : > { %v2716_v24 = vmax.f32 %v2670_v27, 0.0  ;;  %v2543_v20 = vadd.f32 %v2542_v56, %v2478_v40  ;;  %v2495_v18 = vpop.f32.mrf.mxu0  ;;  %v2623_v32 = vadd.f32 %v2622_v1, %v5576_v35 }
 0x3da   : > { %v2496_v37 = vadd.f32 %v2495_v18, %v5572_v45 }
 0x3db   : > { %2748 = vst [vmem:[%s5579_s11 + $0x28] sm:$0xff] %v2716_v24  ;;  %v2717_v41 = vmax.f32 %v2543_v20, 0.0 }
 0x3dd   : > { %2749 = vst [vmem:[%s5579_s11 + $0x30] sm:$0xff] %v2717_v41 }
 0x3de   : > { %v2672_v25 = vpop.f32.mrf.mxu3 }
 0x3df   : > { %v2673_v10 = vadd.f32 %v2672_v25, %v2608_v53 }
 0x3e0   : > { %v2545_v2 = vpop.f32.mrf.mxu1  ;;  %v2625_v22 = vpop.f32.mrf.mxu2 }
 0x3e1   : > { %v2718_v52 = vmax.f32 %v2673_v10, 0.0  ;;  %v2546_v14 = vadd.f32 %v2545_v2, %v2481_v43  ;;  %v2498_v28 = vpop.f32.mrf.mxu0  ;;  %v2626_v6 = vadd.f32 %v2625_v22, %v5576_v35 }
 0x3e2   : > { %v2499_v24 = vadd.f32 %v2498_v28, %v5572_v45 }
 0x3e3   : > { %2750 = vst [vmem:[%s5579_s11 + $0x38] sm:$0xff] %v2718_v52  ;;  %v2719_v23 = vmax.f32 %v2546_v14, 0.0 }
 0x3e5   : > { %2751 = vst [vmem:[%s5579_s11 + $0x40] sm:$0xff] %v2719_v23 }
 0x3e6   : > { %v2675_v12 = vpop.f32.mrf.mxu3 }
 0x3e7   : > { %v2676_v8 = vadd.f32 %v2675_v12, %v2611_v49 }
 0x3e8   : > { %v2548_v58 = vpop.f32.mrf.mxu1  ;;  %v2628_v46 = vpop.f32.mrf.mxu2 }
 0x3e9   : > { %v2720_v60 = vmax.f32 %v2676_v8, 0.0  ;;  %v2549_v17 = vadd.f32 %v2548_v58, %v2484_v5  ;;  %v2501_v27 = vpop.f32.mrf.mxu0  ;;  %v2629_v2 = vadd.f32 %v2628_v46, %v5576_v35 }
 0x3ea   : > { %v2502_v14 = vadd.f32 %v2501_v27, %v5572_v45 }
 0x3eb   : > { %2752 = vst [vmem:[%s5579_s11 + $0x48] sm:$0xff] %v2720_v60  ;;  %v2721_v50 = vmax.f32 %v2549_v17, 0.0 }
 0x3ed   : > { %2753 = vst [vmem:[%s5579_s11 + $0x50] sm:$0xff] %v2721_v50 }
 0x3ee   : > { %v2678_v21 = vpop.f32.mrf.mxu3 }
 0x3ef   : > { %v2679_v13 = vadd.f32 %v2678_v21, %v2614_v3 }
 0x3f0   : > { %v2551_v7 = vpop.f32.mrf.mxu1  ;;  %v2631_v43 = vpop.f32.mrf.mxu2 }
 0x3f1   : > { %v2722_v15 = vmax.f32 %v2679_v13, 0.0  ;;  %v2552_v19 = vadd.f32 %v2551_v7, %v2487_v11  ;;  %v2504_v52 = vpop.f32.mrf.mxu0  ;;  %v2632_v34 = vadd.f32 %v2631_v43, %v5576_v35 }
 0x3f2   : > { %v2505_v60 = vadd.f32 %v2504_v52, %v5572_v45 }
 0x3f3   : > { %2754 = vst [vmem:[%s5579_s11 + $0x58] sm:$0xff] %v2722_v15  ;;  %v2723_v44 = vmax.f32 %v2552_v19, 0.0 }
 0x3f5   : > { %2755 = vst [vmem:[%s5579_s11 + $0x60] sm:$0xff] %v2723_v44 }
 0x3f6   : > { %v2681_v31 = vpop.f32.mrf.mxu3 }
 0x3f7   : > { %v2682_v62 = vadd.f32 %v2681_v31, %v2617_v48 }
 0x3f8   : > { %v2554_v57 = vpop.f32.mrf.mxu1  ;;  %v2634_v8 = vpop.f32.mrf.mxu2 }
 0x3f9   : > { %v2724_v29 = vmax.f32 %v2682_v62, 0.0  ;;  %v2555_v42 = vadd.f32 %v2554_v57, %v2490_v0  ;;  %v2507_v50 = vpop.f32.mrf.mxu0  ;;  %v2635_v7 = vadd.f32 %v2634_v8, %v5576_v35 }
 0x3fa   : > { %v2508_v19 = vadd.f32 %v2507_v50, %v5572_v45 }
 0x3fb   : > { %2756 = vst [vmem:[%s5579_s11 + $0x68] sm:$0xff] %v2724_v29  ;;  %v2725_v59 = vmax.f32 %v2555_v42, 0.0 }
 0x3fd   : > { %2757 = vst [vmem:[%s5579_s11 + $0x70] sm:$0xff] %v2725_v59 }
 0x3fe   : > { %v2684_v55 = vpop.f32.mrf.mxu3 }
 0x3ff   : > { %v2685_v54 = vadd.f32 %v2684_v55, %v2620_v26 }
 0x400   : > { %v2557_v51 = vpop.f32.mrf.mxu1  ;;  %v2637_v15 = vpop.f32.mrf.mxu2 }
 0x401   : > { %v2726_v47 = vmax.f32 %v2685_v54, 0.0  ;;  %v2558_v36 = vadd.f32 %v2557_v51, %v2493_v39  ;;  %v2510_v0 = vpop.f32.mrf.mxu0  ;;  %v2638_v57 = vadd.f32 %v2637_v15, %v5576_v35 }
 0x402   : > { %v2511_v29 = vadd.f32 %v2510_v0, %v5572_v45 }
 0x403   : > { %2758 = vst [vmem:[%s5579_s11 + $0x78] sm:$0xff] %v2726_v47  ;;  %v2727_v33 = vmax.f32 %v2558_v36, 0.0 }
 0x405   : > { %2759 = vst [vmem:[%s5579_s11 + $0x80] sm:$0xff] %v2727_v33 }
 0x406   : > { %v2687_v38 = vpop.f32.mrf.mxu3 }
 0x407   : > { %v2688_v30 = vadd.f32 %v2687_v38, %v2623_v32 }
 0x408   : > { %v2560_v4 = vpop.f32.mrf.mxu1  ;;  %v2640_v59 = vpop.f32.mrf.mxu2 }
 0x409   : > { %v2728_v40 = vmax.f32 %v2688_v30, 0.0  ;;  %v2561_v16 = vadd.f32 %v2560_v4, %v2496_v37  ;;  %v2513_v54 = vpop.f32.mrf.mxu0  ;;  %v2641_v28 = vadd.f32 %v2640_v59, %v5576_v35 }
 0x40a   : > { %v2514_v47 = vadd.f32 %v2513_v54, %v5572_v45 }
 0x40b   : > { %2760 = vst [vmem:[%s5579_s11 + $0x88] sm:$0xff] %v2728_v40  ;;  %v2729_v56 = vmax.f32 %v2561_v16, 0.0 }
 0x40d   : > { %2761 = vst [vmem:[%s5579_s11 + $0x90] sm:$0xff] %v2729_v56 }
 0x40e   : > { %v2690_v20 = vpop.f32.mrf.mxu3 }
 0x40f   : > { %v2691_v41 = vadd.f32 %v2690_v20, %v2626_v6 }
 0x410   : > { %v2563_v53 = vpop.f32.mrf.mxu1  ;;  %v2643_v37 = vpop.f32.mrf.mxu2 }
 0x411   : > { %v2730_v25 = vmax.f32 %v2691_v41, 0.0  ;;  %v2564_v63 = vadd.f32 %v2563_v53, %v2499_v24  ;;  %v2644_v4 = vadd.f32 %v2643_v37, %v5576_v35 }
 0x413   : > { %2762 = vst [vmem:[%s5579_s11 + $0x98] sm:$0xff] %v2730_v25  ;;  %v2731_v10 = vmax.f32 %v2564_v63, 0.0 }
 0x415   : > { %2763 = vst [vmem:[%s5579_s11 + $0xa0] sm:$0xff] %v2731_v10 }
 0x416   : > { %v2693_v61 = vpop.f32.mrf.mxu3 }
 0x417   : > { %v2694_v23 = vadd.f32 %v2693_v61, %v2629_v2 }
 0x418   : > { %v2566_v49 = vpop.f32.mrf.mxu1 }
 0x419   : > { %v2732_v5 = vmax.f32 %v2694_v23, 0.0  ;;  %v2567_v12 = vadd.f32 %v2566_v49, %v2502_v14 }
 0x41b   : > { %2764 = vst [vmem:[%s5579_s11 + $0xa8] sm:$0xff] %v2732_v5  ;;  %v2733_v58 = vmax.f32 %v2567_v12, 0.0 }
 0x41d   : > { %2765 = vst [vmem:[%s5579_s11 + $0xb0] sm:$0xff] %v2733_v58 }
 0x41e   : > { %v2696_v17 = vpop.f32.mrf.mxu3 }
 0x41f   : > { %v2697_v3 = vadd.f32 %v2696_v17, %v2632_v34 }
 0x420   : > { %v2569_v9 = vpop.f32.mrf.mxu1 }
 0x421   : > { %v2734_v11 = vmax.f32 %v2697_v3, 0.0  ;;  %v2570_v21 = vadd.f32 %v2569_v9, %v2505_v60 }
 0x423   : > { %2766 = vst [vmem:[%s5579_s11 + $0xb8] sm:$0xff] %v2734_v11  ;;  %v2735_v13 = vmax.f32 %v2570_v21, 0.0 }
 0x425   : > { %2767 = vst [vmem:[%s5579_s11 + $0xc0] sm:$0xff] %v2735_v13 }
 0x426   : > { %v2699_v1 = vpop.f32.mrf.mxu3 }
 0x427   : > { %v2700_v44 = vadd.f32 %v2699_v1, %v2635_v7 }
 0x428   : > { %v2572_v48 = vpop.f32.mrf.mxu1 }
 0x429   : > { %v2736_v31 = vmax.f32 %v2700_v44, 0.0  ;;  %v2573_v18 = vadd.f32 %v2572_v48, %v2508_v19 }
 0x42b   : > { %2768 = vst [vmem:[%s5579_s11 + $0xc8] sm:$0xff] %v2736_v31  ;;  %v2737_v62 = vmax.f32 %v2573_v18, 0.0 }
 0x42d   : > { %2769 = vst [vmem:[%s5579_s11 + $0xd0] sm:$0xff] %v2737_v62 }
 0x42e   : > { %v2702_v42 = vpop.f32.mrf.mxu3 }
 0x42f   : > { %v2703_v26 = vadd.f32 %v2702_v42, %v2638_v57 }
 0x430   : > { %v2575_v22 = vpop.f32.mrf.mxu1 }
 0x431   : > { %v2738_v39 = vmax.f32 %v2703_v26, 0.0  ;;  %v2576_v55 = vadd.f32 %v2575_v22, %v2511_v29 }
 0x433   : > { %2770 = vst [vmem:[%s5579_s11 + $0xd8] sm:$0xff] %v2738_v39  ;;  %v2739_v51 = vmax.f32 %v2576_v55, 0.0 }
 0x435   : > { %2771 = vst [vmem:[%s5579_s11 + $0xe0] sm:$0xff] %v2739_v51 }
 0x436   : > { %v2705_v36 = vpop.f32.mrf.mxu3 }
 0x437   : > { %v2706_v33 = vadd.f32 %v2705_v36, %v2641_v28 }
 0x438   : > { %v2578_v32 = vpop.f32.mrf.mxu1 }
 0x439   : > { %v2740_v38 = vmax.f32 %v2706_v33, 0.0  ;;  %v2579_v46 = vadd.f32 %v2578_v32, %v2514_v47 }
 0x43b   : > { %2772 = vst [vmem:[%s5579_s11 + $0xe8] sm:$0xff] %v2740_v38  ;;  %v2741_v30 = vmax.f32 %v2579_v46, 0.0 }
 0x43d   : > { %2773 = vst [vmem:[%s5579_s11 + $0xf0] sm:$0xff] %v2741_v30 }
 0x43e   : > { %v2708_v45 = vpop.f32.mrf.mxu3 }
 0x43f   : > { %v2709_v40 = vadd.f32 %v2708_v45, %v2644_v4 }
 0x441   : > { %v2742_v16 = vmax.f32 %v2709_v40, 0.0 }
 0x443   : > { %2774 = vst [vmem:[%s5579_s11 + $0xf8] sm:$0xff] %v2742_v16 }
 0x444   : > { %3533 = shalt.err (!%p3530_p13)
}
 0x445   : > { %s3685_s16 = smov 256   ;;  %s3686_s11 = smov 16  }
 0x446   : > { %3046 = dma.vmem_to_hbm [thread:$0]  (%p3943_p5), %s2792_s21, 4096, %s2794_s29, %s2776_s12, %s3685_s16, %s3685_s16, %s3686_s11  }
 0x447 PF: > { %p3079_p12 = scmp.ge.s32.totalorder %s3668_s26, 2  ;;  %s2808_s8 = sand.u32 1, %s3640_s19  }
 0x448   : > { %s2809_s10 = scalar_lea.sflag [#allocation4], %s2808_s8 }
 0x449   : > { %p3069_p7 = pnand %p3079_p12, %p3947_p11 }
 0x44b   : > { %p3070_p6 = pneg %p3069_p7 }
 0x44d   : > { %3611 = dma.done.wait (%p3070_p6), %s2809_s10, 4096  }
 0x44e   : > { %3613 = vsyncadd (%p3070_p6), %s2809_s10, 4294963200  ;;  %s31_s26 = sadd.s32 1, %s3668_s26   ;;  %s6061_s13 = sld [smem:[#allocation21_spill]] }
 0x44f   : > { %p5665_p1 = scmp.ge.s32.totalorder %s31_s26, 6   ;;  %s6062_s16 = sld [smem:[#allocation22_spill]] }
 0x450   : > { %s6063_s17 = sld [smem:[#allocation23_spill]]  ;;  %s6072_s14 = smov %s3624_s15 }
 0x451   : > { %s6064_s18 = sld [smem:[#allocation35_spill]]  ;;  %s6073_s15 = smov %s3989_s23 }
 0x452   : > { %s6065_s22 = sld [smem:[#allocation24_spill]]  ;;  %s6074_s19 = smov %s3644_s20 }
 0x453   : > { %s6066_s21 = sld [smem:[#allocation36_spill]] }
 0x454   : > { %s6067_s0 = sld [smem:[#allocation27_spill]] }
 0x455   : > { %s6068_s2 = sld [smem:[#allocation28_spill]] }
 0x456   : > { %s6069_s30 = sld [smem:[#allocation30_spill]] }
 0x457   : > { %s6070_s25 = sld [smem:[#allocation31_spill]] }
 0x458   : > { %s6075_s20 = smov %s6065_s22  ;;  %30 = sbr.rel (!%p5665_p1) target bundleno = 26 (0x1a), region = 141 }
 0x45a   : > { %s6076_s22 = smov %s6067_s0 }
 0x45b   : > { %s6077_s23 = smov %s6068_s2 }
 0x45c   : > { %s6078_s24 = smov %s6069_s30 }
 0x45d   :  { %2815 = vsyncpa [#allocation3], 1 }
 0x45e   :  { %2817 = vsyncpa [#allocation3 + $0x1], 1 }
 0x45f   :  { %2818 = vsyncpa [#allocation6], 1 }
 0x460   :  { %2820 = vsyncpa [#allocation6 + $0x1], 1 }
 0x461   :  { %2821 = vsyncpa [#allocation9], 1 }
 0x462   :  { %2822 = vsyncpa [#allocation12], 1 }
 0x463   :  { %2823 = vsyncpa [#allocation4], 1 }
 0x464   :  { %2825 = vsyncpa [#allocation4 + $0x1], 1 }

</bundles_post_ra>
